<compile_context>
chip_gen: v5e
topology: v5e:2x2
jax: 0.10.0
libtpu: 0.0.40
codegen_flags: <defaults>
</compile_context>

<pallas_src>
import jax
import jax.numpy as jnp
from jax.experimental import pallas as pl
from jax.experimental.pallas import tpu as pltpu

LANE = 128


def _round_up(n, m):
    return ((n + m - 1) // m) * m


def _pick_tile_h(H, W, target_rows=512):
    """Largest divisor of H such that TH*W <= target_rows (>=1)."""
    th = 1
    for c in range(1, H + 1):
        if H % c == 0 and c * W <= target_rows:
            th = c
    return th


# ----------------------------- kernels --------------------------------------

def conv3x3_stats_kernel(x_ref, w_ref, y_ref, stats_ref):
    """3x3 same-pad conv tile + per-channel partial BN statistics.

    x_ref:     (1, H+2, W+2, Cin)   full zero-padded image of this batch elem
                                    (block index depends only on b -> stays
                                    resident in VMEM across Cout/H tiles)
    w_ref:     (3, 3*Cin, TC)       weights for this Cout slab, dx folded into K
    y_ref:     (1, TH, W, TC)       conv output tile (bf16)
    stats_ref: (1, 1, 2, TC)        [sum, sumsq] over this tile (f32)
    """
    TH, W, TC = y_ref.shape[1], y_ref.shape[2], y_ref.shape[3]
    Cin = x_ref.shape[3]

    r0 = pl.multiple_of(pl.program_id(2) * TH, TH)  # first padded row of the band

    acc = jnp.zeros((TH * W, TC), jnp.float32)
    for dy in range(3):
        rows = x_ref[0, pl.ds(r0 + dy, TH), :, :]          # (TH, W+2, Cin)
        # im2col along dx only: K = 3*Cin, one MXU matmul per dy.
        patch = jnp.concatenate(
            [rows[:, 0:W, :], rows[:, 1:W + 1, :], rows[:, 2:W + 2, :]],
            axis=-1,
        ).reshape(TH * W, 3 * Cin)
        acc = acc + jnp.dot(patch, w_ref[dy],
                            preferred_element_type=jnp.float32)

    y_ref[...] = acc.reshape(1, TH, W, TC).astype(y_ref.dtype)

    s = jnp.sum(acc, axis=0).reshape(1, TC)
    ss = jnp.sum(acc * acc, axis=0).reshape(1, TC)
    stats_ref[...] = jnp.concatenate([s, ss], axis=0).reshape(1, 1, 2, TC)


def scale_relu_kernel(y_ref, scale_ref, shift_ref, o_ref):
    """y * scale + shift, ReLU.  scale/shift already fold BN mean/var/gamma/beta."""
    y = y_ref[...].astype(jnp.float32)
    scale = scale_ref[...].reshape(1, 1, 1, -1)
    shift = shift_ref[...].reshape(1, 1, 1, -1)
    o_ref[...] = jnp.maximum(y * scale + shift, 0.0).astype(o_ref.dtype)


# ----------------------------- wrappers --------------------------------------

def conv3x3_with_stats(x, w):
    """x: (B,H,W,Cin) bf16, w: (3,3,Cin,Cp) bf16 (Cp multiple of 128).

    Returns (y (B,H,W,Cp) bf16, partial stats (B, n_h, 2, Cp) f32)."""
    B, H, W, Cin = x.shape
    Cp = w.shape[-1]
    TC = LANE
    n_co = Cp // TC
    TH = _pick_tile_h(H, W)
    n_h = H // TH

    xp = jnp.pad(x, ((0, 0), (1, 1), (1, 1), (0, 0)))       # spatial zero pad
    wr = w.reshape(3, 3 * Cin, Cp)                          # fold dx into K

    return pl.pallas_call(
        conv3x3_stats_kernel,
        out_shape=(
            jax.ShapeDtypeStruct((B, H, W, Cp), x.dtype),
            jax.ShapeDtypeStruct((B, n_h, 2, Cp), jnp.float32),
        ),
        grid=(B, n_co, n_h),
        in_specs=[
            pl.BlockSpec((1, H + 2, W + 2, Cin), lambda b, co, h: (b, 0, 0, 0)),
            pl.BlockSpec((3, 3 * Cin, TC), lambda b, co, h: (0, 0, co)),
        ],
        out_specs=(
            pl.BlockSpec((1, TH, W, TC), lambda b, co, h: (b, h, 0, co)),
            pl.BlockSpec((1, 1, 2, TC), lambda b, co, h: (b, h, 0, co)),
        ),
        compiler_params=pltpu.CompilerParams(
            dimension_semantics=("parallel", "parallel", "parallel"),
            vmem_limit_bytes=64 * 1024 * 1024,
        ),
    )(xp, wr)


def bn_relu_apply(y, stats, gamma, beta, eps=1e-5):
    """Finalize batch stats (tiny JAX reduce) then tiled normalize + ReLU."""
    B, H, W, Cp = y.shape
    cnt = B * H * W
    s = jnp.sum(stats, axis=(0, 1))                          # (2, Cp) f32
    mean = s[0] / cnt
    var = jnp.maximum(s[1] / cnt - mean * mean, 0.0)         # biased, like PyTorch
    scale = (gamma * jax.lax.rsqrt(var + eps)).astype(jnp.float32)
    shift = (beta - mean * scale).astype(jnp.float32)

    TC = LANE
    n_co = Cp // TC
    TH = _pick_tile_h(H, W)
    n_h = H // TH

    return pl.pallas_call(
        scale_relu_kernel,
        out_shape=jax.ShapeDtypeStruct((B, H, W, Cp), y.dtype),
        grid=(B, n_h, n_co),
        in_specs=[
            pl.BlockSpec((1, TH, W, TC), lambda b, h, co: (b, h, 0, co)),
            pl.BlockSpec((1, TC), lambda b, h, co: (0, co)),
            pl.BlockSpec((1, TC), lambda b, h, co: (0, co)),
        ],
        out_specs=pl.BlockSpec((1, TH, W, TC), lambda b, h, co: (b, h, 0, co)),
        compiler_params=pltpu.CompilerParams(
            dimension_semantics=("parallel", "parallel", "parallel"),
            vmem_limit_bytes=64 * 1024 * 1024,
        ),
    )(y, scale.reshape(1, Cp), shift.reshape(1, Cp))


def decoder_block_forward(x_nchw, skip_nchw, params):
    """Matches DecoderBlock.forward((x, skip)). NCHW in / NCHW out like PyTorch."""
    orig_dtype = x_nchw.dtype

    # NCHW -> NHWC (bf16 activations for the MXU / half the HBM traffic)
    x = jnp.transpose(x_nchw, (0, 2, 3, 1)).astype(jnp.bfloat16)
    # F.interpolate(scale_factor=2, mode='nearest')
    x = jnp.repeat(jnp.repeat(x, 2, axis=1), 2, axis=2)
    if skip_nchw is not None:
        skip = jnp.transpose(skip_nchw, (0, 2, 3, 1)).astype(jnp.bfloat16)
        x = jnp.concatenate([x, skip], axis=-1)              # torch.cat(dim=1)

    w1, w2 = params["w1"], params["w2"]                      # HWIO
    Cout = w1.shape[-1]
    Cp = _round_up(Cout, LANE)                               # lane-dense channels

    w1p = jnp.pad(w1, ((0, 0), (0, 0), (0, 0), (0, Cp - Cout))).astype(jnp.bfloat16)
    w2p = jnp.pad(w2, ((0, 0), (0, 0), (0, Cp - Cout), (0, Cp - Cout))).astype(jnp.bfloat16)
    g1 = jnp.pad(params["gamma1"].reshape(-1).astype(jnp.float32),
                 (0, Cp - Cout), constant_values=1.0)
    b1 = jnp.pad(params["beta1"].reshape(-1).astype(jnp.float32), (0, Cp - Cout))
    g2 = jnp.pad(params["gamma2"].reshape(-1).astype(jnp.float32),
                 (0, Cp - Cout), constant_values=1.0)
    b2 = jnp.pad(params["beta2"].reshape(-1).astype(jnp.float32), (0, Cp - Cout))

    # Conv2dReLU #1: conv3x3(no bias) -> BN(batch stats) -> ReLU
    y, st = conv3x3_with_stats(x, w1p)
    y = bn_relu_apply(y, st, g1, b1)
    # Conv2dReLU #2
    y, st = conv3x3_with_stats(y, w2p)
    y = bn_relu_apply(y, st, g2, b2)

    # drop channel padding, NHWC -> NCHW
    y = y[..., :Cout].astype(orig_dtype)
    return jnp.transpose(y, (0, 3, 1, 2))


# ----------------------------- demo ------------------------------------------

if __name__ == "__main__":
    key = jax.random.PRNGKey(0)
    k1, k2, k3, k4, k5 = jax.random.split(key, 5)

    # x is the low-res decoder feature; skip is the 2x-resolution skip tensor.
    B, Cx, Cskip, H, W = 2, 2, 2, 8, 8
    Cin, Cout = Cx + Cskip, 8           # DecoderBlock(in_channels=4, out_channels=8)

    x = jax.random.normal(k1, (B, Cx, H, W), jnp.float32)
    skip = jax.random.normal(k2, (B, Cskip, 2 * H, 2 * W), jnp.float32)

    params = dict(
        # conv weights stored HWIO (3, 3, Cin, Cout)
        w1=0.1 * jax.random.normal(k3, (3, 3, Cin, Cout), jnp.float32),
        gamma1=1.0 + 0.1 * jax.random.normal(k5, (1, Cout), jnp.float32),
        beta1=0.05 * jnp.ones((1, Cout), jnp.float32),
        w2=0.1 * jax.random.normal(k4, (3, 3, Cout, Cout), jnp.float32),
        gamma2=jnp.ones((1, Cout), jnp.float32),
        beta2=jnp.zeros((1, Cout), jnp.float32),
    )

    out = jax.jit(decoder_block_forward)(x, skip, params)
    jax.block_until_ready(out)
    assert out.shape == (B, Cout, 2 * H, 2 * W), out.shape
    assert bool(jnp.all(jnp.isfinite(out)))
    print("KERNEL_OK")
</pallas_src>

<mosaic_0001>
module attributes {stable_mosaic.version = 11 : i64} {
  func.func @conv3x3_stats_kernel(%arg0: i32, %arg1: i32, %arg2: i32, %arg3: memref<1x18x18x4xbf16, #tpu.memory_space<vmem>>, %arg4: memref<3x12x128xbf16, #tpu.memory_space<vmem>>, %arg5: memref<1x16x16x128xbf16, #tpu.memory_space<vmem>>, %arg6: memref<1x1x2x128xf32, #tpu.memory_space<vmem>>) attributes {dimension_semantics = [#tpu.dimension_semantics<parallel>, #tpu.dimension_semantics<parallel>, #tpu.dimension_semantics<parallel>], iteration_bounds = array<i64: 2, 1, 1>, scalar_prefetch = 0 : i64, scratch_operands = 0 : i64, tpu.core_type = #tpu.core_type<tc>, window_params = [{transform_indices = @transform_0, window_bounds = array<i64: 1, 18, 18, 4>}, {transform_indices = @transform_1, window_bounds = array<i64: 3, 12, 128>}, {transform_indices = @transform_2, window_bounds = array<i64: 1, 16, 16, 128>}, {transform_indices = @transform_3, window_bounds = array<i64: 1, 1, 2, 128>}]} {
    %c16_i32 = arith.constant 16 : i32
    %0 = arith.muli %arg2, %c16_i32 : i32
    %1 = tpu.assume_multiple %0, 16 : i32
    %cst = arith.constant 0.000000e+00 : f32
    %2 = vector.broadcast %cst : f32 to vector<256x128xf32>
    %c0_i32 = arith.constant 0 : i32
    %3 = arith.addi %1, %c0_i32 : i32
    %c0 = arith.constant 0 : index
    %4 = arith.index_cast %3 : i32 to index
    %c0_0 = arith.constant 0 : index
    %c0_1 = arith.constant 0 : index
    %5 = vector.load %arg3[%c0, %4, %c0_0, %c0_1] : memref<1x18x18x4xbf16, #tpu.memory_space<vmem>>, vector<1x16x18x4xbf16>
    %6 = vector.shape_cast %5 : vector<1x16x18x4xbf16> to vector<16x18x4xbf16>
    %7 = vector.extract_strided_slice %6 {offsets = [0, 0, 0], sizes = [16, 16, 4], strides = [1, 1, 1]} : vector<16x18x4xbf16> to vector<16x16x4xbf16>
    %8 = vector.extract_strided_slice %6 {offsets = [0, 1, 0], sizes = [16, 16, 4], strides = [1, 1, 1]} : vector<16x18x4xbf16> to vector<16x16x4xbf16>
    %9 = vector.extract_strided_slice %6 {offsets = [0, 2, 0], sizes = [16, 16, 4], strides = [1, 1, 1]} : vector<16x18x4xbf16> to vector<16x16x4xbf16>
    %10 = tpu.concatenate %7, %8, %9 in 2 : vector<16x16x4xbf16>, vector<16x16x4xbf16>, vector<16x16x4xbf16> -> vector<16x16x12xbf16>
    %11 = vector.shape_cast %10 : vector<16x16x12xbf16> to vector<256x12xbf16>
    %c0_2 = arith.constant 0 : index
    %c0_3 = arith.constant 0 : index
    %c0_4 = arith.constant 0 : index
    %12 = vector.load %arg4[%c0_2, %c0_3, %c0_4] : memref<3x12x128xbf16, #tpu.memory_space<vmem>>, vector<1x12x128xbf16>
    %13 = vector.shape_cast %12 : vector<1x12x128xbf16> to vector<12x128xbf16>
    %cst_5 = arith.constant dense<0.000000e+00> : vector<256x128xf32>
    %14 = tpu.matmul %11, %13, %cst_5 {dimension_numbers = #tpu.dot_dimension_numbers<[1], [0], [0], [1], [0, 0, 1, 1], [], []>} : vector<256x12xbf16>, vector<12x128xbf16>, vector<256x128xf32> -> vector<256x128xf32>
    %15 = arith.addf %2, %14 : vector<256x128xf32>
    %c1_i32 = arith.constant 1 : i32
    %16 = arith.addi %1, %c1_i32 : i32
    %c0_6 = arith.constant 0 : index
    %17 = arith.index_cast %16 : i32 to index
    %c0_7 = arith.constant 0 : index
    %c0_8 = arith.constant 0 : index
    %18 = vector.load %arg3[%c0_6, %17, %c0_7, %c0_8] : memref<1x18x18x4xbf16, #tpu.memory_space<vmem>>, vector<1x16x18x4xbf16>
    %19 = vector.shape_cast %18 : vector<1x16x18x4xbf16> to vector<16x18x4xbf16>
    %20 = vector.extract_strided_slice %19 {offsets = [0, 0, 0], sizes = [16, 16, 4], strides = [1, 1, 1]} : vector<16x18x4xbf16> to vector<16x16x4xbf16>
    %21 = vector.extract_strided_slice %19 {offsets = [0, 1, 0], sizes = [16, 16, 4], strides = [1, 1, 1]} : vector<16x18x4xbf16> to vector<16x16x4xbf16>
    %22 = vector.extract_strided_slice %19 {offsets = [0, 2, 0], sizes = [16, 16, 4], strides = [1, 1, 1]} : vector<16x18x4xbf16> to vector<16x16x4xbf16>
    %23 = tpu.concatenate %20, %21, %22 in 2 : vector<16x16x4xbf16>, vector<16x16x4xbf16>, vector<16x16x4xbf16> -> vector<16x16x12xbf16>
    %24 = vector.shape_cast %23 : vector<16x16x12xbf16> to vector<256x12xbf16>
    %c1 = arith.constant 1 : index
    %c0_9 = arith.constant 0 : index
    %c0_10 = arith.constant 0 : index
    %25 = vector.load %arg4[%c1, %c0_9, %c0_10] : memref<3x12x128xbf16, #tpu.memory_space<vmem>>, vector<1x12x128xbf16>
    %26 = vector.shape_cast %25 : vector<1x12x128xbf16> to vector<12x128xbf16>
    %cst_11 = arith.constant dense<0.000000e+00> : vector<256x128xf32>
    %27 = tpu.matmul %24, %26, %cst_11 {dimension_numbers = #tpu.dot_dimension_numbers<[1], [0], [0], [1], [0, 0, 1, 1], [], []>} : vector<256x12xbf16>, vector<12x128xbf16>, vector<256x128xf32> -> vector<256x128xf32>
    %28 = arith.addf %15, %27 : vector<256x128xf32>
    %c2_i32 = arith.constant 2 : i32
    %29 = arith.addi %1, %c2_i32 : i32
    %c0_12 = arith.constant 0 : index
    %30 = arith.index_cast %29 : i32 to index
    %c0_13 = arith.constant 0 : index
    %c0_14 = arith.constant 0 : index
    %31 = vector.load %arg3[%c0_12, %30, %c0_13, %c0_14] : memref<1x18x18x4xbf16, #tpu.memory_space<vmem>>, vector<1x16x18x4xbf16>
    %32 = vector.shape_cast %31 : vector<1x16x18x4xbf16> to vector<16x18x4xbf16>
    %33 = vector.extract_strided_slice %32 {offsets = [0, 0, 0], sizes = [16, 16, 4], strides = [1, 1, 1]} : vector<16x18x4xbf16> to vector<16x16x4xbf16>
    %34 = vector.extract_strided_slice %32 {offsets = [0, 1, 0], sizes = [16, 16, 4], strides = [1, 1, 1]} : vector<16x18x4xbf16> to vector<16x16x4xbf16>
    %35 = vector.extract_strided_slice %32 {offsets = [0, 2, 0], sizes = [16, 16, 4], strides = [1, 1, 1]} : vector<16x18x4xbf16> to vector<16x16x4xbf16>
    %36 = tpu.concatenate %33, %34, %35 in 2 : vector<16x16x4xbf16>, vector<16x16x4xbf16>, vector<16x16x4xbf16> -> vector<16x16x12xbf16>
    %37 = vector.shape_cast %36 : vector<16x16x12xbf16> to vector<256x12xbf16>
    %c2 = arith.constant 2 : index
    %c0_15 = arith.constant 0 : index
    %c0_16 = arith.constant 0 : index
    %38 = vector.load %arg4[%c2, %c0_15, %c0_16] : memref<3x12x128xbf16, #tpu.memory_space<vmem>>, vector<1x12x128xbf16>
    %39 = vector.shape_cast %38 : vector<1x12x128xbf16> to vector<12x128xbf16>
    %cst_17 = arith.constant dense<0.000000e+00> : vector<256x128xf32>
    %40 = tpu.matmul %37, %39, %cst_17 {dimension_numbers = #tpu.dot_dimension_numbers<[1], [0], [0], [1], [0, 0, 1, 1], [], []>} : vector<256x12xbf16>, vector<12x128xbf16>, vector<256x128xf32> -> vector<256x128xf32>
    %41 = arith.addf %28, %40 : vector<256x128xf32>
    %42 = vector.shape_cast %41 : vector<256x128xf32> to vector<1x16x16x128xf32>
    %43 = arith.truncf %42 : vector<1x16x16x128xf32> to vector<1x16x16x128xbf16>
    %c0_18 = arith.constant 0 : index
    %c0_19 = arith.constant 0 : index
    %c0_20 = arith.constant 0 : index
    %c0_21 = arith.constant 0 : index
    %44 = vector.load %arg5[%c0_18, %c0_19, %c0_20, %c0_21] : memref<1x16x16x128xbf16, #tpu.memory_space<vmem>>, vector<1x16x16x128xbf16>
    tpu.vector_store %arg5[%c0_18, %c0_19, %c0_20, %c0_21], %43 {strides = array<i32>} : memref<1x16x16x128xbf16, #tpu.memory_space<vmem>>, vector<1x16x16x128xbf16>,
    %cst_22 = arith.constant dense<0.000000e+00> : vector<128xf32>
    %45 = vector.multi_reduction <add>, %41, %cst_22 [0] : vector<256x128xf32> to vector<128xf32>
    %46 = vector.shape_cast %45 : vector<128xf32> to vector<1x128xf32>
    %47 = arith.mulf %41, %41 : vector<256x128xf32>
    %cst_23 = arith.constant dense<0.000000e+00> : vector<128xf32>
    %48 = vector.multi_reduction <add>, %47, %cst_23 [0] : vector<256x128xf32> to vector<128xf32>
    %49 = vector.shape_cast %48 : vector<128xf32> to vector<1x128xf32>
    %50 = tpu.concatenate %46, %49 in 0 : vector<1x128xf32>, vector<1x128xf32> -> vector<2x128xf32>
    %51 = vector.shape_cast %50 : vector<2x128xf32> to vector<1x1x2x128xf32>
    %c0_24 = arith.constant 0 : index
    %c0_25 = arith.constant 0 : index
    %c0_26 = arith.constant 0 : index
    %c0_27 = arith.constant 0 : index
    %52 = vector.load %arg6[%c0_24, %c0_25, %c0_26, %c0_27] : memref<1x1x2x128xf32, #tpu.memory_space<vmem>>, vector<1x1x2x128xf32>
    tpu.vector_store %arg6[%c0_24, %c0_25, %c0_26, %c0_27], %51 {strides = array<i32>} : memref<1x1x2x128xf32, #tpu.memory_space<vmem>>, vector<1x1x2x128xf32>,
    return
  }
  func.func @transform_0(%arg0: i32, %arg1: i32, %arg2: i32) -> (i32, i32, i32, i32) {
    %c0_i32 = arith.constant 0 : i32
    %c0_i32_0 = arith.constant 0 : i32
    %c0_i32_1 = arith.constant 0 : i32
    %c0_i32_2 = arith.constant 0 : i32
    return %arg0, %c0_i32, %c0_i32_0, %c0_i32_1 : i32, i32, i32, i32
  }
  func.func @transform_1(%arg0: i32, %arg1: i32, %arg2: i32) -> (i32, i32, i32) {
    %c0_i32 = arith.constant 0 : i32
    %c0_i32_0 = arith.constant 0 : i32
    %c0_i32_1 = arith.constant 0 : i32
    return %c0_i32, %c0_i32_0, %arg1 : i32, i32, i32
  }
  func.func @transform_2(%arg0: i32, %arg1: i32, %arg2: i32) -> (i32, i32, i32, i32) {
    %c0_i32 = arith.constant 0 : i32
    %c0_i32_0 = arith.constant 0 : i32
    return %arg0, %arg2, %c0_i32, %arg1 : i32, i32, i32, i32
  }
  func.func @transform_3(%arg0: i32, %arg1: i32, %arg2: i32) -> (i32, i32, i32, i32) {
    %c0_i32 = arith.constant 0 : i32
    %c0_i32_0 = arith.constant 0 : i32
    return %arg0, %arg2, %c0_i32, %arg1 : i32, i32, i32, i32
  }
}

module attributes {stable_mosaic.version = 11 : i64} {
  func.func @scale_relu_kernel(%arg0: i32, %arg1: i32, %arg2: i32, %arg3: memref<1x16x16x128xbf16, #tpu.memory_space<vmem>>, %arg4: memref<1x128xf32, #tpu.memory_space<vmem>>, %arg5: memref<1x128xf32, #tpu.memory_space<vmem>>, %arg6: memref<1x16x16x128xbf16, #tpu.memory_space<vmem>>) attributes {dimension_semantics = [#tpu.dimension_semantics<parallel>, #tpu.dimension_semantics<parallel>, #tpu.dimension_semantics<parallel>], iteration_bounds = array<i64: 2, 1, 1>, scalar_prefetch = 0 : i64, scratch_operands = 0 : i64, tpu.core_type = #tpu.core_type<tc>, window_params = [{transform_indices = @transform_0, window_bounds = array<i64: 1, 16, 16, 128>}, {transform_indices = @transform_1, window_bounds = array<i64: 1, 128>}, {transform_indices = @transform_2, window_bounds = array<i64: 1, 128>}, {transform_indices = @transform_3, window_bounds = array<i64: 1, 16, 16, 128>}]} {
    %c0 = arith.constant 0 : index
    %c0_0 = arith.constant 0 : index
    %c0_1 = arith.constant 0 : index
    %c0_2 = arith.constant 0 : index
    %0 = vector.load %arg3[%c0, %c0_0, %c0_1, %c0_2] : memref<1x16x16x128xbf16, #tpu.memory_space<vmem>>, vector<1x16x16x128xbf16>
    %1 = arith.extf %0 : vector<1x16x16x128xbf16> to vector<1x16x16x128xf32>
    %c0_3 = arith.constant 0 : index
    %c0_4 = arith.constant 0 : index
    %2 = vector.load %arg4[%c0_3, %c0_4] : memref<1x128xf32, #tpu.memory_space<vmem>>, vector<1x128xf32>
    %3 = vector.shape_cast %2 : vector<1x128xf32> to vector<1x1x1x128xf32>
    %c0_5 = arith.constant 0 : index
    %c0_6 = arith.constant 0 : index
    %4 = vector.load %arg5[%c0_5, %c0_6] : memref<1x128xf32, #tpu.memory_space<vmem>>, vector<1x128xf32>
    %5 = vector.shape_cast %4 : vector<1x128xf32> to vector<1x1x1x128xf32>
    %6 = vector.broadcast %3 : vector<1x1x1x128xf32> to vector<1x16x16x128xf32>
    %7 = arith.mulf %1, %6 : vector<1x16x16x128xf32>
    %8 = vector.broadcast %5 : vector<1x1x1x128xf32> to vector<1x16x16x128xf32>
    %9 = arith.addf %7, %8 : vector<1x16x16x128xf32>
    %cst = arith.constant 0.000000e+00 : f32
    %10 = vector.broadcast %cst : f32 to vector<1x16x16x128xf32>
    %11 = arith.maximumf %9, %10 : vector<1x16x16x128xf32>
    %12 = arith.truncf %11 : vector<1x16x16x128xf32> to vector<1x16x16x128xbf16>
    %c0_7 = arith.constant 0 : index
    %c0_8 = arith.constant 0 : index
    %c0_9 = arith.constant 0 : index
    %c0_10 = arith.constant 0 : index
    %13 = vector.load %arg6[%c0_7, %c0_8, %c0_9, %c0_10] : memref<1x16x16x128xbf16, #tpu.memory_space<vmem>>, vector<1x16x16x128xbf16>
    tpu.vector_store %arg6[%c0_7, %c0_8, %c0_9, %c0_10], %12 {strides = array<i32>} : memref<1x16x16x128xbf16, #tpu.memory_space<vmem>>, vector<1x16x16x128xbf16>,
    return
  }
  func.func @transform_0(%arg0: i32, %arg1: i32, %arg2: i32) -> (i32, i32, i32, i32) {
    %c0_i32 = arith.constant 0 : i32
    %c0_i32_0 = arith.constant 0 : i32
    return %arg0, %arg1, %c0_i32, %arg2 : i32, i32, i32, i32
  }
  func.func @transform_1(%arg0: i32, %arg1: i32, %arg2: i32) -> (i32, i32) {
    %c0_i32 = arith.constant 0 : i32
    %c0_i32_0 = arith.constant 0 : i32
    return %c0_i32, %arg2 : i32, i32
  }
  func.func @transform_2(%arg0: i32, %arg1: i32, %arg2: i32) -> (i32, i32) {
    %c0_i32 = arith.constant 0 : i32
    %c0_i32_0 = arith.constant 0 : i32
    return %c0_i32, %arg2 : i32, i32
  }
  func.func @transform_3(%arg0: i32, %arg1: i32, %arg2: i32) -> (i32, i32, i32, i32) {
    %c0_i32 = arith.constant 0 : i32
    %c0_i32_0 = arith.constant 0 : i32
    return %arg0, %arg1, %c0_i32, %arg2 : i32, i32, i32, i32
  }
}

module attributes {stable_mosaic.version = 11 : i64} {
  func.func @conv3x3_stats_kernel(%arg0: i32, %arg1: i32, %arg2: i32, %arg3: memref<1x18x18x128xbf16, #tpu.memory_space<vmem>>, %arg4: memref<3x384x128xbf16, #tpu.memory_space<vmem>>, %arg5: memref<1x16x16x128xbf16, #tpu.memory_space<vmem>>, %arg6: memref<1x1x2x128xf32, #tpu.memory_space<vmem>>) attributes {dimension_semantics = [#tpu.dimension_semantics<parallel>, #tpu.dimension_semantics<parallel>, #tpu.dimension_semantics<parallel>], iteration_bounds = array<i64: 2, 1, 1>, scalar_prefetch = 0 : i64, scratch_operands = 0 : i64, tpu.core_type = #tpu.core_type<tc>, window_params = [{transform_indices = @transform_0, window_bounds = array<i64: 1, 18, 18, 128>}, {transform_indices = @transform_1, window_bounds = array<i64: 3, 384, 128>}, {transform_indices = @transform_2, window_bounds = array<i64: 1, 16, 16, 128>}, {transform_indices = @transform_3, window_bounds = array<i64: 1, 1, 2, 128>}]} {
    %c16_i32 = arith.constant 16 : i32
    %0 = arith.muli %arg2, %c16_i32 : i32
    %1 = tpu.assume_multiple %0, 16 : i32
    %cst = arith.constant 0.000000e+00 : f32
    %2 = vector.broadcast %cst : f32 to vector<256x128xf32>
    %c0_i32 = arith.constant 0 : i32
    %3 = arith.addi %1, %c0_i32 : i32
    %c0 = arith.constant 0 : index
    %4 = arith.index_cast %3 : i32 to index
    %c0_0 = arith.constant 0 : index
    %c0_1 = arith.constant 0 : index
    %5 = vector.load %arg3[%c0, %4, %c0_0, %c0_1] : memref<1x18x18x128xbf16, #tpu.memory_space<vmem>>, vector<1x16x18x128xbf16>
    %6 = vector.shape_cast %5 : vector<1x16x18x128xbf16> to vector<16x18x128xbf16>
    %7 = vector.extract_strided_slice %6 {offsets = [0, 0, 0], sizes = [16, 16, 128], strides = [1, 1, 1]} : vector<16x18x128xbf16> to vector<16x16x128xbf16>
    %8 = vector.extract_strided_slice %6 {offsets = [0, 1, 0], sizes = [16, 16, 128], strides = [1, 1, 1]} : vector<16x18x128xbf16> to vector<16x16x128xbf16>
    %9 = vector.extract_strided_slice %6 {offsets = [0, 2, 0], sizes = [16, 16, 128], strides = [1, 1, 1]} : vector<16x18x128xbf16> to vector<16x16x128xbf16>
    %10 = tpu.concatenate %7, %8, %9 in 2 : vector<16x16x128xbf16>, vector<16x16x128xbf16>, vector<16x16x128xbf16> -> vector<16x16x384xbf16>
    %11 = vector.shape_cast %10 : vector<16x16x384xbf16> to vector<256x384xbf16>
    %c0_2 = arith.constant 0 : index
    %c0_3 = arith.constant 0 : index
    %c0_4 = arith.constant 0 : index
    %12 = vector.load %arg4[%c0_2, %c0_3, %c0_4] : memref<3x384x128xbf16, #tpu.memory_space<vmem>>, vector<1x384x128xbf16>
    %13 = vector.shape_cast %12 : vector<1x384x128xbf16> to vector<384x128xbf16>
    %cst_5 = arith.constant dense<0.000000e+00> : vector<256x128xf32>
    %14 = tpu.matmul %11, %13, %cst_5 {dimension_numbers = #tpu.dot_dimension_numbers<[1], [0], [0], [1], [0, 0, 1, 1], [], []>} : vector<256x384xbf16>, vector<384x128xbf16>, vector<256x128xf32> -> vector<256x128xf32>
    %15 = arith.addf %2, %14 : vector<256x128xf32>
    %c1_i32 = arith.constant 1 : i32
    %16 = arith.addi %1, %c1_i32 : i32
    %c0_6 = arith.constant 0 : index
    %17 = arith.index_cast %16 : i32 to index
    %c0_7 = arith.constant 0 : index
    %c0_8 = arith.constant 0 : index
    %18 = vector.load %arg3[%c0_6, %17, %c0_7, %c0_8] : memref<1x18x18x128xbf16, #tpu.memory_space<vmem>>, vector<1x16x18x128xbf16>
    %19 = vector.shape_cast %18 : vector<1x16x18x128xbf16> to vector<16x18x128xbf16>
    %20 = vector.extract_strided_slice %19 {offsets = [0, 0, 0], sizes = [16, 16, 128], strides = [1, 1, 1]} : vector<16x18x128xbf16> to vector<16x16x128xbf16>
    %21 = vector.extract_strided_slice %19 {offsets = [0, 1, 0], sizes = [16, 16, 128], strides = [1, 1, 1]} : vector<16x18x128xbf16> to vector<16x16x128xbf16>
    %22 = vector.extract_strided_slice %19 {offsets = [0, 2, 0], sizes = [16, 16, 128], strides = [1, 1, 1]} : vector<16x18x128xbf16> to vector<16x16x128xbf16>
    %23 = tpu.concatenate %20, %21, %22 in 2 : vector<16x16x128xbf16>, vector<16x16x128xbf16>, vector<16x16x128xbf16> -> vector<16x16x384xbf16>
    %24 = vector.shape_cast %23 : vector<16x16x384xbf16> to vector<256x384xbf16>
    %c1 = arith.constant 1 : index
    %c0_9 = arith.constant 0 : index
    %c0_10 = arith.constant 0 : index
    %25 = vector.load %arg4[%c1, %c0_9, %c0_10] : memref<3x384x128xbf16, #tpu.memory_space<vmem>>, vector<1x384x128xbf16>
    %26 = vector.shape_cast %25 : vector<1x384x128xbf16> to vector<384x128xbf16>
    %cst_11 = arith.constant dense<0.000000e+00> : vector<256x128xf32>
    %27 = tpu.matmul %24, %26, %cst_11 {dimension_numbers = #tpu.dot_dimension_numbers<[1], [0], [0], [1], [0, 0, 1, 1], [], []>} : vector<256x384xbf16>, vector<384x128xbf16>, vector<256x128xf32> -> vector<256x128xf32>
    %28 = arith.addf %15, %27 : vector<256x128xf32>
    %c2_i32 = arith.constant 2 : i32
    %29 = arith.addi %1, %c2_i32 : i32
    %c0_12 = arith.constant 0 : index
    %30 = arith.index_cast %29 : i32 to index
    %c0_13 = arith.constant 0 : index
    %c0_14 = arith.constant 0 : index
    %31 = vector.load %arg3[%c0_12, %30, %c0_13, %c0_14] : memref<1x18x18x128xbf16, #tpu.memory_space<vmem>>, vector<1x16x18x128xbf16>
    %32 = vector.shape_cast %31 : vector<1x16x18x128xbf16> to vector<16x18x128xbf16>
    %33 = vector.extract_strided_slice %32 {offsets = [0, 0, 0], sizes = [16, 16, 128], strides = [1, 1, 1]} : vector<16x18x128xbf16> to vector<16x16x128xbf16>
    %34 = vector.extract_strided_slice %32 {offsets = [0, 1, 0], sizes = [16, 16, 128], strides = [1, 1, 1]} : vector<16x18x128xbf16> to vector<16x16x128xbf16>
    %35 = vector.extract_strided_slice %32 {offsets = [0, 2, 0], sizes = [16, 16, 128], strides = [1, 1, 1]} : vector<16x18x128xbf16> to vector<16x16x128xbf16>
    %36 = tpu.concatenate %33, %34, %35 in 2 : vector<16x16x128xbf16>, vector<16x16x128xbf16>, vector<16x16x128xbf16> -> vector<16x16x384xbf16>
    %37 = vector.shape_cast %36 : vector<16x16x384xbf16> to vector<256x384xbf16>
    %c2 = arith.constant 2 : index
    %c0_15 = arith.constant 0 : index
    %c0_16 = arith.constant 0 : index
    %38 = vector.load %arg4[%c2, %c0_15, %c0_16] : memref<3x384x128xbf16, #tpu.memory_space<vmem>>, vector<1x384x128xbf16>
    %39 = vector.shape_cast %38 : vector<1x384x128xbf16> to vector<384x128xbf16>
    %cst_17 = arith.constant dense<0.000000e+00> : vector<256x128xf32>
    %40 = tpu.matmul %37, %39, %cst_17 {dimension_numbers = #tpu.dot_dimension_numbers<[1], [0], [0], [1], [0, 0, 1, 1], [], []>} : vector<256x384xbf16>, vector<384x128xbf16>, vector<256x128xf32> -> vector<256x128xf32>
    %41 = arith.addf %28, %40 : vector<256x128xf32>
    %42 = vector.shape_cast %41 : vector<256x128xf32> to vector<1x16x16x128xf32>
    %43 = arith.truncf %42 : vector<1x16x16x128xf32> to vector<1x16x16x128xbf16>
    %c0_18 = arith.constant 0 : index
    %c0_19 = arith.constant 0 : index
    %c0_20 = arith.constant 0 : index
    %c0_21 = arith.constant 0 : index
    %44 = vector.load %arg5[%c0_18, %c0_19, %c0_20, %c0_21] : memref<1x16x16x128xbf16, #tpu.memory_space<vmem>>, vector<1x16x16x128xbf16>
    tpu.vector_store %arg5[%c0_18, %c0_19, %c0_20, %c0_21], %43 {strides = array<i32>} : memref<1x16x16x128xbf16, #tpu.memory_space<vmem>>, vector<1x16x16x128xbf16>,
    %cst_22 = arith.constant dense<0.000000e+00> : vector<128xf32>
    %45 = vector.multi_reduction <add>, %41, %cst_22 [0] : vector<256x128xf32> to vector<128xf32>
    %46 = vector.shape_cast %45 : vector<128xf32> to vector<1x128xf32>
    %47 = arith.mulf %41, %41 : vector<256x128xf32>
    %cst_23 = arith.constant dense<0.000000e+00> : vector<128xf32>
    %48 = vector.multi_reduction <add>, %47, %cst_23 [0] : vector<256x128xf32> to vector<128xf32>
    %49 = vector.shape_cast %48 : vector<128xf32> to vector<1x128xf32>
    %50 = tpu.concatenate %46, %49 in 0 : vector<1x128xf32>, vector<1x128xf32> -> vector<2x128xf32>
    %51 = vector.shape_cast %50 : vector<2x128xf32> to vector<1x1x2x128xf32>
    %c0_24 = arith.constant 0 : index
    %c0_25 = arith.constant 0 : index
    %c0_26 = arith.constant 0 : index
    %c0_27 = arith.constant 0 : index
    %52 = vector.load %arg6[%c0_24, %c0_25, %c0_26, %c0_27] : memref<1x1x2x128xf32, #tpu.memory_space<vmem>>, vector<1x1x2x128xf32>
    tpu.vector_store %arg6[%c0_24, %c0_25, %c0_26, %c0_27], %51 {strides = array<i32>} : memref<1x1x2x128xf32, #tpu.memory_space<vmem>>, vector<1x1x2x128xf32>,
    return
  }
  func.func @transform_0(%arg0: i32, %arg1: i32, %arg2: i32) -> (i32, i32, i32, i32) {
    %c0_i32 = arith.constant 0 : i32
    %c0_i32_0 = arith.constant 0 : i32
    %c0_i32_1 = arith.constant 0 : i32
    %c0_i32_2 = arith.constant 0 : i32
    return %arg0, %c0_i32, %c0_i32_0, %c0_i32_1 : i32, i32, i32, i32
  }
  func.func @transform_1(%arg0: i32, %arg1: i32, %arg2: i32) -> (i32, i32, i32) {
    %c0_i32 = arith.constant 0 : i32
    %c0_i32_0 = arith.constant 0 : i32
    %c0_i32_1 = arith.constant 0 : i32
    return %c0_i32, %c0_i32_0, %arg1 : i32, i32, i32
  }
  func.func @transform_2(%arg0: i32, %arg1: i32, %arg2: i32) -> (i32, i32, i32, i32) {
    %c0_i32 = arith.constant 0 : i32
    %c0_i32_0 = arith.constant 0 : i32
    return %arg0, %arg2, %c0_i32, %arg1 : i32, i32, i32, i32
  }
  func.func @transform_3(%arg0: i32, %arg1: i32, %arg2: i32) -> (i32, i32, i32, i32) {
    %c0_i32 = arith.constant 0 : i32
    %c0_i32_0 = arith.constant 0 : i32
    return %arg0, %arg2, %c0_i32, %arg1 : i32, i32, i32, i32
  }
}

</mosaic_0001>

<bundles_post_ra>
// kernel: decoder_block_forward.5
= control target key start
LH: loop header
LB: loop body
LE: loop exit
PB: predicated region body
PF: predicated region fallthrough
CT: control target
= control target key end

     0   :  { %s896_s12 = smov 0   ;;  %s898_s13 = smov 0   ;;  %s1046_s0 = inlined_call_operand.vmem [shape: bf16[2,16,16,128], index: 0, kind: input, shape index: {}]   ;;  %s1047_s1 = inlined_call_operand.vmem [shape: f32[1,128], index: 1, kind: input, shape index: {}]   ;;  %s1048_s2 = inlined_call_operand.vmem [shape: f32[1,128], index: 2, kind: input, shape index: {}]   ;;  %s1049_s3 = inlined_call_operand.vmem [shape: bf16[2,16,16,128], index: 3, kind: output, shape index: {}]  }
   0x1   :  { %s900_s14 = smov 0  }
   0x2 LB: > { %s32_s15 = sadd.s32 1, %s870_s13  ;;  %p643_p0 = scmp.ge.s32.totalorder %s874_s14, 1  ;;  %s874_s14 = sphi %s900_s14, %s13_s14   ;;  %s870_s13 = sphi %s898_s13, %s1051_s13   ;;  %s866_s12 = sphi %s896_s12, %s1050_s12  }
   0x3   : > { %p34_p1 = scmp.ge.s32.totalorder %s32_s15, 2  ;;  %p189_p2 = scmp.lt.s32.totalorder %s874_s14, 3 }
   0x5   : > { %s1053_s15 = smov (%p34_p1, %s32_s15), 0  ;;  %p190_p3 = pnand %p643_p0, %p189_p2 }
   0x6   : > { %p236_p4 = scmp.lt.s32.totalorder (!%p190_p3), %s866_s12, 1 }
   0x7   : > { %193 = sbr.rel (%p190_p3) target bundleno = 58 (0x3a), region = 32 }
   0xc   : > { %s1055_s12 = smov (!%p236_p4, %s866_s12), 1  ;;  %v927_v0 = vld [vmem:[%s1047_s1] ss:$0 sm:$0xff] }
   0xd   : > { %s650_s16 = sshll.u32 %s1055_s12, 7  ;;  %v935_v6 = vld [vmem:[%s1048_s2] ss:$0 sm:$0xff] }
   0xe   : > { %s922_s19 = scalar_lea.vmem %s1046_s0, %s650_s16  ;;  %s961_s26 = scalar_lea.vmem %s1049_s3, %s650_s16 }
   0xf   : > { %v653_v1 = vld [vmem:[%s922_s19] sm:$0xff]   ;;  %v796_v2 = vld [vmem:[%s922_s19 + $0x8] sm:$0xff]   ;;  %v797_v3 = vld [vmem:[%s922_s19 + $0x10] sm:$0xff]  }
  0x10   : > { %v654_v4 = vunpack.c.l.bf16 %v653_v1  ;;  %v655_v5 = vunpack.c.h.bf16 %v653_v1  ;;  %v658_v7 = vunpack.c.l.bf16 %v796_v2  ;;  %v659_v8 = vunpack.c.h.bf16 %v796_v2  ;;  %v798_v9 = vld [vmem:[%s922_s19 + $0x18] sm:$0xff]   ;;  %v799_v30 = vld [vmem:[%s922_s19 + $0x20] sm:$0xff]   ;;  %v800_v35 = vld [vmem:[%s922_s19 + $0x28] sm:$0xff]  }
  0x11   : > { %v662_v10 = vunpack.c.l.bf16 %v797_v3  ;;  %v663_v11 = vunpack.c.h.bf16 %v797_v3  ;;  %v666_v12 = vunpack.c.l.bf16 %v798_v9  ;;  %v667_v13 = vunpack.c.h.bf16 %v798_v9  ;;  %v801_v40 = vld [vmem:[%s922_s19 + $0x30] sm:$0xff]   ;;  %v802_v45 = vld [vmem:[%s922_s19 + $0x38] sm:$0xff]   ;;  %v803_v3 = vld [vmem:[%s922_s19 + $0x40] sm:$0xff]  }
  0x12   : > { %v338_v14 = vmul.f32 %v927_v0, %v654_v4  ;;  %v339_v15 = vmul.f32 %v927_v0, %v655_v5  ;;  %v340_v16 = vmul.f32 %v927_v0, %v658_v7  ;;  %v341_v17 = vmul.f32 %v927_v0, %v659_v8 }
  0x13   : > { %v342_v18 = vmul.f32 %v927_v0, %v662_v10  ;;  %v343_v19 = vmul.f32 %v927_v0, %v663_v11  ;;  %v344_v20 = vmul.f32 %v927_v0, %v666_v12  ;;  %v345_v21 = vmul.f32 %v927_v0, %v667_v13  ;;  %v804_v13 = vld [vmem:[%s922_s19 + $0x48] sm:$0xff]  }
  0x14   : > { %v373_v22 = vadd.f32 %v935_v6, %v338_v14  ;;  %v374_v23 = vadd.f32 %v935_v6, %v339_v15  ;;  %v375_v24 = vadd.f32 %v935_v6, %v340_v16  ;;  %v376_v25 = vadd.f32 %v935_v6, %v341_v17 }
  0x15   : > { %v377_v26 = vadd.f32 %v935_v6, %v342_v18  ;;  %v378_v27 = vadd.f32 %v935_v6, %v343_v19  ;;  %v379_v28 = vadd.f32 %v935_v6, %v344_v20  ;;  %v380_v29 = vadd.f32 %v935_v6, %v345_v21  ;;  %v805_v18 = vld [vmem:[%s922_s19 + $0x50] sm:$0xff]  }
  0x16   : > { %v405_v31 = vmax.f32 %v373_v22, 0.0  ;;  %v406_v32 = vmax.f32 %v374_v23, 0.0  ;;  %v407_v33 = vmax.f32 %v375_v24, 0.0  ;;  %v408_v34 = vmax.f32 %v376_v25, 0.0  ;;  %v806_v23 = vld [vmem:[%s922_s19 + $0x58] sm:$0xff]  }
  0x17   : > { %v409_v36 = vmax.f32 %v377_v26, 0.0  ;;  %v410_v37 = vmax.f32 %v378_v27, 0.0  ;;  %v411_v38 = vmax.f32 %v379_v28, 0.0  ;;  %v412_v39 = vmax.f32 %v380_v29, 0.0 }
  0x18   : > { %v719_v41 = vpack.c.bf16 %v406_v32, %v405_v31  ;;  %v724_v42 = vpack.c.bf16 %v408_v34, %v407_v33  ;;  %v670_v43 = vunpack.c.l.bf16 %v799_v30  ;;  %v671_v44 = vunpack.c.h.bf16 %v799_v30 }
  0x19   : > { %v729_v46 = vpack.c.bf16 %v410_v37, %v409_v36  ;;  %v734_v47 = vpack.c.bf16 %v412_v39, %v411_v38  ;;  %v674_v48 = vunpack.c.l.bf16 %v800_v35  ;;  %v675_v49 = vunpack.c.h.bf16 %v800_v35 }
  0x1a   : > { %720 = vst [vmem:[%s961_s26] sm:$0xff] %v719_v41   ;;  %v346_v50 = vmul.f32 %v927_v0, %v670_v43  ;;  %v347_v51 = vmul.f32 %v927_v0, %v671_v44  ;;  %v678_v52 = vunpack.c.l.bf16 %v801_v40  ;;  %v679_v53 = vunpack.c.h.bf16 %v801_v40  ;;  %v807_v40 = vld [vmem:[%s922_s19 + $0x60] sm:$0xff]  }
  0x1b   : > { %811 = vst [vmem:[%s961_s26 + $0x8] sm:$0xff] %v724_v42   ;;  %v348_v54 = vmul.f32 %v927_v0, %v674_v48  ;;  %v349_v55 = vmul.f32 %v927_v0, %v675_v49  ;;  %v682_v56 = vunpack.c.l.bf16 %v802_v45  ;;  %v683_v57 = vunpack.c.h.bf16 %v802_v45 }
  0x1c   : > { %812 = vst [vmem:[%s961_s26 + $0x10] sm:$0xff] %v729_v46   ;;  %v381_v58 = vadd.f32 %v935_v6, %v346_v50  ;;  %v382_v59 = vadd.f32 %v935_v6, %v347_v51  ;;  %v350_v60 = vmul.f32 %v927_v0, %v678_v52  ;;  %v351_v61 = vmul.f32 %v927_v0, %v679_v53  ;;  %v808_v53 = vld [vmem:[%s922_s19 + $0x68] sm:$0xff]  }
  0x1d   : > { %813 = vst [vmem:[%s961_s26 + $0x18] sm:$0xff] %v734_v47   ;;  %v383_v62 = vadd.f32 %v935_v6, %v348_v54  ;;  %v384_v63 = vadd.f32 %v935_v6, %v349_v55  ;;  %v352_v1 = vmul.f32 %v927_v0, %v682_v56  ;;  %v353_v2 = vmul.f32 %v927_v0, %v683_v57 }
  0x1e   : > { %v413_v4 = vmax.f32 %v381_v58, 0.0  ;;  %v414_v5 = vmax.f32 %v382_v59, 0.0  ;;  %v385_v7 = vadd.f32 %v935_v6, %v350_v60  ;;  %v386_v8 = vadd.f32 %v935_v6, %v351_v61  ;;  %v809_v58 = vld [vmem:[%s922_s19 + $0x70] sm:$0xff]  }
  0x1f   : > { %v415_v9 = vmax.f32 %v383_v62, 0.0  ;;  %v416_v10 = vmax.f32 %v384_v63, 0.0  ;;  %v387_v11 = vadd.f32 %v935_v6, %v352_v1  ;;  %v388_v12 = vadd.f32 %v935_v6, %v353_v2  ;;  %v810_v63 = vld [vmem:[%s922_s19 + $0x78] sm:$0xff]  }
  0x20   : > { %v739_v14 = vpack.c.bf16 %v414_v5, %v413_v4  ;;  %v417_v15 = vmax.f32 %v385_v7, 0.0  ;;  %v418_v16 = vmax.f32 %v386_v8, 0.0  ;;  %v686_v17 = vunpack.c.l.bf16 %v803_v3 }
  0x21   : > { %v744_v19 = vpack.c.bf16 %v416_v10, %v415_v9  ;;  %v419_v20 = vmax.f32 %v387_v11, 0.0  ;;  %v420_v21 = vmax.f32 %v388_v12, 0.0  ;;  %v687_v22 = vunpack.c.h.bf16 %v803_v3 }
  0x22   : > { %814 = vst [vmem:[%s961_s26 + $0x20] sm:$0xff] %v739_v14   ;;  %v749_v24 = vpack.c.bf16 %v418_v16, %v417_v15  ;;  %v354_v25 = vmul.f32 %v927_v0, %v686_v17  ;;  %v690_v26 = vunpack.c.l.bf16 %v804_v13  ;;  %v691_v27 = vunpack.c.h.bf16 %v804_v13 }
  0x23   : > { %815 = vst [vmem:[%s961_s26 + $0x28] sm:$0xff] %v744_v19   ;;  %v754_v28 = vpack.c.bf16 %v420_v21, %v419_v20  ;;  %v355_v29 = vmul.f32 %v927_v0, %v687_v22  ;;  %v694_v30 = vunpack.c.l.bf16 %v805_v18  ;;  %v695_v31 = vunpack.c.h.bf16 %v805_v18 }
  0x24   : > { %816 = vst [vmem:[%s961_s26 + $0x30] sm:$0xff] %v749_v24   ;;  %v389_v32 = vadd.f32 %v935_v6, %v354_v25  ;;  %v356_v33 = vmul.f32 %v927_v0, %v690_v26  ;;  %v357_v34 = vmul.f32 %v927_v0, %v691_v27  ;;  %v698_v35 = vunpack.c.l.bf16 %v806_v23 }
  0x25   : > { %817 = vst [vmem:[%s961_s26 + $0x38] sm:$0xff] %v754_v28   ;;  %v390_v36 = vadd.f32 %v935_v6, %v355_v29  ;;  %v358_v37 = vmul.f32 %v927_v0, %v694_v30  ;;  %v359_v38 = vmul.f32 %v927_v0, %v695_v31  ;;  %v699_v39 = vunpack.c.h.bf16 %v806_v23 }
  0x26   : > { %v421_v41 = vmax.f32 %v389_v32, 0.0  ;;  %v391_v42 = vadd.f32 %v935_v6, %v356_v33  ;;  %v392_v43 = vadd.f32 %v935_v6, %v357_v34  ;;  %v360_v44 = vmul.f32 %v927_v0, %v698_v35 }
  0x27   : > { %v422_v45 = vmax.f32 %v390_v36, 0.0  ;;  %v393_v46 = vadd.f32 %v935_v6, %v358_v37  ;;  %v394_v47 = vadd.f32 %v935_v6, %v359_v38  ;;  %v361_v48 = vmul.f32 %v927_v0, %v699_v39 }
  0x28   : > { %v423_v49 = vmax.f32 %v391_v42, 0.0  ;;  %v424_v50 = vmax.f32 %v392_v43, 0.0  ;;  %v395_v51 = vadd.f32 %v935_v6, %v360_v44  ;;  %v702_v52 = vunpack.c.l.bf16 %v807_v40 }
  0x29   : > { %v759_v54 = vpack.c.bf16 %v422_v45, %v421_v41  ;;  %v425_v55 = vmax.f32 %v393_v46, 0.0  ;;  %v426_v56 = vmax.f32 %v394_v47, 0.0  ;;  %v396_v57 = vadd.f32 %v935_v6, %v361_v48 }
  0x2a   : > { %v764_v59 = vpack.c.bf16 %v424_v50, %v423_v49  ;;  %v427_v60 = vmax.f32 %v395_v51, 0.0  ;;  %v703_v61 = vunpack.c.h.bf16 %v807_v40  ;;  %v362_v62 = vmul.f32 %v927_v0, %v702_v52 }
  0x2b   : > { %818 = vst [vmem:[%s961_s26 + $0x40] sm:$0xff] %v759_v54   ;;  %v769_v1 = vpack.c.bf16 %v426_v56, %v425_v55  ;;  %v428_v2 = vmax.f32 %v396_v57, 0.0  ;;  %v706_v3 = vunpack.c.l.bf16 %v808_v53  ;;  %v707_v4 = vunpack.c.h.bf16 %v808_v53 }
  0x2c   : > { %819 = vst [vmem:[%s961_s26 + $0x48] sm:$0xff] %v764_v59   ;;  %v363_v5 = vmul.f32 %v927_v0, %v703_v61  ;;  %v397_v7 = vadd.f32 %v935_v6, %v362_v62  ;;  %v710_v8 = vunpack.c.l.bf16 %v809_v58  ;;  %v711_v9 = vunpack.c.h.bf16 %v809_v58 }
  0x2d   : > { %820 = vst [vmem:[%s961_s26 + $0x50] sm:$0xff] %v769_v1   ;;  %v774_v10 = vpack.c.bf16 %v428_v2, %v427_v60  ;;  %v364_v11 = vmul.f32 %v927_v0, %v706_v3  ;;  %v365_v12 = vmul.f32 %v927_v0, %v707_v4  ;;  %v714_v13 = vunpack.c.l.bf16 %v810_v63 }
  0x2e   : > { %v398_v14 = vadd.f32 %v935_v6, %v363_v5  ;;  %v429_v15 = vmax.f32 %v397_v7, 0.0  ;;  %v366_v16 = vmul.f32 %v927_v0, %v710_v8  ;;  %v367_v17 = vmul.f32 %v927_v0, %v711_v9 }
  0x2f   : > { %821 = vst [vmem:[%s961_s26 + $0x58] sm:$0xff] %v774_v10   ;;  %v399_v18 = vadd.f32 %v935_v6, %v364_v11  ;;  %v400_v19 = vadd.f32 %v935_v6, %v365_v12  ;;  %v715_v20 = vunpack.c.h.bf16 %v810_v63  ;;  %v368_v21 = vmul.f32 %v927_v0, %v714_v13 }
  0x30   : > { %v430_v22 = vmax.f32 %v398_v14, 0.0  ;;  %v401_v23 = vadd.f32 %v935_v6, %v366_v16  ;;  %v402_v24 = vadd.f32 %v935_v6, %v367_v17 }
  0x31   : > { %v431_v25 = vmax.f32 %v399_v18, 0.0  ;;  %v432_v26 = vmax.f32 %v400_v19, 0.0  ;;  %v369_v27 = vmul.f32 %v927_v0, %v715_v20  ;;  %v403_v28 = vadd.f32 %v935_v6, %v368_v21 }
  0x32   : > { %v779_v29 = vpack.c.bf16 %v430_v22, %v429_v15  ;;  %v433_v30 = vmax.f32 %v401_v23, 0.0  ;;  %v434_v31 = vmax.f32 %v402_v24, 0.0 }
  0x33   : > { %v784_v32 = vpack.c.bf16 %v432_v26, %v431_v25  ;;  %v404_v33 = vadd.f32 %v935_v6, %v369_v27  ;;  %v435_v34 = vmax.f32 %v403_v28, 0.0 }
  0x34   : > { %822 = vst [vmem:[%s961_s26 + $0x60] sm:$0xff] %v779_v29   ;;  %v789_v35 = vpack.c.bf16 %v434_v31, %v433_v30 }
  0x35   : > { %823 = vst [vmem:[%s961_s26 + $0x68] sm:$0xff] %v784_v32   ;;  %v436_v36 = vmax.f32 %v404_v33, 0.0 }
  0x36   : > { %824 = vst [vmem:[%s961_s26 + $0x70] sm:$0xff] %v789_v35  }
  0x37   : > { %v794_v37 = vpack.c.bf16 %v436_v36, %v435_v34 }
  0x39   : > { %825 = vst [vmem:[%s961_s26 + $0x78] sm:$0xff] %v794_v37  }
  0x3a PF: > { %s13_s14 = sadd.s32 1, %s874_s14   ;;  %s1050_s12 = smov %s870_s13 }
  0x3b   : > { %p10_p5 = scmp.ge.s32.totalorder %s13_s14, 4   ;;  %s1051_s13 = smov %s1053_s15 }
  0x3d   :  { %12 = sbr.rel (!%p10_p5) target bundleno = 2 (0x2), region = 68 }

// kernel: decoder_block_forward.4
= control target key start
LH: loop header
LB: loop body
LE: loop exit
PB: predicated region body
PF: predicated region fallthrough
CT: control target
= control target key end

     0   :  { %s3277_s12 = smov 0   ;;  %s3279_s13 = smov 0   ;;  %s4278_s0 = inlined_call_operand.vmem [shape: bf16[2,18,18,4], index: 0, kind: input, shape index: {}]   ;;  %s4279_s1 = inlined_call_operand.vmem [shape: bf16[3,12,128], index: 1, kind: input, shape index: {}]   ;;  %s4280_s2 = inlined_call_operand.vmem [shape: bf16[2,16,16,128], index: 2, kind: output, shape index: {0}]   ;;  %s4281_s3 = inlined_call_operand.vmem [shape: f32[2,1,2,128], index: 3, kind: output, shape index: {1}]  }
   0x1   :  { %s3281_s14 = smov 0  }
   0x2 LB: > { %s33_s15 = sadd.s32 1, %s3249_s13  ;;  %p2687_p0 = scmp.ge.s32.totalorder %s3253_s14, 1  ;;  %s3253_s14 = sphi %s3281_s14, %s14_s14   ;;  %s3249_s13 = sphi %s3279_s13, %s4283_s13   ;;  %s3245_s12 = sphi %s3277_s12, %s4282_s12  }
   0x3   : > { %p35_p1 = scmp.ge.s32.totalorder %s33_s15, 2  ;;  %p176_p2 = scmp.lt.s32.totalorder %s3253_s14, 3 }
   0x5   : > { %s4285_s15 = smov (%p35_p1, %s33_s15), 0  ;;  %p177_p3 = pnand %p2687_p0, %p176_p2 }
   0x6   : > { %p222_p4 = scmp.lt.s32.totalorder (!%p177_p3), %s3245_s12, 1  ;;  %s3255_s20 = smov (!%p177_p3), 8  }
   0x7   : > { %180 = sbr.rel (%p177_p3) target bundleno = 560 (0x230), region = 28  ;;  %s3256_s21 = smov (!%p177_p3), 4  }
   0xc   : > { %s4287_s12 = smov (!%p222_p4, %s3245_s12), 1  ;;  %vm661_vm0 = vcmask 1046528   ;;  %vm436_vm1 = vsmask.f32 7424  ;;  %vm1399_vm2 = vcmask 1045504   ;;  %vm742_vm3 = vcmask 31744  }
   0xd   : > { %s3196_s16 = smul.u32 216, %s4287_s12  ;;  %vm775_vm4 = vcmask 64512   ;;  %vm1366_vm5 = vcmask 97280   ;;  %s3046_s7 = sshll.u32 %s4287_s12, 7  ;;  %vm2503_vm6 = vcmask 1040384  }
   0xe   : > { %s4097_s10 = scalar_lea.vmem %s4280_s2, %s3046_s7  ;;  %s2691_s11 = sshll.u32 %s4287_s12, 1 }
   0xf   : > { %s3301_s19 = scalar_lea.vmem %s4278_s0, %s3196_s16  ;;  %s254_s18 = scalar_lea.vmem %s4281_s3, %s2691_s11 }
  0x10   : > { %v3304_v0 = vld [vmem:[%s3301_s19 + $0x18] sm:$0xff]  ;;  %v2912_v1 = vld [vmem:[%s3301_s19 + $0x20] sm:$0x1]  ;;  %v262_v4 = vld [vmem:[%s3301_s19 + $0x8] sm:$0x1] }
  0x11   : > { %v3308_v2 = vld [vmem:[%s3301_s19] sm:$0xff]  ;;  %v1769_v3 = vunpack.c.l.b16 %v2912_v1  ;;  %v3312_v5 = vld [vmem:[%s3301_s19 + $0xc] sm:$0xff]  ;;  %v2758_v6 = vld [vmem:[%s3301_s19 + $0x14] sm:$0x1]  ;;  %v404_v7 = vunpack.c.l.b16 %v262_v4  ;;  %v2025_v11 = vrot.slane %v3304_v0, 1  ;;  %v1804_v12 = vshll.u32 %v3304_v0, 16 }
  0x12   : > { %v438_v8 = vshrl.u32 %v3308_v2, 16  ;;  %v440_v9 = vshll.u32 %v3308_v2, 16  ;;  %v958_v13 = vunpack.c.l.b16 %v2758_v6  ;;  %v2794_v14 = vld [vmem:[%s3301_s19 + $0xa4] sm:$0x1]  ;;  %v1802_v17 = vshrl.u32 %v3304_v0, 16  ;;  %v3323_v23 = vld [vmem:[%s3301_s19 + $0x9c] sm:$0xff] }
  0x13   : > { %v1785_v10 = vpack.c.b16 %v1769_v3, %v1769_v3  ;;  %v420_v15 = vpack.c.b16 %v404_v7, %v404_v7  ;;  %v993_v18 = vshll.u32 %v3312_v5, 16  ;;  %v1806_v20 = vrot.slane %v1804_v12, 1  ;;  %v2915_v27 = vld [vmem:[%s3301_s19 + $0x2c] sm:$0x1]  ;;  %v3330_v34 = vld [vmem:[%s3301_s19 + $0x24] sm:$0xff]  ;;  %v3357_v12 = vld [vmem:[%s3301_s19 + $0x18] sm:$0xff] }
  0x14   : > { %v442_v16 = vrot.slane %v440_v9, 1  ;;  %v974_v22 = vpack.c.b16 %v958_v13, %v958_v13  ;;  %v970_v26 = vunpack.c.l.b16 %v2794_v14  ;;  %v991_v29 = vshrl.u32 %v3312_v5, 16  ;;  %v265_v46 = vld [vmem:[%s3301_s19 + $0x14] sm:$0x1]  ;;  %v3345_v54 = vld [vmem:[%s3301_s19 + $0xc] sm:$0xff] }
  0x15   : > { %v2026_v19 = vrot.slane %v1785_v10, 1  ;;  %v1809_v21 = vshll.u32 %v1785_v10, 16  ;;  %v445_v25 = vshll.u32 %v420_v15, 16  ;;  %v995_v30 = vrot.slane %v993_v18, 1  ;;  %v2761_v1 = vld [vmem:[%s3301_s19 + $0x20] sm:$0x1] }
  0x16   : > { %v443_v24 = vor.u32 %v442_v16, %v438_v8  ;;  %v998_v31 = vshll.u32 %v974_v22, 16  ;;  %v1807_v33 = vor.u32 %v1806_v20, %v1802_v17  ;;  %v986_v36 = vpack.c.b16 %v970_v26, %v970_v26  ;;  %v2918_v20 = vld [vmem:[%s3301_s19 + $0x38] sm:$0x1] }
  0x17   : > { %v2027_v28 = vsel %vm661_vm0, %v2025_v11, %v2026_v19  ;;  %v447_v32 = vrot.slane %v445_v25, 1  ;;  %v1811_v35 = vrot.slane %v1809_v21, 1  ;;  %v1137_v37 = vshll.u32 %v3323_v23, 16 }
  0x18   : > { %2073 = vrot.lane.b32.xlu0 %v2027_v28, %s3255_s20  ;;  %v1770_v38 = vunpack.c.l.b16 %v2915_v27  ;;  %v996_v40 = vor.u32 %v995_v30, %v991_v29  ;;  %v1000_v41 = vrot.slane %v998_v31, 1  ;;  %v1816_v43 = vshll.u32 %v3330_v34, 16  ;;  %v3371_v30 = vld [vmem:[%s3301_s19 + $0x30] sm:$0xff] }
  0x19   : > { %v448_v39 = vsel %vm436_vm1, %v443_v24, %v447_v32  ;;  %v662_v44 = vrot.slane %v3308_v2, 1  ;;  %v663_v45 = vrot.slane %v420_v15, 1  ;;  %v1812_v47 = vsel %vm436_vm1, %v1807_v33, %v1811_v35  ;;  %v2797_v24 = vld [vmem:[%s3301_s19 + $0xb0] sm:$0x1]  ;;  %v3374_v32 = vld [vmem:[%s3301_s19 + $0xa8] sm:$0xff] }
  0x1a   : > { %629 = vrot.lane.b32.xlu1 %v448_v39, %s3256_s21  ;;  %v1786_v42 = vpack.c.b16 %v1770_v38, %v1770_v38  ;;  %v1135_v48 = vshrl.u32 %v3323_v23, 16  ;;  %v1139_v49 = vrot.slane %v1137_v37, 1  ;;  %v1142_v50 = vshll.u32 %v986_v36, 16 }
  0x1b   : > { %v664_v51 = vsel %vm661_vm0, %v662_v44, %v663_v45  ;;  %v1001_v52 = vsel %vm436_vm1, %v996_v40, %v1000_v41  ;;  %v1814_v53 = vshrl.u32 %v3330_v34, 16  ;;  %v405_v55 = vunpack.c.l.b16 %v265_v46  ;;  %v268_v44 = vld [vmem:[%s3301_s19 + $0x20] sm:$0x1] }
  0x1c   : > { %710 = vrot.lane.b32.xlu2 %v664_v51, %s3255_s20  ;;  %v1818_v56 = vrot.slane %v1816_v43, 1  ;;  %v1821_v57 = vshll.u32 %v1786_v42, 16  ;;  %v1214_v58 = vrot.slane %v3312_v5, 1  ;;  %v1215_v59 = vrot.slane %v974_v22, 1 }
  0x1d   : > { %v1140_v60 = vor.u32 %v1139_v49, %v1135_v48  ;;  %v1144_v61 = vrot.slane %v1142_v50, 1  ;;  %v421_v62 = vpack.c.b16 %v405_v55, %v405_v55  ;;  %v452_v63 = vshll.u32 %v3345_v54, 16 }
  0x1e   : > { %v1819_v3 = vor.u32 %v1818_v56, %v1814_v53  ;;  %v1823_v4 = vrot.slane %v1821_v57, 1  ;;  %v1216_v6 = vsel %vm661_vm0, %v1214_v58, %v1215_v59  ;;  %v959_v8 = vunpack.c.l.b16 %v2761_v1  ;;  %v3390_v56 = vld [vmem:[%s3301_s19 + $0x18] sm:$0xff]  ;;  %v2764_v58 = vld [vmem:[%s3301_s19 + $0x2c] sm:$0x1] }
  0x1f   : > { %v1145_v7 = vsel %vm436_vm1, %v1140_v60, %v1144_v61  ;;  %v450_v9 = vshrl.u32 %v3345_v54, 16  ;;  %v454_v10 = vrot.slane %v452_v63, 1  ;;  %v457_v11 = vshll.u32 %v421_v62, 16  ;;  %v3397_v60 = vld [vmem:[%s3301_s19 + $0x24] sm:$0xff] }
  0x20   : > { %1993 = vrot.lane.b32.xlu0 %v1812_v47, %s3256_s21  ;;  %v1824_v13 = vsel %vm436_vm1, %v1819_v3, %v1823_v4  ;;  %v1250_v14 = vrot.slane %v3323_v23, 1  ;;  %v1251_v15 = vrot.slane %v986_v36, 1  ;;  %v2028_v16 = vrot.slane %v3330_v34, 1 }
  0x21   : > { %v2029_v17 = vrot.slane %v1786_v42, 1  ;;  %v1005_v18 = vshll.u32 %v3357_v12, 16  ;;  %v975_v19 = vpack.c.b16 %v959_v8, %v959_v8  ;;  %v455_v21 = vor.u32 %v454_v10, %v450_v9 }
  0x22   : > { %1182 = vrot.lane.b32.xlu1 %v1001_v52, %s3256_s21  ;;  %v459_v22 = vrot.slane %v457_v11, 1  ;;  %v1252_v25 = vsel %vm661_vm0, %v1250_v14, %v1251_v15  ;;  %v1003_v26 = vshrl.u32 %v3357_v12, 16  ;;  %v1771_v31 = vunpack.c.l.b16 %v2918_v20  ;;  %v3411_v20 = vld [vmem:[%s3301_s19 + $0xb4] sm:$0xff] }
  0x23   : > { %v1007_v27 = vrot.slane %v1005_v18, 1  ;;  %v1010_v28 = vshll.u32 %v975_v19, 16  ;;  %v2030_v29 = vsel %vm661_vm0, %v2028_v16, %v2029_v17  ;;  %v971_v33 = vunpack.c.l.b16 %v2797_v24 }
  0x24   : > { %1262 = vrot.lane.b32.xlu2 %v1216_v6, %s3255_s20  ;;  %v665_v35 = vrot.slane %v3345_v54, 1  ;;  %v666_v36 = vrot.slane %v421_v62, 1  ;;  %v460_v37 = vsel %vm436_vm1, %v455_v21, %v459_v22  ;;  %v1149_v40 = vshll.u32 %v3374_v32, 16 }
  0x25   : > { %v1008_v38 = vor.u32 %v1007_v27, %v1003_v26  ;;  %v1012_v39 = vrot.slane %v1010_v28, 1  ;;  %v1787_v41 = vpack.c.b16 %v1771_v31, %v1771_v31  ;;  %v1828_v42 = vshll.u32 %v3371_v30, 16 }
  0x26   : > { %v987_v43 = vpack.c.b16 %v971_v33, %v971_v33  ;;  %v667_v45 = vsel %vm661_vm0, %v665_v35, %v666_v36  ;;  %v1217_v46 = vrot.slane %v3357_v12, 1  ;;  %v1218_v47 = vrot.slane %v975_v19, 1  ;;  %v2921_v33 = vld [vmem:[%s3301_s19 + $0x44] sm:$0x1] }
  0x27   : > { %v1013_v48 = vsel %vm436_vm1, %v1008_v38, %v1012_v39  ;;  %v1147_v49 = vshrl.u32 %v3374_v32, 16  ;;  %v1151_v50 = vrot.slane %v1149_v40, 1  ;;  %v1826_v52 = vshrl.u32 %v3371_v30, 16  ;;  %v3421_v39 = vld [vmem:[%s3301_s19 + $0x3c] sm:$0xff] }
  0x28   : > { %1206 = vrot.lane.b32.xlu0 %v1145_v7, %s3256_s21  ;;  %v1154_v51 = vshll.u32 %v987_v43, 16  ;;  %v1830_v53 = vrot.slane %v1828_v42, 1  ;;  %v1833_v55 = vshll.u32 %v1787_v41, 16  ;;  %v406_v57 = vunpack.c.l.b16 %v268_v44 }
  0x29   : > { %v1219_v59 = vsel %vm661_vm0, %v1217_v46, %v1218_v47  ;;  %v960_v61 = vunpack.c.l.b16 %v2764_v58  ;;  %v1152_v62 = vor.u32 %v1151_v50, %v1147_v49  ;;  %v464_v6 = vshll.u32 %v3390_v56, 16 }
  0x2a   : > { %1995 = vrot.lane.b32.xlu1 %v1824_v13, %s3256_s21  ;;  %v1156_v63 = vrot.slane %v1154_v51, 1  ;;  %v1831_v1 = vor.u32 %v1830_v53, %v1826_v52  ;;  %v1835_v3 = vrot.slane %v1833_v55, 1  ;;  %v422_v4 = vpack.c.b16 %v406_v57, %v406_v57  ;;  %v2800_v13 = vld [vmem:[%s3301_s19 + $0xbc] sm:$0x1]  ;;  %v2767_v51 = vld [vmem:[%s3301_s19 + $0x38] sm:$0x1] }
  0x2b   : > { %v1253_v7 = vrot.slane %v3374_v32, 1  ;;  %v1254_v8 = vrot.slane %v987_v43, 1  ;;  %v976_v9 = vpack.c.b16 %v960_v61, %v960_v61  ;;  %v1017_v10 = vshll.u32 %v3397_v60, 16  ;;  %v271_v55 = vld [vmem:[%s3301_s19 + $0x2c] sm:$0x1] }
  0x2c   : > { %1286 = vrot.lane.b32.xlu2 %v1252_v25, %s3255_s20  ;;  %v1157_v11 = vsel %vm436_vm1, %v1152_v62, %v1156_v63  ;;  %v1836_v14 = vsel %vm436_vm1, %v1831_v1, %v1835_v3  ;;  %v462_v15 = vshrl.u32 %v3390_v56, 16  ;;  %v466_v16 = vrot.slane %v464_v6, 1  ;;  %v3437_v63 = vld [vmem:[%s3301_s19 + $0x30] sm:$0xff]  ;;  %v3440_v3 = vld [vmem:[%s3301_s19 + $0x24] sm:$0xff] }
  0x2d   : > { %v469_v17 = vshll.u32 %v422_v4, 16  ;;  %v1255_v18 = vsel %vm661_vm0, %v1253_v7, %v1254_v8  ;;  %v1015_v19 = vshrl.u32 %v3397_v60, 16  ;;  %v972_v21 = vunpack.c.l.b16 %v2800_v13 }
  0x2e   : > { %v1019_v22 = vrot.slane %v1017_v10, 1  ;;  %v1022_v24 = vshll.u32 %v976_v9, 16  ;;  %v2031_v25 = vrot.slane %v3371_v30, 1  ;;  %v2032_v26 = vrot.slane %v1787_v41, 1 }
  0x2f   : > { %v467_v27 = vor.u32 %v466_v16, %v462_v15  ;;  %v471_v28 = vrot.slane %v469_v17, 1  ;;  %v1161_v31 = vshll.u32 %v3411_v20, 16  ;;  %v1772_v40 = vunpack.c.l.b16 %v2921_v33  ;;  %v2803_v16 = vld [vmem:[%s3301_s19 + $0xc8] sm:$0x1] }
  0x30   : > { %2075 = vrot.lane.b32.xlu0 %v2030_v29, %s3255_s20  ;;  %v988_v29 = vpack.c.b16 %v972_v21, %v972_v21  ;;  %v1020_v35 = vor.u32 %v1019_v22, %v1015_v19  ;;  %v1024_v36 = vrot.slane %v1022_v24, 1  ;;  %v1159_v41 = vshrl.u32 %v3411_v20, 16  ;;  %v2924_v22 = vld [vmem:[%s3301_s19 + $0x50] sm:$0x1] }
  0x31   : > { %v472_v38 = vsel %vm436_vm1, %v467_v27, %v471_v28  ;;  %v1163_v42 = vrot.slane %v1161_v31, 1  ;;  %v669_v46 = vrot.slane %v422_v4, 1  ;;  %v1840_v47 = vshll.u32 %v3421_v39, 16  ;;  %v3457_v31 = vld [vmem:[%s3301_s19 + $0xc0] sm:$0xff] }
  0x32   : > { %631 = vrot.lane.b32.xlu1 %v460_v37, %s3256_s21  ;;  %v2033_v37 = vsel %vm661_vm0, %v2031_v25, %v2032_v26  ;;  %v1166_v43 = vshll.u32 %v988_v29, 16  ;;  %v1025_v44 = vsel %vm436_vm1, %v1020_v35, %v1024_v36  ;;  %v1221_v49 = vrot.slane %v976_v9, 1  ;;  %v3461_v35 = vld [vmem:[%s3301_s19 + $0x48] sm:$0xff] }
  0x33   : > { %v1788_v50 = vpack.c.b16 %v1772_v40, %v1772_v40  ;;  %v1164_v52 = vor.u32 %v1163_v42, %v1159_v41  ;;  %v1838_v58 = vshrl.u32 %v3421_v39, 16  ;;  %v961_v1 = vunpack.c.l.b16 %v2767_v51 }
  0x34   : > { %1184 = vrot.lane.b32.xlu2 %v1013_v48, %s3256_s21  ;;  %v1220_v48 = vrot.slane %v3397_v60, 1  ;;  %v1168_v53 = vrot.slane %v1166_v43, 1  ;;  %v407_v4 = vunpack.c.l.b16 %v271_v55  ;;  %v1256_v6 = vrot.slane %v3411_v20, 1  ;;  %v274_v55 = vld [vmem:[%s3301_s19 + $0x38] sm:$0x1] }
  0x35   : > { %v1845_v61 = vshll.u32 %v1788_v50, 16  ;;  %v1257_v7 = vrot.slane %v988_v29, 1  ;;  %v977_v13 = vpack.c.b16 %v961_v1, %v961_v1  ;;  %v2035_v19 = vrot.slane %v1788_v50, 1 }
  0x36   : > { %v1222_v62 = vsel %vm661_vm0, %v1220_v48, %v1221_v49  ;;  %v1169_v8 = vsel %vm436_vm1, %v1164_v52, %v1168_v53  ;;  %v423_v15 = vpack.c.b16 %v407_v4, %v407_v4  ;;  %v474_v24 = vshrl.u32 %v3440_v3, 16 }
  0x37   : > { %v1847_v10 = vrot.slane %v1845_v61, 1  ;;  %v1258_v17 = vsel %vm661_vm0, %v1256_v6, %v1257_v7  ;;  %v1027_v27 = vshrl.u32 %v3437_v63, 16  ;;  %v1034_v29 = vshll.u32 %v977_v13, 16 }
  0x38   : > { %712 = vrot.lane.b32.xlu0 %v667_v45, %s3255_s20  ;;  %v668_v45 = vrot.slane %v3390_v56, 1  ;;  %v481_v26 = vshll.u32 %v423_v15, 16  ;;  %v973_v33 = vunpack.c.l.b16 %v2803_v16  ;;  %v1773_v36 = vunpack.c.l.b16 %v2924_v22 }
  0x39   : > { %v1036_v42 = vrot.slane %v1034_v29, 1  ;;  %v672_v48 = vrot.slane %v423_v15, 1  ;;  %v1171_v51 = vshrl.u32 %v3457_v31, 16  ;;  %v408_v1 = vunpack.c.l.b16 %v274_v55 }
  0x3a   : > { %1264 = vrot.lane.b32.xlu1 %v1219_v59, %s3255_s20  ;;  %v670_v57 = vsel %vm661_vm0, %v668_v45, %v669_v46  ;;  %v1842_v59 = vrot.slane %v1840_v47, 1  ;;  %v483_v40 = vrot.slane %v481_v26, 1  ;;  %v989_v43 = vpack.c.b16 %v973_v33, %v973_v33 }
  0x3b   : > { %v1789_v45 = vpack.c.b16 %v1773_v36, %v1773_v36  ;;  %v1852_v46 = vshll.u32 %v3461_v35, 16  ;;  %v671_v47 = vrot.slane %v3440_v3, 1  ;;  %v1223_v4 = vrot.slane %v3437_v63, 1  ;;  %v2892_v36 = vld [vmem:[%s4279_s1] sm:$0xf] }
  0x3c   : > { %1208 = vrot.lane.b32.xlu2 %v1157_v11, %s3256_s21  ;;  %v1843_v9 = vor.u32 %v1842_v59, %v1838_v58  ;;  %v476_v11 = vshll.u32 %v3440_v3, 16  ;;  %v1178_v53 = vshll.u32 %v989_v43, 16  ;;  %v1224_v6 = vrot.slane %v977_v13, 1 }
  0x3d   : > { %v1854_v58 = vrot.slane %v1852_v46, 1  ;;  %v1857_v59 = vshll.u32 %v1789_v45, 16  ;;  %v673_v61 = vsel %vm661_vm0, %v671_v47, %v672_v48  ;;  %v1259_v26 = vrot.slane %v3457_v31, 1 }
  0x3e   : > { %v1848_v21 = vsel %vm436_vm1, %v1843_v9, %v1847_v10  ;;  %v478_v25 = vrot.slane %v476_v11, 1  ;;  %v2770_v9 = vld [vmem:[%s3301_s19 + $0x44] sm:$0x1]  ;;  %v1225_v16 = vsel %vm661_vm0, %v1223_v4, %v1224_v6  ;;  %v2038_v29 = vrot.slane %v1789_v45, 1 }
  0x3f   : > { %v1859_v11 = vrot.slane %v1857_v59, 1  ;;  %v3026_v59 = vld [vmem:[%s4279_s1 + $0x10] sm:$0xf] }
  0x40   : > { %1997 = vrot.lane.b32.xlu0 %v1836_v14, %s3256_s21  ;;  %v1029_v14 = vshll.u32 %v3437_v63, 16 }
  0x42   : > { %1288 = vrot.lane.b32.xlu1 %v1255_v18, %s3255_s20  ;;  %v2034_v18 = vrot.slane %v3421_v39, 1  ;;  %v1031_v28 = vrot.slane %v1029_v14, 1  ;;  %v424_v14 = vpack.c.b16 %v408_v1, %v408_v1 }
  0x44   : > { %2077 = vrot.lane.b32.xlu2 %v2033_v37, %s3255_s20  ;;  %v2036_v37 = vsel %vm661_vm0, %v2034_v18, %v2035_v19  ;;  %v1032_v41 = vor.u32 %v1031_v28, %v1027_v27  ;;  %v3487_v18 = vld [vmem:[%s3301_s19 + $0x3c] sm:$0xff]  ;;  %v962_v19 = vunpack.c.l.b16 %v2770_v9  ;;  %v1260_v27 = vrot.slane %v989_v43, 1  ;;  %v3080_v9 = vld [vmem:[%s4279_s1 + $0x8] sm:$0x30] }
  0x45   : > { %v1041_v22 = vshll.u32 %v3487_v18, 16  ;;  %v2037_v28 = vrot.slane %v3461_v35, 1  ;;  %v675_v55 = vrot.slane %v424_v14, 1 }
  0x46   : > { %v1037_v50 = vsel %vm436_vm1, %v1032_v41, %v1036_v42  ;;  %v3496_v33 = vpack.c.b16 %v962_v19, %v962_v19  ;;  %v298_v41 = vld [vmem:[%s3301_s19 + $0x98] sm:$0x1]  ;;  %v1261_v46 = vsel %vm661_vm0, %v1259_v26, %v1260_v27 }
  0x47   : > { %v1043_v42 = vrot.slane %v1041_v22, 1  ;;  %v2039_v48 = vsel %vm661_vm0, %v2037_v28, %v2038_v29 }
  0x48   : > { %633 = vrot.lane.b32.xlu0 %v472_v38, %s3256_s21  ;;  %v479_v38 = vor.u32 %v478_v25, %v474_v24  ;;  %v493_v25 = vshll.u32 %v424_v14, 16  ;;  %v1046_v43 = vshll.u32 %v3496_v33, 16  ;;  %v1227_v19 = vrot.slane %v3496_v33, 1 }
  0x4a   : > { %1186 = vrot.lane.b32.xlu1 %v1025_v44, %s3256_s21  ;;  %v1173_v44 = vshll.u32 %v3457_v31, 16  ;;  %v484_v49 = vsel %vm436_vm1, %v479_v38, %v483_v40  ;;  %v2927_v38 = vld [vmem:[%s3301_s19 + $0x5c] sm:$0x1]  ;;  %v495_v45 = vrot.slane %v493_v25, 1 }
  0x4c   : > { %714 = vrot.lane.b32.xlu2 %v670_v57, %s3255_s20  ;;  %v1175_v52 = vrot.slane %v1173_v44, 1  ;;  %v1850_v57 = vshrl.u32 %v3461_v35, 16  ;;  %v1039_v35 = vshrl.u32 %v3487_v18, 16 }
  0x4e   : > { %v1176_v7 = vor.u32 %v1175_v52, %v1171_v51  ;;  %v1855_v10 = vor.u32 %v1854_v58, %v1850_v57  ;;  %v3517_v52 = vld [vmem:[%s3301_s19 + $0x90] sm:$0xff]  ;;  %v1044_v57 = vor.u32 %v1043_v42, %v1039_v35  ;;  %v1048_v58 = vrot.slane %v1046_v43, 1 }
  0x4f   : > { %v584_v1 = vshll.u32 %v3517_v52, 16  ;;  %v582_v22 = vshrl.u32 %v3517_v52, 16 }
  0x50   : > { %1266 = vrot.lane.b32.xlu0 %v1222_v62, %s3255_s20  ;;  %v3478_v62 = vld [vmem:[%s3301_s19 + $0x30] sm:$0xff]  ;;  %v1860_v13 = vsel %vm436_vm1, %v1855_v10, %v1859_v11  ;;  %v277_v11 = vld [vmem:[%s3301_s19 + $0x44] sm:$0x1] }
  0x51   : > { %v488_v15 = vshll.u32 %v3478_v62, 16  ;;  %v674_v51 = vrot.slane %v3478_v62, 1  ;;  %v409_v33 = vunpack.c.l.b16 %v277_v11 }
  0x52   : > { %1210 = vrot.lane.b32.xlu1 %v1169_v8, %s3256_s21  ;;  %v1180_v8 = vrot.slane %v1178_v53, 1  ;;  %v416_v53 = vunpack.c.l.b16 %v298_v41 }
  0x53   : > { %v490_v24 = vrot.slane %v488_v15, 1 }
  0x54   : > { %1999 = vrot.lane.b32.xlu2 %v1848_v21, %s3256_s21  ;;  %v486_v21 = vshrl.u32 %v3478_v62, 16  ;;  %v432_v10 = vpack.c.b16 %v416_v53, %v416_v53 }
  0x56   : > { %v491_v44 = vor.u32 %v490_v24, %v486_v21  ;;  %v2773_v21 = vld [vmem:[%s3301_s19 + $0x50] sm:$0x1]  ;;  %v586_v24 = vrot.slane %v584_v1, 1  ;;  %v589_v25 = vshll.u32 %v432_v10, 16 }
  0x58   : > { %1290 = vrot.lane.b32.xlu0 %v1258_v17, %s3255_s20  ;;  %v1181_v17 = vsel %vm436_vm1, %v1176_v7, %v1180_v8  ;;  %v496_v62 = vsel %vm436_vm1, %v491_v44, %v495_v45  ;;  %v2872_v8 = vld [vmem:[%s4279_s1 + $0x8] sm:$0xf]  ;;  %v587_v41 = vor.u32 %v586_v24, %v582_v22  ;;  %v591_v35 = vrot.slane %v589_v25, 1 }
  0x59   : > { %v2873_v15 = vor.u32 %v3080_v9, %v2872_v8  ;;  %v3562_v44 = vpack.c.b16 %v409_v33, %v409_v33 }
  0x5a   : > { %2079 = vrot.lane.b32.xlu1 %v2036_v37, %s3255_s20  ;;  %v3063_v37 = vld [vmem:[%s4279_s1] sm:$0x30]  ;;  %v592_v53 = vsel %vm436_vm1, %v587_v41, %v591_v35 }
  0x5b   : > { %v2893_v40 = vor.u32 %v3063_v37, %v2892_v36  ;;  %v1401_v26 = vsel %vm1399_vm2, %v2873_v15, 0  ;;  %v3554_v36 = vld [vmem:[%s3301_s19 + $0x3c] sm:$0xff]  ;;  %v3558_v37 = vld [vmem:[%s3301_s19 + $0x48] sm:$0xff] }
  0x5c   : > { %635 = vrot.lane.b32.xlu2 %v484_v49, %s3256_s21  ;;  %v3513_v49 = vld [vmem:[%s3301_s19 + $0x54] sm:$0xff]  ;;  %1410 = vmatpush.bf16.msra.mxu0 %v1401_v26  ;;  %v500_v45 = vshll.u32 %v3554_v36, 16  ;;  %v1229_v41 = vrot.slane %v3558_v37, 1 }
  0x5d   : > { %v1530_v47 = vsel %vm1399_vm2, %v2893_v40, 0  ;;  %v1864_v7 = vshll.u32 %v3513_v49, 16  ;;  %v1862_v27 = vshrl.u32 %v3513_v49, 16  ;;  %3193 = vmatpush.bf16.msra.mxu3 %v1401_v26  ;;  %v2040_v9 = vrot.slane %v3513_v49, 1  ;;  %v3592_v26 = vld [vmem:[%s3301_s19 + $0x60] sm:$0xff] }
  0x5e   : > { %1539 = vmatpush.bf16.msra.mxu1 %v1530_v47 }
  0x5f   : > { %v1866_v28 = vrot.slane %v1864_v7, 1  ;;  %v3580_v7 = vld [vmem:[%s3301_s19 + $0x9c] sm:$0xff] }
  0x60   : > { %1188 = vrot.lane.b32.xlu0 %v1037_v50, %s3256_s21  ;;  %v1774_v50 = vunpack.c.l.b16 %v2927_v38  ;;  %v963_v38 = vunpack.c.l.b16 %v2773_v21  ;;  %v596_v22 = vshll.u32 %v3580_v7, 16 }
  0x61   : > { %3194 = vmatpush.bf16.msrb.mxu3 %v1530_v47  ;;  %v1867_v42 = vor.u32 %v1866_v28, %v1862_v27  ;;  %v594_v27 = vshrl.u32 %v3580_v7, 16  ;;  %v1876_v28 = vshll.u32 %v3592_v26, 16 }
  0x62   : > { %716 = vrot.lane.b32.xlu1 %v673_v61, %s3255_s20  ;;  %v3097_v61 = vld [vmem:[%s4279_s1 + $0x10] sm:$0x30]  ;;  %v3529_v6 = vpack.c.b16 %v1774_v50, %v1774_v50  ;;  %v979_v47 = vpack.c.b16 %v963_v38, %v963_v38  ;;  %v698_v50 = vrot.slane %v3517_v52, 1  ;;  %v677_v38 = vrot.slane %v3554_v36, 1 }
  0x63   : > { %v3027_v4 = vor.u32 %v3097_v61, %v3026_v59  ;;  %v505_v59 = vshll.u32 %v3562_v44, 16  ;;  %v301_v61 = vld [vmem:[%s3301_s19 + $0xa4] sm:$0x1] }
  0x64   : > { %1268 = vrot.lane.b32.xlu2 %v1225_v16, %s3255_s20  ;;  %v676_v16 = vsel %vm661_vm0, %v674_v51, %v675_v55  ;;  %v1869_v29 = vshll.u32 %v3529_v6, 16  ;;  %v699_v51 = vrot.slane %v432_v10, 1  ;;  %v417_v8 = vunpack.c.l.b16 %v301_v61 }
  0x65   : > { %v3540_v14 = vsel %vm1399_vm2, %v3027_v4, 0  ;;  %v1058_v4 = vshll.u32 %v979_v47, 16  ;;  %v2041_v10 = vrot.slane %v3529_v6, 1  ;;  %v507_v15 = vrot.slane %v505_v59, 1 }
  0x66   : > { %2219 = vmatpush.bf16.msra.mxu2 %v3540_v14  ;;  %v1871_v43 = vrot.slane %v1869_v29, 1  ;;  %v700_v52 = vsel %vm661_vm0, %v698_v50, %v699_v51  ;;  %v433_v21 = vpack.c.b16 %v417_v8, %v417_v8  ;;  %v598_v29 = vrot.slane %v596_v22, 1  ;;  %v280_v50 = vld [vmem:[%s3301_s19 + $0x50] sm:$0x1] }
  0x67   : > { %v2042_v24 = vsel %vm661_vm0, %v2040_v9, %v2041_v10  ;;  %v1230_v35 = vrot.slane %v979_v47, 1  ;;  %v1874_v51 = vshrl.u32 %v3592_v26, 16 }
  0x68   : > { %1212 = vrot.lane.b32.xlu0 %v1181_v17, %s3256_s21  ;;  %v1226_v17 = vrot.slane %v3487_v18, 1  ;;  %v1872_v55 = vsel %vm436_vm1, %v1867_v42, %v1871_v43  ;;  %v601_v33 = vshll.u32 %v433_v21, 16 }
  0x6a   : > { %2001 = vrot.lane.b32.xlu1 %v1860_v13, %s3256_s21  ;;  %v1049_v13 = vsel %vm436_vm1, %v1044_v57, %v1048_v58  ;;  %v1228_v40 = vsel %vm661_vm0, %v1226_v17, %v1227_v19  ;;  %v498_v57 = vshrl.u32 %v3554_v36, 16  ;;  %v502_v58 = vrot.slane %v500_v45, 1  ;;  %v2930_v17 = vld [vmem:[%s3301_s19 + $0x68] sm:$0x1] }
  0x6b   : > { %v1775_v49 = vunpack.c.l.b16 %v2930_v17  ;;  %v1878_v36 = vrot.slane %v1876_v28, 1  ;;  %v603_v47 = vrot.slane %v601_v33, 1 }
  0x6c   : > { %1292 = vrot.lane.b32.xlu2 %v1261_v46, %s3255_s20  ;;  %v503_v11 = vor.u32 %v502_v58, %v498_v57  ;;  %v1231_v57 = vsel %vm661_vm0, %v1229_v41, %v1230_v35  ;;  %v3614_v58 = vld [vmem:[%s3301_s19 + $0x54] sm:$0xff]  ;;  %v3649_v41 = vld [vmem:[%s3301_s19 + $0xa8] sm:$0xff] }
  0x6d   : > { %v3602_v42 = vpack.c.b16 %v1775_v49, %v1775_v49  ;;  %v1879_v9 = vor.u32 %v1878_v36, %v1874_v51 }
  0x6e   : > { %v508_v25 = vsel %vm436_vm1, %v503_v11, %v507_v15  ;;  %v1065_v15 = vshll.u32 %v3614_v58, 16 }
  0x70   : > { %2081 = vrot.lane.b32.xlu0 %v2039_v48, %s3255_s20  ;;  %v1053_v48 = vshll.u32 %v3558_v37, 16 }
  0x72   : > { %637 = vrot.lane.b32.xlu1 %v496_v62, %s3256_s21  ;;  %v1051_v62 = vshrl.u32 %v3558_v37, 16  ;;  %v1055_v1 = vrot.slane %v1053_v48, 1  ;;  %v2776_v48 = vld [vmem:[%s3301_s19 + $0x5c] sm:$0x1]  ;;  %v599_v37 = vor.u32 %v598_v29, %v594_v27  ;;  %v2933_v27 = vld [vmem:[%s3301_s19 + $0x74] sm:$0x1] }
  0x73   : > { %v964_v59 = vunpack.c.l.b16 %v2776_v48  ;;  %v3657_v48 = vld [vmem:[%s3301_s19 + $0x6c] sm:$0xff] }
  0x74   : > { %1190 = vrot.lane.b32.xlu2 %v1049_v13, %s3256_s21  ;;  %v1056_v19 = vor.u32 %v1055_v1, %v1051_v62  ;;  %v1060_v13 = vrot.slane %v1058_v4, 1  ;;  %v701_v62 = vrot.slane %v3580_v7, 1  ;;  %v702_v1 = vrot.slane %v433_v21, 1  ;;  %v3620_v4 = vld [vmem:[%s3301_s19 + $0x48] sm:$0xff]  ;;  %v304_v21 = vld [vmem:[%s3301_s19 + $0xb0] sm:$0x1] }
  0x75   : > { %v512_v7 = vshll.u32 %v3620_v4, 16  ;;  %v3629_v11 = vpack.c.b16 %v964_v59, %v964_v59  ;;  %v510_v28 = vshrl.u32 %v3620_v4, 16  ;;  %v418_v35 = vunpack.c.l.b16 %v304_v21  ;;  %v3688_v21 = vld [vmem:[%s3301_s19 + $0x54] sm:$0xff] }
  0x76   : > { %v3565_v46 = vpop.permute.xlu2 %710  ;;  %v1061_v6 = vsel %vm436_vm1, %v1056_v19, %v1060_v13  ;;  %v703_v19 = vsel %vm661_vm0, %v701_v62, %v702_v1  ;;  %v1888_v1 = vshll.u32 %v3657_v48, 16 }
  0x77   : > { %v514_v29 = vrot.slane %v512_v7, 1 }
  0x78   : > { %718 = vrot.lane.b32.xlu0 %v676_v16, %s3255_s20 }
  0x79   : > { %v515_v36 = vor.u32 %v514_v29, %v510_v28  ;;  %v2779_v29 = vld [vmem:[%s3301_s19 + $0x68] sm:$0x1] }
  0x7a   : > { %1270 = vrot.lane.b32.xlu1 %v1228_v40, %s3255_s20  ;;  %v678_v40 = vrot.slane %v3562_v44, 1  ;;  %v1881_v44 = vshll.u32 %v3602_v42, 16 }
  0x7c   : > { %653 = vrot.lane.b32.xlu2 %v592_v53, %s3256_s21  ;;  %v679_v53 = vsel %vm661_vm0, %v677_v38, %v678_v40  ;;  %v1883_v10 = vrot.slane %v1881_v44, 1  ;;  %v1067_v40 = vrot.slane %v1065_v15, 1  ;;  %v283_v15 = vld [vmem:[%s3301_s19 + $0x5c] sm:$0x1] }
  0x7e   : > { %v3584_v16 = vpop.permute.xlu2 %1262  ;;  %v1884_v49 = vsel %vm436_vm1, %v1879_v9, %v1883_v10 }
  0x80   : > { %2003 = vrot.lane.b32.xlu0 %v1872_v55, %s3256_s21 }
  0x82   : > { %734 = vrot.lane.b32.xlu1 %v700_v52, %s3255_s20  ;;  %v410_v52 = vunpack.c.l.b16 %v280_v50  ;;  %v1776_v50 = vunpack.c.l.b16 %v2933_v27 }
  0x84   : > { %2083 = vrot.lane.b32.xlu2 %v2042_v24, %s3255_s20  ;;  %v426_v13 = vpack.c.b16 %v410_v52, %v410_v52  ;;  %v2043_v24 = vrot.slane %v3592_v26, 1  ;;  %v1070_v26 = vshll.u32 %v3629_v11, 16  ;;  %v3671_v62 = vpack.c.b16 %v1776_v50, %v1776_v50 }
  0x86   : > { %v3604_v43 = vpop.permute.xlu2 %1286  ;;  %v517_v33 = vshll.u32 %v426_v13, 16 }
  0x88   : > { %639 = vrot.lane.b32.xlu0 %v508_v25, %s3256_s21  ;;  %v2044_v25 = vrot.slane %v3602_v42, 1  ;;  %v519_v44 = vrot.slane %v517_v33, 1 }
  0x8a   : > { %v2074_v45 = vpop.permute.xlu0 %2073  ;;  %1192 = vrot.lane.b32.xlu1 %v1061_v6, %s3256_s21  ;;  %v2045_v51 = vsel %vm661_vm0, %v2043_v24, %v2044_v25  ;;  %v411_v24 = vunpack.c.l.b16 %v283_v15  ;;  %v1233_v25 = vrot.slane %v3629_v11, 1 }
  0x8c   : > { %v630_v55 = vpop.permute.xlu1 %629  ;;  %720 = vrot.lane.b32.xlu2 %v679_v53, %s3255_s20  ;;  %v3662_v53 = vpack.c.b16 %v418_v35, %v418_v35 }
  0x8d   : > { %v744_v61 = vsel %vm742_vm3, %v3308_v2, %v630_v55  ;;  %v604_v2 = vsel %vm436_vm1, %v599_v37, %v603_v47  ;;  %v1072_v47 = vrot.slane %v1070_v26, 1 }
  0x8e   : > { %v777_v8 = vsel %vm775_vm4, %v744_v61, %v3565_v46  ;;  %v3632_v17 = vpop.permute.xlu2 %1184  ;;  %v681_v61 = vrot.slane %v426_v13, 1  ;;  %v613_v7 = vshll.u32 %v3662_v53, 16  ;;  %v1893_v13 = vshll.u32 %v3671_v62, 16 }
  0x8f   : > { %2894 = vmatmul.msk.bf16.vlgmr.msra.gmra.mxu1 %vm1366_vm5, %v777_v8  ;;  %v520_v8 = vsel %vm436_vm1, %v515_v36, %v519_v44 }
  0x90   : > { %1272 = vrot.lane.b32.xlu0 %v1231_v57, %s3255_s20  ;;  %v680_v57 = vrot.slane %v3620_v4, 1 }
  0x92   : > { %v1994_v46 = vpop.permute.xlu0 %1993  ;;  %655 = vrot.lane.b32.xlu1 %v604_v2, %s3256_s21 }
  0x93   : > { %v2106_v22 = vsel %vm742_vm3, %v3304_v0, %v1994_v46  ;;  %v1063_v0 = vshrl.u32 %v3614_v58, 16  ;;  %v682_v46 = vsel %vm661_vm0, %v680_v57, %v681_v61  ;;  %v2046_v57 = vrot.slane %v3657_v48, 1 }
  0x94   : > { %v2138_v6 = vsel %vm775_vm4, %v2106_v22, %v2074_v45  ;;  %v1183_v38 = vpop.permute.xlu1 %1182  ;;  %2005 = vrot.lane.b32.xlu2 %v1884_v49, %s3256_s21 }
  0x95   : > { %3028 = vmatmul.msk.bf16.vlgmr.msra.gmra.mxu2 %vm1366_vm5, %v2138_v6  ;;  %v1295_v42 = vsel %vm742_vm3, %v3312_v5, %v1183_v38  ;;  %v1068_v37 = vor.u32 %v1067_v40, %v1063_v0  ;;  %v608_v5 = vshll.u32 %v3649_v41, 16  ;;  %v615_v6 = vrot.slane %v613_v7, 1 }
  0x96   : > { %v1327_v45 = vsel %vm775_vm4, %v1295_v42, %v3584_v16  ;;  %v3665_v16 = vpop.permute.xlu2 %1208  ;;  %v524_v0 = vshll.u32 %v3688_v21, 16  ;;  %v427_v40 = vpack.c.b16 %v411_v24, %v411_v24  ;;  %v3705_v42 = vld [vmem:[%s3301_s19 + $0x60] sm:$0xff]  ;;  %v3740_v24 = vld [vmem:[%s3301_s19 + $0xb4] sm:$0xff] }
  0x97   : > { %2874 = vmatmul.msk.bf16.vlgmr.msra.gmra.mxu0 %vm1366_vm5, %v1327_v45  ;;  %v1073_v10 = vsel %vm436_vm1, %v1068_v37, %v1072_v47  ;;  %v610_v2 = vrot.slane %v608_v5, 1  ;;  %v965_v45 = vunpack.c.l.b16 %v2779_v29  ;;  %v1077_v44 = vshll.u32 %v3705_v42, 16 }
  0x98   : > { %736 = vrot.lane.b32.xlu0 %v703_v19, %s3255_s20  ;;  %v1890_v19 = vrot.slane %v1888_v1, 1  ;;  %v526_v36 = vrot.slane %v524_v0, 1  ;;  %v529_v47 = vshll.u32 %v427_v40, 16  ;;  %v704_v5 = vrot.slane %v3649_v41, 1 }
  0x99   : > { %v3718_v61 = vpack.c.b16 %v965_v45, %v965_v45 }
  0x9a   : > { %v1207_v55 = vpop.permute.xlu0 %1206  ;;  %2085 = vrot.lane.b32.xlu1 %v2045_v51, %s3255_s20  ;;  %v522_v51 = vshrl.u32 %v3688_v21, 16  ;;  %v531_v7 = vrot.slane %v529_v47, 1 }
  0x9b   : > { %v1319_v59 = vsel %vm742_vm3, %v3323_v23, %v1207_v55  ;;  %v606_v23 = vshrl.u32 %v3649_v41, 16  ;;  %v705_v55 = vrot.slane %v3662_v53, 1  ;;  %v307_v53 = vld [vmem:[%s3301_s19 + $0xbc] sm:$0x1] }
  0x9c   : > { %v1351_v52 = vsel %vm775_vm4, %v1319_v59, %v3604_v43  ;;  %v1996_v9 = vpop.permute.xlu1 %1995  ;;  %v1886_v43 = vshrl.u32 %v3657_v48, 16  ;;  %641 = vrot.lane.b32.xlu2 %v520_v8, %s3256_s21  ;;  %v2047_v59 = vrot.slane %v3671_v62, 1  ;;  %v2936_v8 = vld [vmem:[%s3301_s19 + $0x80] sm:$0x1]  ;;  %v1079_v62 = vrot.slane %v1077_v44, 1 }
  0x9d   : > { %2886 = vmatmul.msk.bf16.vlgmr.msra.gmra.mxu3 %vm1366_vm5, %v1351_v52  ;;  %v2108_v22 = vsel %vm742_vm3, %v3330_v34, %v1996_v9  ;;  %v611_v49 = vor.u32 %v610_v2, %v606_v23  ;;  %v1895_v34 = vrot.slane %v1893_v13, 1  ;;  %v1082_v23 = vshll.u32 %v3718_v61, 16  ;;  %v2782_v44 = vld [vmem:[%s3301_s19 + $0x74] sm:$0x1] }
  0x9e   : > { %3195 = vmatpush.bf16.msra.mxu3 %v3540_v14  ;;  %v1232_v14 = vrot.slane %v3614_v58, 1  ;;  %v3695_v27 = vpop.permute.xlu2 %2077  ;;  %v1891_v38 = vor.u32 %v1890_v19, %v1886_v43  ;;  %v527_v2 = vor.u32 %v526_v36, %v522_v51  ;;  %v706_v15 = vsel %vm661_vm0, %v704_v5, %v705_v55 }
  0x9f   : > { %v616_v11 = vsel %vm436_vm1, %v611_v49, %v615_v6  ;;  %v1777_v43 = vunpack.c.l.b16 %v2936_v8  ;;  %v683_v13 = vrot.slane %v3688_v21, 1  ;;  %v1084_v49 = vrot.slane %v1082_v23, 1 }
  0xa0   : > { %1194 = vrot.lane.b32.xlu0 %v1073_v10, %s3256_s21  ;;  %v1234_v26 = vsel %vm661_vm0, %v1232_v14, %v1233_v25  ;;  %v1896_v50 = vsel %vm436_vm1, %v1891_v38, %v1895_v34  ;;  %v1075_v10 = vshrl.u32 %v3705_v42, 16  ;;  %v419_v14 = vunpack.c.l.b16 %v307_v53 }
  0xa1   : > { %v532_v6 = vsel %vm436_vm1, %v527_v2, %v531_v7  ;;  %v3747_v29 = vpack.c.b16 %v1777_v43, %v1777_v43 }
  0xa2   : > { %v2076_v28 = vpop.permute.xlu0 %2075  ;;  %722 = vrot.lane.b32.xlu1 %v682_v46, %s3255_s20  ;;  %v3735_v46 = vld [vmem:[%s3301_s19 + $0x78] sm:$0xff]  ;;  %v1080_v25 = vor.u32 %v1079_v62, %v1075_v10 }
  0xa3   : > { %v2140_v33 = vsel %vm775_vm4, %v2108_v22, %v2076_v28  ;;  %v684_v22 = vrot.slane %v427_v40, 1  ;;  %v620_v28 = vshll.u32 %v3740_v24, 16  ;;  %v1235_v40 = vrot.slane %v3705_v42, 1 }
  0xa4   : > { %v632_v35 = vpop.permute.xlu1 %631  ;;  %1274 = vrot.lane.b32.xlu2 %v1234_v26, %s3255_s20  ;;  %v435_v26 = vpack.c.b16 %v419_v14, %v419_v14  ;;  %v1085_v51 = vsel %vm436_vm1, %v1080_v25, %v1084_v49 }
  0xa5   : > { %3029 = vmatmul.msk.bf16.gmra.mxu2 %vm1366_vm5, %v2140_v33  ;;  %v746_v37 = vsel %vm742_vm3, %v3345_v54, %v632_v35  ;;  %v1297_v54 = vsel %vm742_vm3, %v3357_v12, %v3632_v17  ;;  %v2048_v17 = vsel %vm661_vm0, %v2046_v57, %v2047_v59  ;;  %v1900_v33 = vshll.u32 %v3735_v46, 16  ;;  %v286_v35 = vld [vmem:[%s3301_s19 + $0x68] sm:$0x1]  ;;  %v3771_v57 = vld [vmem:[%s3301_s19 + $0x60] sm:$0xff] }
  0xa6   : > { %v3720_v1 = vpop.permute.xlu2 %714  ;;  %v685_v0 = vsel %vm661_vm0, %v683_v13, %v684_v22  ;;  %v622_v47 = vrot.slane %v620_v28, 1  ;;  %v625_v5 = vshll.u32 %v435_v26, 16  ;;  %v412_v59 = vunpack.c.l.b16 %v286_v35  ;;  %v2939_v28 = vld [vmem:[%s3301_s19 + $0x8c] sm:$0x1] }
  0xa7   : > { %v536_v23 = vshll.u32 %v3771_v57, 16  ;;  %v1778_v35 = vunpack.c.l.b16 %v2939_v28 }
  0xa8   : > { %657 = vrot.lane.b32.xlu0 %v616_v11, %s3256_s21  ;;  %v1321_v11 = vsel %vm742_vm3, %v3374_v32, %v3665_v16  ;;  %v1902_v32 = vrot.slane %v1900_v33, 1  ;;  %v1905_v16 = vshll.u32 %v3747_v29, 16  ;;  %v3781_v62 = vpack.c.b16 %v412_v59, %v412_v59  ;;  %v3823_v59 = vld [vmem:[%s3301_s19 + $0xa8] sm:$0xff] }
  0xa9   : > { %v538_v49 = vrot.slane %v536_v23, 1  ;;  %v686_v23 = vrot.slane %v3771_v57, 1 }
  0xaa   : > { %v713_v52 = vpop.permute.xlu0 %712  ;;  %2007 = vrot.lane.b32.xlu1 %v1896_v50, %s3256_s21  ;;  %v1236_v50 = vrot.slane %v3718_v61, 1  ;;  %v1907_v10 = vrot.slane %v1905_v16, 1 }
  0xab   : > { %v779_v9 = vsel %vm775_vm4, %v746_v37, %v713_v52  ;;  %v618_v37 = vshrl.u32 %v3740_v24, 16 }
  0xac   : > { %2895 = vmatmul.msk.bf16.gmra.mxu1 %vm1366_vm5, %v779_v9  ;;  %v1265_v12 = vpop.permute.xlu1 %1264  ;;  %738 = vrot.lane.b32.xlu2 %v706_v15, %s3255_s20  ;;  %v1237_v52 = vsel %vm661_vm0, %v1235_v40, %v1236_v50  ;;  %v627_v9 = vrot.slane %v625_v5, 1  ;;  %v707_v15 = vrot.slane %v3740_v24, 1  ;;  %v3806_v40 = vld [vmem:[%s3301_s19 + $0x84] sm:$0xff] }
  0xad   : > { %v1329_v19 = vsel %vm775_vm4, %v1297_v54, %v1265_v12  ;;  %v966_v54 = vunpack.c.l.b16 %v2782_v44  ;;  %v623_v8 = vor.u32 %v622_v47, %v618_v37  ;;  %v2948_v37 = vld [vmem:[%s3301_s19 + $0xb0] sm:$0x1] }
  0xae   : > { %2875 = vmatmul.msk.bf16.gmra.mxu0 %vm1366_vm5, %v1329_v19  ;;  %v3750_v38 = vpop.permute.xlu2 %1999 }
  0xaf   : > { %v3790_v43 = vpack.c.b16 %v966_v54, %v966_v54  ;;  %v628_v22 = vsel %vm436_vm1, %v623_v8, %v627_v9  ;;  %v1948_v9 = vshll.u32 %v3823_v59, 16 }
  0xb0   : > { %2087 = vrot.lane.b32.xlu0 %v2048_v17, %s3255_s20  ;;  %v708_v17 = vrot.slane %v435_v26, 1 }
  0xb2   : > { %v1998_v34 = vpop.permute.xlu0 %1997  ;;  %643 = vrot.lane.b32.xlu1 %v532_v6, %s3256_s21  ;;  %v541_v6 = vshll.u32 %v3781_v62, 16  ;;  %v709_v33 = vsel %vm661_vm0, %v707_v15, %v708_v17 }
  0xb3   : > { %v2110_v45 = vsel %vm742_vm3, %v3371_v30, %v1998_v34  ;;  %v1898_v30 = vshrl.u32 %v3735_v46, 16 }
  0xb4   : > { %v2142_v36 = vsel %vm775_vm4, %v2110_v45, %v3695_v27  ;;  %v1289_v55 = vpop.permute.xlu1 %1288  ;;  %1196 = vrot.lane.b32.xlu2 %v1085_v51, %s3256_s21  ;;  %v3777_v27 = vld [vmem:[%s3301_s19 + $0x6c] sm:$0xff]  ;;  %v2050_v45 = vrot.slane %v3747_v29, 1  ;;  %v543_v51 = vrot.slane %v541_v6, 1 }
  0xb5   : > { %3030 = vmatmul.msk.bf16.gmra.mxu2 %vm1366_vm5, %v2142_v36  ;;  %v1353_v61 = vsel %vm775_vm4, %v1321_v11, %v1289_v55  ;;  %v1903_v53 = vor.u32 %v1902_v32, %v1898_v30  ;;  %v1089_v19 = vshll.u32 %v3777_v27, 16  ;;  %v1087_v34 = vshrl.u32 %v3777_v27, 16 }
  0xb6   : > { %2887 = vmatmul.msk.bf16.gmra.mxu3 %vm1366_vm5, %v1353_v61  ;;  %v3784_v2 = vpop.permute.xlu2 %635  ;;  %v2049_v11 = vrot.slane %v3735_v46, 1  ;;  %v1912_v55 = vshll.u32 %v3806_v40, 16  ;;  %v1794_v30 = vpack.c.b16 %v1778_v35, %v1778_v35  ;;  %v1781_v61 = vunpack.c.l.b16 %v2948_v37  ;;  %v3858_v35 = vld [vmem:[%s3301_s19 + $0x6c] sm:$0xff] }
  0xb7   : > { %v1908_v25 = vsel %vm436_vm1, %v1903_v53, %v1907_v10  ;;  %v1238_v15 = vrot.slane %v3777_v27, 1 }
  0xb8   : > { %724 = vrot.lane.b32.xlu0 %v685_v0, %s3255_s20  ;;  %v1091_v0 = vrot.slane %v1089_v19, 1  ;;  %v2051_v29 = vsel %vm661_vm0, %v2049_v11, %v2050_v45  ;;  %v1914_v8 = vrot.slane %v1912_v55, 1  ;;  %v1917_v10 = vshll.u32 %v1794_v30, 16 }
  0xb9   : > { %v3836_v17 = vpack.c.b16 %v1781_v61, %v1781_v61 }
  0xba   : > { %v634_v7 = vpop.permute.xlu0 %633  ;;  %1276 = vrot.lane.b32.xlu1 %v1237_v52, %s3255_s20  ;;  %v1092_v5 = vor.u32 %v1091_v0, %v1087_v34  ;;  %v1910_v52 = vshrl.u32 %v3806_v40, 16  ;;  %v1919_v6 = vrot.slane %v1917_v10, 1 }
  0xbb   : > { %v748_v12 = vsel %vm742_vm3, %v3390_v56, %v634_v7  ;;  %v534_v56 = vshrl.u32 %v3771_v57, 16  ;;  %v687_v7 = vrot.slane %v3781_v62, 1  ;;  %v289_v62 = vld [vmem:[%s3301_s19 + $0x74] sm:$0x1] }
  0xbc   : > { %v781_v13 = vsel %vm775_vm4, %v748_v12, %v3720_v1  ;;  %v1187_v14 = vpop.permute.xlu1 %1186  ;;  %v1094_v1 = vshll.u32 %v3790_v43, 16  ;;  %659 = vrot.lane.b32.xlu2 %v628_v22, %s3256_s21  ;;  %v1239_v12 = vrot.slane %v3790_v43, 1  ;;  %v2785_v22 = vld [vmem:[%s3301_s19 + $0x80] sm:$0x1]  ;;  %v1950_v43 = vrot.slane %v1948_v9, 1 }
  0xbd   : > { %2896 = vmatmul.msk.bf16.gmra.mxu1 %vm1366_vm5, %v781_v13  ;;  %v1299_v26 = vsel %vm742_vm3, %v3397_v60, %v1187_v14  ;;  %v539_v50 = vor.u32 %v538_v49, %v534_v56  ;;  %v1953_v56 = vshll.u32 %v3836_v17, 16  ;;  %v1915_v49 = vor.u32 %v1914_v8, %v1910_v52  ;;  %v2951_v9 = vld [vmem:[%s3301_s19 + $0xbc] sm:$0x1] }
  0xbe   : > { %v3813_v36 = vpop.permute.xlu2 %1268  ;;  %v1096_v60 = vrot.slane %v1094_v1, 1  ;;  %v688_v28 = vsel %vm661_vm0, %v686_v23, %v687_v7  ;;  %v967_v34 = vunpack.c.l.b16 %v2785_v22  ;;  %v2052_v1 = vrot.slane %v3806_v40, 1 }
  0xbf   : > { %v544_v16 = vsel %vm436_vm1, %v539_v50, %v543_v51  ;;  %v413_v11 = vunpack.c.l.b16 %v289_v62  ;;  %v1955_v50 = vrot.slane %v1953_v56, 1  ;;  %v1920_v51 = vsel %vm436_vm1, %v1915_v49, %v1919_v6 }
  0xc0   : > { %2009 = vrot.lane.b32.xlu0 %v1908_v25, %s3256_s21  ;;  %v1097_v54 = vsel %vm436_vm1, %v1092_v5, %v1096_v60  ;;  %v1946_v25 = vshrl.u32 %v3823_v59, 16  ;;  %v3865_v37 = vpack.c.b16 %v967_v34, %v967_v34 }
  0xc2   : > { %v1267_v44 = vpop.permute.xlu0 %1266  ;;  %740 = vrot.lane.b32.xlu1 %v709_v33, %s3255_s20  ;;  %v3853_v33 = vld [vmem:[%s3301_s19 + $0x78] sm:$0xff]  ;;  %v1951_v45 = vor.u32 %v1950_v43, %v1946_v25 }
  0xc3   : > { %v1331_v47 = vsel %vm775_vm4, %v1299_v26, %v1267_v44  ;;  %v2053_v26 = vrot.slane %v1794_v30, 1  ;;  %v548_v44 = vshll.u32 %v3858_v35, 16  ;;  %v2061_v30 = vrot.slane %v3823_v59, 1 }
  0xc4   : > { %2876 = vmatmul.msk.bf16.gmra.mxu0 %vm1366_vm5, %v1331_v47  ;;  %v1211_v32 = vpop.permute.xlu1 %1210  ;;  %2089 = vrot.lane.b32.xlu2 %v2051_v29, %s3255_s20  ;;  %v1101_v47 = vshll.u32 %v3853_v33, 16  ;;  %v429_v29 = vpack.c.b16 %v413_v11, %v413_v11  ;;  %v1956_v52 = vsel %vm436_vm1, %v1951_v45, %v1955_v50 }
  0xc5   : > { %v1323_v53 = vsel %vm742_vm3, %v3411_v20, %v1211_v32  ;;  %v2112_v20 = vsel %vm742_vm3, %v3421_v39, %v3750_v38  ;;  %v1240_v38 = vsel %vm661_vm0, %v1238_v15, %v1239_v12  ;;  %v2054_v55 = vsel %vm661_vm0, %v2052_v1, %v2053_v26  ;;  %v2942_v32 = vld [vmem:[%s3301_s19 + $0x98] sm:$0x1]  ;;  %v3889_v15 = vld [vmem:[%s3301_s19 + $0x90] sm:$0xff] }
  0xc6   : > { %v3838_v19 = vpop.permute.xlu2 %1292  ;;  %v550_v10 = vrot.slane %v548_v44, 1  ;;  %v553_v23 = vshll.u32 %v429_v29, 16  ;;  %v1779_v12 = vunpack.c.l.b16 %v2942_v32  ;;  %v1924_v56 = vshll.u32 %v3889_v15, 16  ;;  %v292_v44 = vld [vmem:[%s3301_s19 + $0x80] sm:$0x1] }
  0xc8   : > { %645 = vrot.lane.b32.xlu0 %v544_v16, %s3256_s21  ;;  %v750_v16 = vsel %vm742_vm3, %v3440_v3, %v3784_v2  ;;  %v1103_v3 = vrot.slane %v1101_v47, 1  ;;  %v1106_v2 = vshll.u32 %v3865_v37, 16  ;;  %v3899_v43 = vpack.c.b16 %v1779_v12, %v1779_v12 }
  0xc9   : > { %v1926_v50 = vrot.slane %v1924_v56, 1  ;;  %v3224_v56 = vld [vmem:[%s3301_s19 + $0x30] sm:$0xff] }
  0xca   : > { %v1291_v13 = vpop.permute.xlu0 %1290  ;;  %1198 = vrot.lane.b32.xlu1 %v1097_v54, %s3256_s21  ;;  %v2062_v54 = vrot.slane %v3836_v17, 1  ;;  %v1108_v25 = vrot.slane %v1106_v2, 1 }
  0xcb   : > { %v1355_v14 = vsel %vm775_vm4, %v1323_v53, %v1291_v13  ;;  %v546_v53 = vshrl.u32 %v3858_v35, 16 }
  0xcc   : > { %2888 = vmatmul.msk.bf16.gmra.mxu3 %vm1366_vm5, %v1355_v14  ;;  %v2080_v39 = vpop.permute.xlu1 %2079  ;;  %726 = vrot.lane.b32.xlu2 %v688_v28, %s3255_s20  ;;  %v2063_v13 = vsel %vm661_vm0, %v2061_v30, %v2062_v54  ;;  %v555_v14 = vrot.slane %v553_v23, 1  ;;  %v689_v28 = vrot.slane %v3858_v35, 1  ;;  %v3924_v30 = vld [vmem:[%s3301_s19 + $0x78] sm:$0xff]  ;;  %v1242_v54 = vrot.slane %v3865_v37, 1 }
  0xcd   : > { %v2144_v0 = vsel %vm775_vm4, %v2112_v20, %v2080_v39  ;;  %v1782_v20 = vunpack.c.l.b16 %v2951_v9  ;;  %v551_v22 = vor.u32 %v550_v10, %v546_v53  ;;  %v2788_v10 = vld [vmem:[%s3301_s19 + $0x8c] sm:$0x1] }
  0xce   : > { %3031 = vmatmul.msk.bf16.gmra.mxu2 %vm1366_vm5, %v2144_v0  ;;  %v3868_v5 = vpop.permute.xlu2 %1190 }
  0xcf   : > { %v3908_v34 = vpack.c.b16 %v1782_v20, %v1782_v20  ;;  %v556_v26 = vsel %vm436_vm1, %v551_v22, %v555_v14  ;;  %v3941_v20 = vld [vmem:[%s3301_s19 + $0x84] sm:$0xff]  ;;  %v558_v14 = vshrl.u32 %v3924_v30, 16 }
  0xd0   : > { %1278 = vrot.lane.b32.xlu0 %v1240_v38, %s3255_s20  ;;  %v690_v38 = vrot.slane %v429_v29, 1  ;;  %v3223_v29 = vld [vmem:[%s3301_s19 + $0x48] sm:$0xff] }
  0xd2   : > { %v1189_v60 = vpop.permute.xlu0 %1188  ;;  %2011 = vrot.lane.b32.xlu1 %v1920_v51, %s3256_s21  ;;  %v1929_v51 = vshll.u32 %v3899_v43, 16  ;;  %v691_v47 = vsel %vm661_vm0, %v689_v28, %v690_v38  ;;  %v2056_v38 = vrot.slane %v3899_v43, 1  ;;  %v2945_v43 = vld [vmem:[%s3301_s19 + $0xa4] sm:$0x1] }
  0xd3   : > { %v1301_v61 = vsel %vm742_vm3, %v3437_v63, %v1189_v60  ;;  %v1099_v63 = vshrl.u32 %v3853_v33, 16 }
  0xd4   : > { %v1333_v8 = vsel %vm775_vm4, %v1301_v61, %v3813_v36  ;;  %v717_v7 = vpop.permute.xlu1 %716  ;;  %2017 = vrot.lane.b32.xlu2 %v1956_v52, %s3256_s21  ;;  %v3895_v36 = vld [vmem:[%s3301_s19 + $0xb4] sm:$0xff]  ;;  %v1241_v61 = vrot.slane %v3853_v33, 1 }
  0xd5   : > { %2877 = vmatmul.msk.bf16.gmra.mxu0 %vm1366_vm5, %v1333_v8  ;;  %v783_v17 = vsel %vm775_vm4, %v750_v16, %v717_v7  ;;  %v1104_v62 = vor.u32 %v1103_v3, %v1099_v63  ;;  %v1960_v0 = vshll.u32 %v3895_v36, 16  ;;  %v1958_v60 = vshrl.u32 %v3895_v36, 16 }
  0xd6   : > { %2897 = vmatmul.msk.bf16.gmra.mxu1 %vm1366_vm5, %v783_v17  ;;  %v3902_v49 = vpop.permute.xlu2 %653  ;;  %v414_v16 = vunpack.c.l.b16 %v292_v44  ;;  %v1931_v8 = vrot.slane %v1929_v51, 1  ;;  %v560_v3 = vshll.u32 %v3924_v30, 16  ;;  %v1243_v37 = vsel %vm661_vm0, %v1241_v61, %v1242_v54 }
  0xd7   : > { %v1109_v45 = vsel %vm436_vm1, %v1104_v62, %v1108_v25  ;;  %v1113_v25 = vshll.u32 %v3941_v20, 16  ;;  %v1111_v44 = vshrl.u32 %v3941_v20, 16  ;;  %v692_v61 = vrot.slane %v3924_v30, 1 }
  0xd8   : > { %2091 = vrot.lane.b32.xlu0 %v2054_v55, %s3255_s20  ;;  %v1962_v55 = vrot.slane %v1960_v0, 1  ;;  %v430_v2 = vpack.c.b16 %v414_v16, %v414_v16  ;;  %v562_v62 = vrot.slane %v560_v3, 1  ;;  %v2064_v0 = vrot.slane %v3895_v36, 1 }
  0xda   : > { %v1213_v6 = vpop.permute.xlu0 %1212  ;;  %2097 = vrot.lane.b32.xlu1 %v2063_v13, %s3255_s20  ;;  %v1963_v7 = vor.u32 %v1962_v55, %v1958_v60  ;;  %v968_v13 = vunpack.c.l.b16 %v2788_v10  ;;  %v565_v28 = vshll.u32 %v430_v2, 16  ;;  %v563_v60 = vor.u32 %v562_v62, %v558_v14  ;;  %v3225_v14 = vld [vmem:[%s3301_s19 + $0x90] sm:$0xff] }
  0xdb   : > { %v1325_v39 = vsel %vm742_vm3, %v3457_v31, %v1213_v6  ;;  %v1922_v31 = vshrl.u32 %v3889_v15, 16  ;;  %v693_v54 = vrot.slane %v430_v2, 1  ;;  %v768_v62 = vsel %vm742_vm3, %v3225_v14, %v3902_v49 }
  0xdc   : > { %v1357_v1 = vsel %vm775_vm4, %v1325_v39, %v3838_v19  ;;  %v2002_v11 = vpop.permute.xlu1 %2001  ;;  %v1965_v19 = vshll.u32 %v3908_v34, 16  ;;  %647 = vrot.lane.b32.xlu2 %v556_v26, %s3256_s21  ;;  %v2055_v39 = vrot.slane %v3889_v15, 1  ;;  %v3954_v26 = vpack.c.b16 %v968_v13, %v968_v13 }
  0xdd   : > { %2889 = vmatmul.msk.bf16.gmra.mxu3 %vm1366_vm5, %v1357_v1  ;;  %v2114_v32 = vsel %vm742_vm3, %v3223_v29, %v2002_v11  ;;  %v1927_v52 = vor.u32 %v1926_v50, %v1922_v31  ;;  %v2065_v1 = vrot.slane %v3908_v34, 1  ;;  %v2954_v50 = vld [vmem:[%s3301_s19 + $0xc8] sm:$0x1]  ;;  %v1115_v34 = vrot.slane %v1113_v25, 1  ;;  %v3971_v29 = vld [vmem:[%s3301_s19 + $0xc0] sm:$0xff]  ;;  %v3226_v25 = vld [vmem:[%s3301_s19 + $0x54] sm:$0xff] }
  0xde   : > { %v3931_v9 = vpop.permute.xlu2 %2083  ;;  %v1967_v63 = vrot.slane %v1965_v19, 1  ;;  %v567_v55 = vrot.slane %v565_v28, 1  ;;  %v2057_v19 = vsel %vm661_vm0, %v2055_v39, %v2056_v38  ;;  %v1972_v3 = vshll.u32 %v3971_v29, 16  ;;  %v2791_v38 = vld [vmem:[%s3301_s19 + $0x98] sm:$0x1] }
  0xdf   : > { %v1932_v17 = vsel %vm436_vm1, %v1927_v52, %v1931_v8  ;;  %v3976_v52 = vld [vmem:[%s3301_s19 + $0x9c] sm:$0xff]  ;;  %v1780_v8 = vunpack.c.l.b16 %v2945_v43 }
  0xe0   : > { %1200 = vrot.lane.b32.xlu0 %v1109_v45, %s3256_s21  ;;  %v1968_v22 = vsel %vm436_vm1, %v1963_v7, %v1967_v63  ;;  %v1303_v45 = vsel %vm742_vm3, %v3487_v18, %v3868_v5  ;;  %v2066_v5 = vsel %vm661_vm0, %v2064_v0, %v2065_v1  ;;  %v1936_v7 = vshll.u32 %v3976_v52, 16 }
  0xe1   : > { %v1796_v13 = vpack.c.b16 %v1780_v8, %v1780_v8  ;;  %v1934_v0 = vshrl.u32 %v3976_v52, 16  ;;  %v3227_v8 = vld [vmem:[%s3301_s19 + $0x3c] sm:$0xff] }
  0xe2   : > { %v2082_v53 = vpop.permute.xlu0 %2081  ;;  %728 = vrot.lane.b32.xlu1 %v691_v47, %s3255_s20  ;;  %v1118_v47 = vshll.u32 %v3954_v26, 16  ;;  %v1938_v1 = vrot.slane %v1936_v7, 1 }
  0xe3   : > { %v2146_v23 = vsel %vm775_vm4, %v2114_v32, %v2082_v53  ;;  %v1783_v32 = vunpack.c.l.b16 %v2954_v50  ;;  %v1116_v53 = vor.u32 %v1115_v34, %v1111_v44  ;;  %v1974_v50 = vrot.slane %v1972_v3, 1 }
  0xe4   : > { %3032 = vmatmul.msk.bf16.gmra.mxu2 %vm1366_vm5, %v2146_v23  ;;  %v638_v12 = vpop.permute.xlu1 %637  ;;  %1280 = vrot.lane.b32.xlu2 %v1243_v37, %s3255_s20  ;;  %v1120_v10 = vrot.slane %v1118_v47, 1  ;;  %v568_v23 = vsel %vm436_vm1, %v563_v60, %v567_v55  ;;  %v969_v34 = vunpack.c.l.b16 %v2791_v38  ;;  %v1939_v60 = vor.u32 %v1938_v1, %v1934_v0 }
  0xe5   : > { %v752_v6 = vsel %vm742_vm3, %v3224_v56, %v638_v12  ;;  %v3983_v63 = vpack.c.b16 %v1783_v32, %v1783_v32  ;;  %v694_v12 = vsel %vm661_vm0, %v692_v61, %v693_v54  ;;  %v2058_v54 = vrot.slane %v3976_v52, 1 }
  0xe6   : > { %v3956_v11 = vpop.permute.xlu2 %720  ;;  %v1121_v28 = vsel %vm436_vm1, %v1116_v53, %v1120_v10  ;;  %v2059_v10 = vrot.slane %v1796_v13, 1  ;;  %v2067_v1 = vrot.slane %v3971_v29, 1 }
  0xe8   : > { %2013 = vrot.lane.b32.xlu0 %v1932_v17, %s3256_s21  ;;  %v1244_v17 = vrot.slane %v3941_v20, 1 }
  0xea   : > { %v719_v31 = vpop.permute.xlu0 %718  ;;  %2019 = vrot.lane.b32.xlu1 %v1968_v22, %s3256_s21  ;;  %v295_v22 = vld [vmem:[%s3301_s19 + $0x8c] sm:$0x1] }
  0xeb   : > { %v785_v51 = vsel %vm775_vm4, %v752_v6, %v719_v31  ;;  %v1245_v6 = vrot.slane %v3954_v26, 1  ;;  %v1970_v31 = vshrl.u32 %v3971_v29, 16  ;;  %v4007_v26 = vld [vmem:[%s3301_s19 + $0x84] sm:$0xff]  ;;  %v415_v43 = vunpack.c.l.b16 %v295_v22 }
  0xec   : > { %2898 = vmatmul.msk.bf16.gmra.mxu1 %vm1366_vm5, %v785_v51  ;;  %v1271_v18 = vpop.permute.xlu1 %1270  ;;  %2093 = vrot.lane.b32.xlu2 %v2057_v19, %s3255_s20  ;;  %v1977_v51 = vshll.u32 %v3983_v63, 16  ;;  %v572_v32 = vshll.u32 %v4007_v26, 16  ;;  %v570_v22 = vshrl.u32 %v4007_v26, 16 }
  0xed   : > { %v1335_v16 = vsel %vm775_vm4, %v1303_v45, %v1271_v18  ;;  %v1941_v45 = vshll.u32 %v1796_v13, 16  ;;  %v1246_v47 = vsel %vm661_vm0, %v1244_v17, %v1245_v6  ;;  %v1975_v19 = vor.u32 %v1974_v50, %v1970_v31 }
  0xee   : > { %2878 = vmatmul.msk.bf16.gmra.mxu0 %vm1366_vm5, %v1335_v16  ;;  %v3986_v2 = vpop.permute.xlu2 %2005  ;;  %v1979_v18 = vrot.slane %v1977_v51, 1  ;;  %v574_v14 = vrot.slane %v572_v32, 1 }
  0xef   : > { %v1943_v55 = vrot.slane %v1941_v45, 1  ;;  %v2068_v45 = vrot.slane %v3983_v63, 1 }
  0xf0   : > { %2099 = vrot.lane.b32.xlu0 %v2066_v5, %s3255_s20  ;;  %v4017_v5 = vpack.c.b16 %v415_v43, %v415_v43  ;;  %v1980_v17 = vsel %vm436_vm1, %v1975_v19, %v1979_v18 }
  0xf2   : > { %v2004_v37 = vpop.permute.xlu0 %2003  ;;  %649 = vrot.lane.b32.xlu1 %v568_v23, %s3256_s21  ;;  %v985_v23 = vpack.c.b16 %v969_v34, %v969_v34  ;;  %v577_v13 = vshll.u32 %v4017_v5, 16 }
  0xf3   : > { %v2116_v56 = vsel %vm742_vm3, %v3226_v25, %v2004_v37  ;;  %v1944_v37 = vsel %vm436_vm1, %v1939_v60, %v1943_v55  ;;  %v2060_v25 = vsel %vm661_vm0, %v2058_v54, %v2059_v10  ;;  %v2069_v55 = vsel %vm661_vm0, %v2067_v1, %v2068_v45  ;;  %v3229_v54 = vld [vmem:[%s3301_s19 + $0x9c] sm:$0xff] }
  0xf4   : > { %v2148_v39 = vsel %vm775_vm4, %v2116_v56, %v3931_v9  ;;  %v735_v49 = vpop.permute.xlu1 %734  ;;  %1202 = vrot.lane.b32.xlu2 %v1121_v28, %s3256_s21  ;;  %v4013_v9 = vld [vmem:[%s3301_s19 + $0x90] sm:$0xff]  ;;  %v1130_v28 = vshll.u32 %v985_v23, 16  ;;  %v579_v31 = vrot.slane %v577_v13, 1  ;;  %v695_v10 = vrot.slane %v4007_v26, 1 }
  0xf5   : > { %3033 = vmatmul.msk.bf16.gmra.mxu2 %vm1366_vm5, %v2148_v39  ;;  %v801_v44 = vsel %vm775_vm4, %v768_v62, %v735_v49  ;;  %v1125_v7 = vshll.u32 %v4013_v9, 16  ;;  %v2957_v62 = vld [vmem:[%s3301_s19 + $0xd4] sm:$0x1]  ;;  %v1123_v56 = vshrl.u32 %v4013_v9, 16  ;;  %v3228_v39 = vld [vmem:[%s3301_s19 + $0x48] sm:$0xff]  ;;  %v575_v49 = vor.u32 %v574_v14, %v570_v22  ;;  %v3230_v22 = vld [vmem:[%s3301_s19 + $0x60] sm:$0xff] }
  0xf6   : > { %2906 = vmatmul.msk.bf16.vlgmr.msrb.gmra.mxu3 %vm1366_vm5, %v801_v44  ;;  %v4020_v16 = vpop.permute.xlu2 %641  ;;  %v1784_v0 = vunpack.c.l.b16 %v2957_v62  ;;  %v1132_v34 = vrot.slane %v1130_v28, 1  ;;  %v2118_v14 = vsel %vm742_vm3, %v3230_v22, %v3986_v2 }
  0xf7   : > { %v1127_v6 = vrot.slane %v1125_v7, 1  ;;  %v580_v63 = vsel %vm436_vm1, %v575_v49, %v579_v31  ;;  %v696_v7 = vrot.slane %v4017_v5, 1  ;;  %v756_v45 = vsel %vm742_vm3, %v3620_v4, %v4020_v16 }
  0xf8   : > { %730 = vrot.lane.b32.xlu0 %v694_v12, %s3255_s20  ;;  %v1800_v60 = vpack.c.b16 %v1784_v0, %v1784_v0 }
  0xf9   : > { %v1128_v44 = vor.u32 %v1127_v6, %v1123_v56  ;;  %v697_v56 = vsel %vm661_vm0, %v695_v10, %v696_v7 }
  0xfa   : > { %v640_v61 = vpop.permute.xlu0 %639  ;;  %1282 = vrot.lane.b32.xlu1 %v1246_v47, %s3255_s20 }
  0xfb   : > { %v754_v53 = vsel %vm742_vm3, %v3227_v8, %v640_v61  ;;  %v1133_v18 = vsel %vm436_vm1, %v1128_v44, %v1132_v34 }
  0xfc   : > { %v787_v3 = vsel %vm775_vm4, %v754_v53, %v3956_v11  ;;  %v1193_v12 = vpop.permute.xlu1 %1192  ;;  %2015 = vrot.lane.b32.xlu2 %v1944_v37, %s3256_s21  ;;  %v4039_v11 = vld [vmem:[%s3301_s19 + $0xcc] sm:$0xff]  ;;  %v1989_v53 = vshll.u32 %v1800_v60, 16  ;;  %v1248_v37 = vrot.slane %v985_v23, 1 }
  0xfd   : > { %2899 = vmatmul.msk.bf16.gmra.mxu1 %vm1366_vm5, %v787_v3  ;;  %v1305_v38 = vsel %vm742_vm3, %v3228_v39, %v1193_v12  ;;  %v1984_v47 = vshll.u32 %v4039_v11, 16  ;;  %v1982_v32 = vshrl.u32 %v4039_v11, 16  ;;  %v1247_v3 = vrot.slane %v4013_v9, 1 }
  0xfe   : > { %v1275_v50 = vpop.permute.xlu2 %1274  ;;  %v2070_v28 = vrot.slane %v4039_v11, 1  ;;  %v2071_v39 = vrot.slane %v1800_v60, 1 }
  0xff   : > { %v1986_v61 = vrot.slane %v1984_v47, 1  ;;  %v1249_v6 = vsel %vm661_vm0, %v1247_v3, %v1248_v37 }
 0x100   : > { %2021 = vrot.lane.b32.xlu0 %v1980_v17, %s3256_s21 }
 0x101   : > { %v1987_v62 = vor.u32 %v1986_v61, %v1982_v32 }
 0x102   : > { %v1273_v51 = vpop.permute.xlu0 %1272  ;;  %2095 = vrot.lane.b32.xlu1 %v2060_v25, %s3255_s20  ;;  %v1991_v25 = vrot.slane %v1989_v53, 1 }
 0x103   : > { %v1337_v43 = vsel %vm775_vm4, %v1305_v38, %v1273_v51  ;;  %v2072_v51 = vsel %vm661_vm0, %v2070_v28, %v2071_v39 }
 0x104   : > { %2879 = vmatmul.msk.bf16.gmra.mxu0 %vm1366_vm5, %v1337_v43  ;;  %v656_v19 = vpop.permute.xlu1 %655  ;;  %2101 = vrot.lane.b32.xlu2 %v2069_v55, %s3255_s20  ;;  %v1992_v2 = vsel %vm436_vm1, %v1987_v62, %v1991_v25 }
 0x105   : > { %v770_v8 = vsel %vm742_vm3, %v3229_v54, %v656_v19 }
 0x106   : > { %v739_v12 = vpop.permute.xlu2 %738 }
 0x108   : > { %651 = vrot.lane.b32.xlu0 %v580_v63, %s3256_s21 }
 0x10a   : > { %v737_v17 = vpop.permute.xlu0 %736  ;;  %1204 = vrot.lane.b32.xlu1 %v1133_v18, %s3256_s21 }
 0x10b   : > { %v803_v13 = vsel %vm775_vm4, %v770_v8, %v737_v17 }
 0x10c   : > { %2907 = vmatmul.msk.bf16.gmra.mxu3 %vm1366_vm5, %v803_v13  ;;  %v2086_v5 = vpop.permute.xlu1 %2085  ;;  %732 = vrot.lane.b32.xlu2 %v697_v56, %s3255_s20  ;;  %v1541_v49 = vpop.f32.mrf.mxu1 }
 0x10d   : > { %v2150_v23 = vsel %vm775_vm4, %v2118_v14, %v2086_v5 }
 0x10e   : > { %3034 = vmatmul.msk.bf16.gmra.mxu2 %vm1366_vm5, %v2150_v23  ;;  %v1197_v38 = vpop.permute.xlu2 %1196 }
 0x10f   : > { %v1309_v56 = vsel %vm742_vm3, %v3705_v42, %v1197_v38 }
 0x110   : > { %1284 = vrot.lane.b32.xlu0 %v1249_v6, %s3255_s20 }
 0x112   : > { %v1195_v0 = vpop.permute.xlu0 %1194  ;;  %2023 = vrot.lane.b32.xlu1 %v1992_v2, %s3256_s21 }
 0x113   : > { %v1307_v1 = vsel %vm742_vm3, %v3614_v58, %v1195_v0 }
 0x114   : > { %v1339_v31 = vsel %vm775_vm4, %v1307_v1, %v1275_v50  ;;  %v1412_v43 = vpop.f32.mrf.mxu0  ;;  %v723_v44 = vpop.permute.xlu1 %722  ;;  %2103 = vrot.lane.b32.xlu2 %v2072_v51, %s3255_s20 }
 0x115   : > { %2880 = vmatmul.msk.bf16.gmra.mxu0 %vm1366_vm5, %v1339_v31  ;;  %v789_v34 = vsel %vm775_vm4, %v756_v45, %v723_v44  ;;  %v1542_v16 = vadd.f32 %v1541_v49, %v1412_v43  ;;  %v1543_v19 = vpop.f32.mrf.mxu1 }
 0x116   : > { %2900 = vmatmul.msk.bf16.gmra.mxu1 %vm1366_vm5, %v789_v34  ;;  %v660_v47 = vpop.permute.xlu2 %659 }
 0x117   : > { %v774_v42 = vsel %vm742_vm3, %v3740_v24, %v660_v47 }
 0x118   : > { %v2221_v58 = vpop.f32.mrf.mxu2 }
 0x119   : > { %v2301_v63 = vadd.f32 %v2221_v58, %v1542_v16 }
 0x11a   : > { %v658_v60 = vpop.permute.xlu0 %657 }
 0x11b   : > { %v772_v4 = vsel %vm742_vm3, %v3649_v41, %v658_v60  ;;  %v2434_v10 = vmul.f32 %v2301_v63, %v2301_v63 }
 0x11c   : > { %v805_v50 = vsel %vm775_vm4, %v772_v4, %v739_v12  ;;  %v1414_v55 = vpop.f32.mrf.mxu0  ;;  %v2008_v18 = vpop.permute.xlu1 %2007 }
 0x11d   : > { %2908 = vmatmul.msk.bf16.gmra.mxu3 %vm1366_vm5, %v805_v50  ;;  %v1544_v32 = vadd.f32 %v1543_v19, %v1414_v55  ;;  %v2120_v61 = vsel %vm742_vm3, %v3657_v48, %v2008_v18 }
 0x11e   : > { %v2090_v53 = vpop.permute.xlu2 %2089 }
 0x120   : > { %v2223_v54 = vpop.f32.mrf.mxu2 }
 0x121   : > { %v2302_v8 = vadd.f32 %v2223_v54, %v1544_v32 }
 0x122   : > { %v2088_v41 = vpop.permute.xlu0 %2087 }
 0x123   : > { %v3101_v7 = vpack.c.bf16 %v2302_v8, %v2301_v63  ;;  %v2397_v3 = vadd.f32 %v2302_v8, %v2301_v63  ;;  %v2435_v37 = vmul.f32 %v2302_v8, %v2302_v8  ;;  %v2152_v12 = vsel %vm775_vm4, %v2120_v61, %v2088_v41  ;;  %v4122_v63 = vpop.f32.mrf.mxu3 }
 0x124   : > { %3035 = vmatmul.msk.bf16.gmra.mxu2 %vm1366_vm5, %v2152_v12  ;;  %v644_v17 = vpop.permute.xlu1 %643 }
 0x125   : > { %3102 = vst [vmem:[%s4097_s10] sm:$0xff] %v3101_v7   ;;  %v2466_v48 = vadd.f32 %v2435_v37, %v2434_v10  ;;  %v758_v22 = vsel %vm742_vm3, %v3688_v21, %v644_v17 }
 0x126   : > { %v727_v14 = vpop.permute.xlu2 %726 }
 0x128   : > { %v2226_v5 = vpop.f32.mrf.mxu2 }
 0x129   : > { %v1546_v13 = vpop.f32.mrf.mxu1 }
 0x12a   : > { %v725_v62 = vpop.permute.xlu0 %724 }
 0x12b   : > { %v791_v25 = vsel %vm775_vm4, %v758_v22, %v725_v62  ;;  %v1417_v6 = vpop.f32.mrf.mxu0 }
 0x12c   : > { %2901 = vmatmul.msk.bf16.gmra.mxu1 %vm1366_vm5, %v791_v25  ;;  %v1547_v23 = vadd.f32 %v1546_v13, %v1417_v6  ;;  %v1277_v2 = vpop.permute.xlu1 %1276 }
 0x12d   : > { %v1341_v39 = vsel %vm775_vm4, %v1309_v56, %v1277_v2 }
 0x12e   : > { %v2303_v28 = vadd.f32 %v2226_v5, %v1547_v23  ;;  %2881 = vmatmul.msk.bf16.gmra.mxu0 %vm1366_vm5, %v1341_v39  ;;  %v2018_v31 = vpop.permute.xlu2 %2017 }
 0x12f   : > { %v2130_v6 = vsel %vm742_vm3, %v3823_v59, %v2018_v31 }
 0x130   : > { %v2398_v21 = vadd.f32 %v2397_v3, %v2303_v28  ;;  %v2436_v0 = vmul.f32 %v2303_v28, %v2303_v28  ;;  %v2228_v34 = vpop.f32.mrf.mxu2 }
 0x131   : > { %v1548_v38 = vpop.f32.mrf.mxu1 }
 0x132   : > { %v2010_v1 = vpop.permute.xlu0 %2009  ;;  %v2467_v45 = vadd.f32 %v2466_v48, %v2436_v0  ;;  %v4129_v48 = vpop.f32.mrf.mxu3 }
 0x133   : > { %v2122_v49 = vsel %vm742_vm3, %v3735_v46, %v2010_v1  ;;  %v1419_v51 = vpop.f32.mrf.mxu0 }
 0x134   : > { %v2154_v43 = vsel %vm775_vm4, %v2122_v49, %v2090_v53  ;;  %v1549_v44 = vadd.f32 %v1548_v38, %v1419_v51  ;;  %v741_v58 = vpop.permute.xlu1 %740 }
 0x135   : > { %3036 = vmatmul.msk.bf16.gmra.mxu2 %vm1366_vm5, %v2154_v43  ;;  %v807_v4 = vsel %vm775_vm4, %v774_v42, %v741_v58 }
 0x136   : > { %v2304_v60 = vadd.f32 %v2228_v34, %v1549_v44  ;;  %2909 = vmatmul.msk.bf16.gmra.mxu3 %vm1366_vm5, %v807_v4  ;;  %v648_v18 = vpop.permute.xlu2 %647 }
 0x137   : > { %v762_v42 = vsel %vm742_vm3, %v3858_v35, %v648_v18 }
 0x138   : > { %v3106_v46 = vpack.c.bf16 %v2304_v60, %v2303_v28  ;;  %v2399_v16 = vadd.f32 %v2398_v21, %v2304_v60  ;;  %v2437_v50 = vmul.f32 %v2304_v60, %v2304_v60  ;;  %v2231_v8 = vpop.f32.mrf.mxu2 }
 0x13a   : > { %v646_v55 = vpop.permute.xlu0 %645  ;;  %3178 = vst [vmem:[%s4097_s10 + $0x8] sm:$0xff] %v3106_v46   ;;  %v2468_v24 = vadd.f32 %v2467_v45, %v2437_v50  ;;  %v1551_v61 = vpop.f32.mrf.mxu1 }
 0x13b   : > { %v760_v47 = vsel %vm742_vm3, %v3771_v57, %v646_v55  ;;  %v4137_v0 = vpop.f32.mrf.mxu3 }
 0x13c   : > { %v793_v19 = vsel %vm775_vm4, %v760_v47, %v727_v14  ;;  %v1199_v32 = vpop.permute.xlu1 %1198 }
 0x13d   : > { %2902 = vmatmul.msk.bf16.gmra.mxu1 %vm1366_vm5, %v793_v19  ;;  %v1311_v54 = vsel %vm742_vm3, %v3777_v27, %v1199_v32 }
 0x13e   : > { %v1281_v17 = vpop.permute.xlu2 %1280 }
 0x140   : > { %v2233_v56 = vpop.f32.mrf.mxu2 }
 0x141   : > { %v1422_v53 = vpop.f32.mrf.mxu0 }
 0x142   : > { %v1552_v10 = vadd.f32 %v1551_v61, %v1422_v53  ;;  %v1279_v41 = vpop.permute.xlu0 %1278  ;;  %v1553_v27 = vpop.f32.mrf.mxu1 }
 0x143   : > { %v1343_v7 = vsel %vm775_vm4, %v1311_v54, %v1279_v41  ;;  %v4150_v4 = vpop.f32.mrf.mxu3 }
 0x144   : > { %v2305_v3 = vadd.f32 %v2231_v8, %v1552_v10  ;;  %2882 = vmatmul.msk.bf16.gmra.mxu0 %vm1366_vm5, %v1343_v7  ;;  %v2012_v12 = vpop.permute.xlu1 %2011 }
 0x145   : > { %v2124_v14 = vsel %vm742_vm3, %v3806_v40, %v2012_v12 }
 0x146   : > { %v2400_v57 = vadd.f32 %v2399_v16, %v2305_v3  ;;  %v2438_v37 = vmul.f32 %v2305_v3, %v2305_v3  ;;  %v2094_v45 = vpop.permute.xlu2 %2093 }
 0x148   : > { %v2469_v22 = vadd.f32 %v2468_v24, %v2438_v37 }
 0x149   : > { %v1424_v13 = vpop.f32.mrf.mxu0 }
 0x14a   : > { %v1554_v62 = vadd.f32 %v1553_v27, %v1424_v13  ;;  %v2092_v25 = vpop.permute.xlu0 %2091 }
 0x14b   : > { %v2156_v5 = vsel %vm775_vm4, %v2124_v14, %v2092_v25 }
 0x14c   : > { %v2306_v23 = vadd.f32 %v2233_v56, %v1554_v62  ;;  %3037 = vmatmul.msk.bf16.gmra.mxu2 %vm1366_vm5, %v2156_v5  ;;  %v2098_v21 = vpop.permute.xlu1 %2097 }
 0x14d   : > { %v2162_v40 = vsel %vm775_vm4, %v2130_v6, %v2098_v21 }
 0x14e   : > { %v3111_v2 = vpack.c.bf16 %v2306_v23, %v2305_v3  ;;  %v2401_v28 = vadd.f32 %v2400_v57, %v2306_v23  ;;  %v2439_v39 = vmul.f32 %v2306_v23, %v2306_v23  ;;  %3040 = vmatmul.msk.bf16.vlgmr.msra.gmra.mxu3 %vm1366_vm5, %v2162_v40  ;;  %v1203_v24 = vpop.permute.xlu2 %1202 }
 0x14f   : > { %v4158_v53 = vpop.f32.mrf.mxu3  ;;  %v1315_v13 = vsel %vm742_vm3, %v3941_v20, %v1203_v24 }
 0x150   : > { %3179 = vst [vmem:[%s4097_s10 + $0x10] sm:$0xff] %v3111_v2   ;;  %v2470_v1 = vadd.f32 %v2469_v22, %v2439_v39 }
 0x151   : > { %v2236_v38 = vpop.f32.mrf.mxu2 }
 0x152   : > { %v1201_v49 = vpop.permute.xlu0 %1200  ;;  %v1427_v31 = vpop.f32.mrf.mxu0 }
 0x153   : > { %v1313_v59 = vsel %vm742_vm3, %v3853_v33, %v1201_v49  ;;  %v1556_v51 = vpop.f32.mrf.mxu1 }
 0x154   : > { %v1345_v43 = vsel %vm775_vm4, %v1313_v59, %v1281_v17  ;;  %v1557_v44 = vadd.f32 %v1556_v51, %v1427_v31  ;;  %v729_v34 = vpop.permute.xlu1 %728 }
 0x155   : > { %2883 = vmatmul.msk.bf16.gmra.mxu0 %vm1366_vm5, %v1345_v43  ;;  %v795_v60 = vsel %vm775_vm4, %v762_v42, %v729_v34 }
 0x156   : > { %v2307_v58 = vadd.f32 %v2236_v38, %v1557_v44  ;;  %2903 = vmatmul.msk.bf16.gmra.mxu1 %vm1366_vm5, %v795_v60  ;;  %v2016_v37 = vpop.permute.xlu2 %2015 }
 0x157   : > { %v2128_v20 = vsel %vm742_vm3, %v3976_v52, %v2016_v37 }
 0x158   : > { %v2402_v33 = vadd.f32 %v2401_v28, %v2307_v58  ;;  %v2440_v46 = vmul.f32 %v2307_v58, %v2307_v58 }
 0x159   : > { %v2238_v32 = vpop.f32.mrf.mxu2 }
 0x15a   : > { %v2014_v16 = vpop.permute.xlu0 %2013  ;;  %v2471_v50 = vadd.f32 %v2470_v1, %v2440_v46  ;;  %v1429_v55 = vpop.f32.mrf.mxu0 }
 0x15b   : > { %v2126_v35 = vsel %vm742_vm3, %v3889_v15, %v2014_v16  ;;  %v1558_v47 = vpop.f32.mrf.mxu1 }
 0x15c   : > { %v2158_v19 = vsel %vm775_vm4, %v2126_v35, %v2094_v45  ;;  %v1559_v18 = vadd.f32 %v1558_v47, %v1429_v55  ;;  %v2020_v61 = vpop.permute.xlu1 %2019 }
 0x15d   : > { %3038 = vmatmul.msk.bf16.gmra.mxu2 %vm1366_vm5, %v2158_v19  ;;  %v2132_v8 = vsel %vm742_vm3, %v3895_v36, %v2020_v61  ;;  %v4165_v36 = vpop.f32.mrf.mxu3 }
 0x15e   : > { %v2308_v54 = vadd.f32 %v2238_v32, %v1559_v18  ;;  %v2102_v2 = vpop.permute.xlu2 %2101 }
 0x160   : > { %v3116_v10 = vpack.c.bf16 %v2308_v54, %v2307_v58  ;;  %v2403_v41 = vadd.f32 %v2402_v33, %v2308_v54  ;;  %v2441_v15 = vmul.f32 %v2308_v54, %v2308_v54 }
 0x162   : > { %v2100_v7 = vpop.permute.xlu0 %2099  ;;  %3180 = vst [vmem:[%s4097_s10 + $0x18] sm:$0xff] %v3116_v10   ;;  %v2472_v3 = vadd.f32 %v2471_v50, %v2441_v15 }
 0x163   : > { %v2164_v57 = vsel %vm775_vm4, %v2132_v8, %v2100_v7 }
 0x164   : > { %3041 = vmatmul.msk.bf16.gmra.mxu3 %vm1366_vm5, %v2164_v57  ;;  %v650_v12 = vpop.permute.xlu1 %649 }
 0x165   : > { %v764_v17 = vsel %vm742_vm3, %v3924_v30, %v650_v12  ;;  %v4178_v59 = vpop.f32.mrf.mxu3 }
 0x166   : > { %v733_v34 = vpop.permute.xlu2 %732 }
 0x167   : > { %v2241_v62 = vpop.f32.mrf.mxu2 }
 0x169   : > { %v1561_v22 = vpop.f32.mrf.mxu1 }
 0x16a   : > { %v731_v14 = vpop.permute.xlu0 %730 }
 0x16b   : > { %v797_v27 = vsel %vm775_vm4, %v764_v17, %v731_v14  ;;  %v1432_v25 = vpop.f32.mrf.mxu0 }
 0x16c   : > { %2904 = vmatmul.msk.bf16.gmra.mxu1 %vm1366_vm5, %v797_v27  ;;  %v1562_v56 = vadd.f32 %v1561_v22, %v1432_v25  ;;  %v1283_v5 = vpop.permute.xlu1 %1282 }
 0x16d   : > { %v1347_v23 = vsel %vm775_vm4, %v1315_v13, %v1283_v5  ;;  %v4188_v35 = vpop.f32.mrf.mxu3 }
 0x16e   : > { %v2309_v6 = vadd.f32 %v2241_v62, %v1562_v56  ;;  %2884 = vmatmul.msk.bf16.gmra.mxu0 %vm1366_vm5, %v1347_v23 }
 0x16f   : > { %v2243_v42 = vpop.f32.mrf.mxu2 }
 0x170   : > { %v2404_v30 = vadd.f32 %v2403_v41, %v2309_v6  ;;  %v2442_v28 = vmul.f32 %v2309_v6, %v2309_v6 }
 0x171   : > { %v1563_v1 = vpop.f32.mrf.mxu1 }
 0x172   : > { %v2022_v39 = vpop.permute.xlu0 %2021  ;;  %v2473_v21 = vadd.f32 %v2472_v3, %v2442_v28 }
 0x173   : > { %v2134_v40 = vsel %vm742_vm3, %v3971_v29, %v2022_v39  ;;  %v1434_v45 = vpop.f32.mrf.mxu0 }
 0x174   : > { %v2166_v49 = vsel %vm775_vm4, %v2134_v40, %v2102_v2  ;;  %v1564_v31 = vadd.f32 %v1563_v1, %v1434_v45  ;;  %v2096_v38 = vpop.permute.xlu1 %2095 }
 0x175   : > { %3042 = vmatmul.msk.bf16.gmra.mxu3 %vm1366_vm5, %v2166_v49  ;;  %v2160_v43 = vsel %vm775_vm4, %v2128_v20, %v2096_v38 }
 0x176   : > { %v2310_v51 = vadd.f32 %v2243_v42, %v1564_v31  ;;  %3039 = vmatmul.msk.bf16.gmra.mxu2 %vm1366_vm5, %v2160_v43 }
 0x178   : > { %v3121_v29 = vpack.c.bf16 %v2310_v51, %v2309_v6  ;;  %v2405_v44 = vadd.f32 %v2404_v30, %v2310_v51  ;;  %v2443_v52 = vmul.f32 %v2310_v51, %v2310_v51  ;;  %v2246_v24 = vpop.f32.mrf.mxu2 }
 0x179   : > { %v4196_v15 = vpop.f32.mrf.mxu3 }
 0x17a   : > { %v652_v58 = vpop.permute.xlu0 %651  ;;  %3181 = vst [vmem:[%s4097_s10 + $0x20] sm:$0xff] %v3121_v29   ;;  %v2474_v60 = vadd.f32 %v2473_v21, %v2443_v52  ;;  %v1566_v50 = vpop.f32.mrf.mxu1 }
 0x17b   : > { %v766_v33 = vsel %vm742_vm3, %v4007_v26, %v652_v58  ;;  %v2104_v26 = vpop.permute.xlu2 %2103 }
 0x17c   : > { %v799_v46 = vsel %vm775_vm4, %v766_v33, %v733_v34  ;;  %v1205_v16 = vpop.permute.xlu1 %1204 }
 0x17d   : > { %2905 = vmatmul.msk.bf16.gmra.mxu1 %vm1366_vm5, %v799_v46  ;;  %v1317_v55 = vsel %vm742_vm3, %v4013_v9, %v1205_v16 }
 0x180   : > { %v2248_v12 = vpop.f32.mrf.mxu2 }
 0x181   : > { %v1437_v47 = vpop.f32.mrf.mxu0  ;;  %v1603_v25 = vpop.f32.mrf.mxu3 }
 0x182   : > { %v1567_v19 = vadd.f32 %v1566_v50, %v1437_v47  ;;  %v1285_v18 = vpop.permute.xlu0 %1284  ;;  %v1568_v3 = vpop.f32.mrf.mxu1 }
 0x183   : > { %v1349_v32 = vsel %vm775_vm4, %v1317_v55, %v1285_v18 }
 0x184   : > { %v2311_v61 = vadd.f32 %v2246_v24, %v1567_v19  ;;  %2885 = vmatmul.msk.bf16.gmra.mxu0 %vm1366_vm5, %v1349_v32  ;;  %v2024_v10 = vpop.permute.xlu1 %2023 }
 0x185   : > { %v2136_v41 = vsel %vm742_vm3, %v4039_v11, %v2024_v10 }
 0x186   : > { %v2406_v54 = vadd.f32 %v2405_v44, %v2311_v61  ;;  %v2444_v8 = vmul.f32 %v2311_v61, %v2311_v61  ;;  %v2168_v7 = vsel %vm775_vm4, %v2136_v41, %v2104_v26 }
 0x187   : > { %3043 = vmatmul.msk.bf16.gmra.mxu3 %vm1366_vm5, %v2168_v7 }
 0x188   : > { %v2475_v9 = vadd.f32 %v2474_v60, %v2444_v8 }
 0x189   : > { %v1439_v57 = vpop.f32.mrf.mxu0 }
 0x18a   : > { %v1569_v37 = vadd.f32 %v1568_v3, %v1439_v57 }
 0x18c   : > { %v2312_v17 = vadd.f32 %v2248_v12, %v1569_v37 }
 0x18e   : > { %v3126_v22 = vpack.c.bf16 %v2312_v17, %v2311_v61  ;;  %v2407_v14 = vadd.f32 %v2406_v54, %v2312_v17  ;;  %v2445_v27 = vmul.f32 %v2312_v17, %v2312_v17 }
 0x18f   : > { %v4201_v30 = vpop.f32.mrf.mxu3 }
 0x190   : > { %3182 = vst [vmem:[%s4097_s10 + $0x28] sm:$0xff] %v3126_v22   ;;  %v2476_v13 = vadd.f32 %v2475_v9, %v2445_v27 }
 0x191   : > { %v2251_v11 = vpop.f32.mrf.mxu2 }
 0x192   : > { %v1442_v62 = vpop.f32.mrf.mxu0 }
 0x193   : > { %v1571_v56 = vpop.f32.mrf.mxu1 }
 0x194   : > { %v1572_v5 = vadd.f32 %v1571_v56, %v1442_v62  ;;  %v1604_v56 = vadd.f32 %v1603_v25, %v4129_v48 }
 0x196   : > { %v2313_v6 = vadd.f32 %v2251_v11, %v1572_v5  ;;  %v1602_v11 = vadd.f32 %v4196_v15, %v4122_v63 }
 0x197   : > { %v1608_v38 = vpop.f32.mrf.mxu3 }
 0x198   : > { %v2408_v23 = vadd.f32 %v2407_v14, %v2313_v6  ;;  %v2446_v2 = vmul.f32 %v2313_v6, %v2313_v6 }
 0x199   : > { %v2253_v20 = vpop.f32.mrf.mxu2 }
 0x19a   : > { %v1444_v28 = vpop.f32.mrf.mxu0  ;;  %v2477_v39 = vadd.f32 %v2476_v13, %v2446_v2 }
 0x19b   : > { %v1573_v21 = vpop.f32.mrf.mxu1 }
 0x19c   : > { %v1574_v40 = vadd.f32 %v1573_v21, %v1444_v28 }
 0x19e   : > { %v2314_v1 = vadd.f32 %v2253_v20, %v1574_v40 }
 0x1a0   : > { %v3131_v45 = vpack.c.bf16 %v2314_v1, %v2313_v6  ;;  %v2409_v49 = vadd.f32 %v2408_v23, %v2314_v1  ;;  %v2447_v31 = vmul.f32 %v2314_v1, %v2314_v1  ;;  %v4204_v52 = vpop.f32.mrf.mxu3 }
 0x1a2   : > { %3183 = vst [vmem:[%s4097_s10 + $0x30] sm:$0xff] %v3131_v45   ;;  %v2478_v42 = vadd.f32 %v2477_v39, %v2447_v31  ;;  %v1607_v31 = vadd.f32 %v4201_v30, %v4137_v0 }
 0x1a7   : > { %v2256_v43 = vpop.f32.mrf.mxu2 }
 0x1a8   : > { %v4206_v47 = vpop.f32.mrf.mxu3 }
 0x1a9   : > { %v1576_v51 = vpop.f32.mrf.mxu1 }
 0x1ab   : > { %v1447_v29 = vpop.f32.mrf.mxu0 }
 0x1ac   : > { %v1577_v44 = vadd.f32 %v1576_v51, %v1447_v29 }
 0x1ae   : > { %v2315_v34 = vadd.f32 %v2256_v43, %v1577_v44 }
 0x1af   : > { %v2258_v50 = vpop.f32.mrf.mxu2 }
 0x1b0   : > { %v2410_v58 = vadd.f32 %v2409_v49, %v2315_v34  ;;  %v2448_v60 = vmul.f32 %v2315_v34, %v2315_v34 }
 0x1b1   : > { %v1578_v46 = vpop.f32.mrf.mxu1 }
 0x1b2   : > { %v2479_v33 = vadd.f32 %v2478_v42, %v2448_v60  ;;  %v1609_v42 = vadd.f32 %v1608_v38, %v4150_v4  ;;  %v1612_v38 = vadd.f32 %v4204_v52, %v4158_v53 }
 0x1b3   : > { %v1449_v16 = vpop.f32.mrf.mxu0 }
 0x1b4   : > { %v1579_v55 = vadd.f32 %v1578_v46, %v1449_v16 }
 0x1b6   : > { %v2316_v24 = vadd.f32 %v2258_v50, %v1579_v55  ;;  %v1614_v55 = vadd.f32 %v4206_v47, %v4165_v36 }
 0x1b8   : > { %v3136_v19 = vpack.c.bf16 %v2316_v24, %v2315_v34  ;;  %v4208_v18 = vadd.f32 %v2410_v58, %v2316_v24  ;;  %v2449_v32 = vmul.f32 %v2316_v24, %v2316_v24  ;;  %v2261_v54 = vpop.f32.mrf.mxu2 }
 0x1b9   : > { %v4213_v8 = vpop.f32.mrf.mxu3 }
 0x1ba   : > { %3184 = vst [vmem:[%s4097_s10 + $0x38] sm:$0xff] %v3136_v19   ;;  %v4211_v61 = vadd.f32 %v2479_v33, %v2449_v32  ;;  %v1581_v26 = vpop.f32.mrf.mxu1 }
 0x1c0   : > { %v2263_v57 = vpop.f32.mrf.mxu2 }
 0x1c1   : > { %v1452_v10 = vpop.f32.mrf.mxu0  ;;  %v4215_v37 = vpop.f32.mrf.mxu3 }
 0x1c2   : > { %v1582_v41 = vadd.f32 %v1581_v26, %v1452_v10  ;;  %v1583_v9 = vpop.f32.mrf.mxu1 }
 0x1c4   : > { %v2317_v12 = vadd.f32 %v2261_v54, %v1582_v41 }
 0x1c6   : > { %v2450_v4 = vmul.f32 %v2317_v12, %v2317_v12  ;;  %v2412_v19 = vadd.f32 %v4208_v18, %v2317_v12 }
 0x1c9   : > { %v1454_v7 = vpop.f32.mrf.mxu0 }
 0x1ca   : > { %v1584_v3 = vadd.f32 %v1583_v9, %v1454_v7  ;;  %v2481_v7 = vadd.f32 %v4211_v61, %v2450_v4 }
 0x1cc   : > { %v2318_v17 = vadd.f32 %v2263_v57, %v1584_v3 }
 0x1ce   : > { %v3141_v22 = vpack.c.bf16 %v2318_v17, %v2317_v12  ;;  %v2451_v32 = vmul.f32 %v2318_v17, %v2318_v17  ;;  %v2413_v3 = vadd.f32 %v2412_v19, %v2318_v17 }
 0x1cf   : > { %v2266_v13 = vpop.f32.mrf.mxu2 }
 0x1d0   : > { %3185 = vst [vmem:[%s4097_s10 + $0x40] sm:$0xff] %v3141_v22   ;;  %v2482_v53 = vadd.f32 %v2481_v7, %v2451_v32 }
 0x1d1   : > { %v2281_v27 = vpop.f32.mrf.mxu3 }
 0x1d2   : > { %v1457_v14 = vpop.f32.mrf.mxu0  ;;  %v4221_v23 = vadd.f32 %v2281_v27, %v1602_v11 }
 0x1d3   : > { %v1586_v62 = vpop.f32.mrf.mxu1 }
 0x1d4   : > { %v1587_v2 = vadd.f32 %v1586_v62, %v1457_v14 }
 0x1d6   : > { %v2319_v1 = vadd.f32 %v2266_v13, %v1587_v2 }
 0x1d7   : > { %v2268_v20 = vpop.f32.mrf.mxu2 }
 0x1d8   : > { %v2452_v57 = vmul.f32 %v2319_v1, %v2319_v1  ;;  %v2414_v52 = vadd.f32 %v2413_v3, %v2319_v1 }
 0x1d9   : > { %v2283_v5 = vpop.f32.mrf.mxu3 }
 0x1da   : > { %v1459_v6 = vpop.f32.mrf.mxu0  ;;  %v4223_v28 = vadd.f32 %v2283_v5, %v1604_v56  ;;  %v2483_v36 = vadd.f32 %v2482_v53, %v2452_v57 }
 0x1db   : > { %v1588_v39 = vpop.f32.mrf.mxu1 }
 0x1dc   : > { %v3161_v21 = vpack.c.bf16 %v4223_v28, %v4221_v23  ;;  %v1589_v40 = vadd.f32 %v1588_v39, %v1459_v6 }
 0x1de   : > { %3189 = vst [vmem:[%s4097_s10 + $0x60] sm:$0xff] %v3161_v21   ;;  %v2320_v45 = vadd.f32 %v2268_v20, %v1589_v40 }
 0x1e0   : > { %v3146_v63 = vpack.c.bf16 %v2320_v45, %v2319_v1  ;;  %v2271_v25 = vpop.f32.mrf.mxu2  ;;  %v2453_v27 = vmul.f32 %v2320_v45, %v2320_v45  ;;  %v2415_v47 = vadd.f32 %v2414_v52, %v2320_v45 }
 0x1e2   : > { %3186 = vst [vmem:[%s4097_s10 + $0x48] sm:$0xff] %v3146_v63   ;;  %v2484_v12 = vadd.f32 %v2483_v36, %v2453_v27 }
 0x1e7   : > { %v2286_v48 = vpop.f32.mrf.mxu3 }
 0x1e8   : > { %v4232_v43 = vadd.f32 %v2286_v48, %v1607_v31  ;;  %v2273_v46 = vpop.f32.mrf.mxu2 }
 0x1e9   : > { %v1591_v15 = vpop.f32.mrf.mxu1 }
 0x1eb   : > { %v1462_v49 = vpop.f32.mrf.mxu0 }
 0x1ec   : > { %v1592_v34 = vadd.f32 %v1591_v15, %v1462_v49 }
 0x1ee   : > { %v2321_v16 = vadd.f32 %v2271_v25, %v1592_v34  ;;  %v2458_v25 = vmul.f32 %v4221_v23, %v4221_v23  ;;  %v1617_v34 = vadd.f32 %v4213_v8, %v4178_v59 }
 0x1ef   : > { %v2288_v51 = vpop.f32.mrf.mxu3 }
 0x1f0   : > { %v4234_v29 = vadd.f32 %v2288_v51, %v1609_v42  ;;  %v2454_v13 = vmul.f32 %v2321_v16, %v2321_v16  ;;  %v2416_v62 = vadd.f32 %v2415_v47, %v2321_v16  ;;  %v2459_v42 = vmul.f32 %v4223_v28, %v4223_v28 }
 0x1f1   : > { %v1593_v58 = vpop.f32.mrf.mxu1 }
 0x1f2   : > { %v3166_v44 = vpack.c.bf16 %v4234_v29, %v4232_v43  ;;  %v2485_v6 = vadd.f32 %v2484_v12, %v2454_v13 }
 0x1f3   : > { %v1464_v60 = vpop.f32.mrf.mxu0 }
 0x1f4   : > { %3190 = vst [vmem:[%s4097_s10 + $0x68] sm:$0xff] %v3166_v44   ;;  %v1594_v33 = vadd.f32 %v1593_v58, %v1464_v60  ;;  %v1619_v58 = vadd.f32 %v4215_v37, %v4188_v35  ;;  %v2460_v60 = vmul.f32 %v4232_v43, %v4232_v43 }
 0x1f6   : > { %v2322_v50 = vadd.f32 %v2273_v46, %v1594_v33 }
 0x1f8   : > { %v2291_v0 = vpop.f32.mrf.mxu3  ;;  %v3151_v30 = vpack.c.bf16 %v2322_v50, %v2321_v16  ;;  %v2455_v11 = vmul.f32 %v2322_v50, %v2322_v50  ;;  %v2417_v61 = vadd.f32 %v2416_v62, %v2322_v50 }
 0x1f9   : > { %v2329_v54 = vadd.f32 %v2291_v0, %v1612_v38  ;;  %v2276_v10 = vpop.f32.mrf.mxu2 }
 0x1fa   : > { %3187 = vst [vmem:[%s4097_s10 + $0x50] sm:$0xff] %v3151_v30   ;;  %v1596_v24 = vpop.f32.mrf.mxu1  ;;  %v2486_v21 = vadd.f32 %v2485_v6, %v2455_v11 }
 0x1fb   : > { %v2462_v59 = vmul.f32 %v2329_v54, %v2329_v54 }
 0x200   : > { %v2293_v26 = vpop.f32.mrf.mxu3 }
 0x201   : > { %v2330_v41 = vadd.f32 %v2293_v26, %v1614_v55  ;;  %v1467_v9 = vpop.f32.mrf.mxu0  ;;  %v2278_v39 = vpop.f32.mrf.mxu2 }
 0x202   : > { %v1597_v22 = vadd.f32 %v1596_v24, %v1467_v9  ;;  %v1598_v56 = vpop.f32.mrf.mxu1 }
 0x203   : > { %v3171_v14 = vpack.c.bf16 %v2330_v41, %v2329_v54  ;;  %v2463_v35 = vmul.f32 %v2330_v41, %v2330_v41 }
 0x204   : > { %v2323_v18 = vadd.f32 %v2276_v10, %v1597_v22 }
 0x205   : > { %3191 = vst [vmem:[%s4097_s10 + $0x70] sm:$0xff] %v3171_v14  }
 0x206   : > { %v2456_v17 = vmul.f32 %v2323_v18, %v2323_v18  ;;  %v2418_v40 = vadd.f32 %v2417_v61, %v2323_v18 }
 0x208   : > { %v2487_v63 = vadd.f32 %v2486_v21, %v2456_v17 }
 0x209   : > { %v1469_v5 = vpop.f32.mrf.mxu0 }
 0x20a   : > { %v1599_v2 = vadd.f32 %v1598_v56, %v1469_v5  ;;  %v2296_v1 = vpop.f32.mrf.mxu3 }
 0x20b   : > { %v2331_v16 = vadd.f32 %v2296_v1, %v1617_v34 }
 0x20c   : > { %v2324_v20 = vadd.f32 %v2278_v39, %v1599_v2 }
 0x20e   : > { %v3156_v48 = vpack.c.bf16 %v2324_v20, %v2323_v18  ;;  %v2419_v45 = vadd.f32 %v2418_v40, %v2324_v20  ;;  %v2457_v15 = vmul.f32 %v2324_v20, %v2324_v20 }
 0x210   : > { %3188 = vst [vmem:[%s4097_s10 + $0x58] sm:$0xff] %v3156_v48   ;;  %v2420_v49 = vadd.f32 %v2419_v45, %v4221_v23  ;;  %v2488_v31 = vadd.f32 %v2487_v63, %v2457_v15 }
 0x212   : > { %v2421_v51 = vadd.f32 %v2420_v49, %v4223_v28  ;;  %v2489_v44 = vadd.f32 %v2488_v31, %v2458_v25  ;;  %v2298_v46 = vpop.f32.mrf.mxu3  ;;  %v2461_v28 = vmul.f32 %v4234_v29, %v4234_v29 }
 0x213   : > { %v2332_v50 = vadd.f32 %v2298_v46, %v1619_v58 }
 0x214   : > { %v2490_v33 = vadd.f32 %v2489_v44, %v2459_v42  ;;  %v2422_v23 = vadd.f32 %v2421_v51, %v4232_v43  ;;  %v2464_v43 = vmul.f32 %v2331_v16, %v2331_v16 }
 0x215   : > { %v3176_v4 = vpack.c.bf16 %v2332_v50, %v2331_v16  ;;  %v2465_v10 = vmul.f32 %v2332_v50, %v2332_v50 }
 0x216   : > { %v2423_v0 = vadd.f32 %v2422_v23, %v4234_v29  ;;  %v2491_v30 = vadd.f32 %v2490_v33, %v2460_v60 }
 0x217   : > { %3192 = vst [vmem:[%s4097_s10 + $0x78] sm:$0xff] %v3176_v4  }
 0x218   : > { %v2424_v8 = vadd.f32 %v2423_v0, %v2329_v54  ;;  %v2492_v38 = vadd.f32 %v2491_v30, %v2461_v28 }
 0x21a   : > { %v2425_v37 = vadd.f32 %v2424_v8, %v2330_v41  ;;  %v2493_v55 = vadd.f32 %v2492_v38, %v2462_v59 }
 0x21c   : > { %v2426_v24 = vadd.f32 %v2425_v37, %v2331_v16  ;;  %v2494_v19 = vadd.f32 %v2493_v55, %v2463_v35 }
 0x21e   : > { %v2495_v32 = vadd.f32 %v2494_v19, %v2464_v43  ;;  %v2427_v26 = vadd.f32 %v2426_v24, %v2332_v50 }
 0x220   : > { %v2428_v9 = vrot.slane %v2427_v26, 4  ;;  %v2496_v7 = vadd.f32 %v2495_v32, %v2465_v10 }
 0x222   : > { %v2429_v3 = vadd.f32 %v2428_v9, %v2427_v26  ;;  %v2497_v29 = vrot.slane %v2496_v7, 4 }
 0x224   : > { %v2430_v57 = vrot.slane %v2429_v3, 2  ;;  %v2498_v22 = vadd.f32 %v2497_v29, %v2496_v7 }
 0x226   : > { %v2431_v14 = vadd.f32 %v2430_v57, %v2429_v3  ;;  %v2499_v54 = vrot.slane %v2498_v22, 2 }
 0x228   : > { %v2432_v53 = vrot.slane %v2431_v14, 1  ;;  %v2500_v52 = vadd.f32 %v2499_v54, %v2498_v22 }
 0x22a   : > { %v2501_v41 = vrot.slane %v2500_v52, 1  ;;  %v2433_v27 = vadd.f32 %v2432_v53, %v2431_v14 }
 0x22c   : > { %v2502_v36 = vadd.f32 %v2501_v41, %v2500_v52 }
 0x22e   : > { %v2504_v47 = vsel %vm2503_vm6, %v2433_v27, %v2502_v36 }
 0x22f   : > { %2505 = vst [vmem:[%s254_s18] sm:$0x3] %v2504_v47 }
 0x230 PF: > { %s14_s14 = sadd.s32 1, %s3253_s14   ;;  %s4282_s12 = smov %s3249_s13 }
 0x231   : > { %p11_p5 = scmp.ge.s32.totalorder %s14_s14, 4   ;;  %s4283_s13 = smov %s4285_s15 }
 0x233   :  { %13 = sbr.rel (!%p11_p5) target bundleno = 2 (0x2), region = 78 }

// kernel: decoder_block_forward.6
= control target key start
LH: loop header
LB: loop body
LE: loop exit
PB: predicated region body
PF: predicated region fallthrough
CT: control target
= control target key end

     0   :  { %s4434_s12 = smov 0   ;;  %s4436_s13 = smov 0   ;;  %s5255_s0 = inlined_call_operand.vmem [shape: bf16[2,18,18,128], index: 0, kind: input, shape index: {}]   ;;  %s5256_s1 = inlined_call_operand.vmem [shape: bf16[3,384,128], index: 1, kind: input, shape index: {}]   ;;  %s5257_s2 = inlined_call_operand.vmem [shape: bf16[2,16,16,128], index: 2, kind: output, shape index: {0}]   ;;  %s5258_s3 = inlined_call_operand.vmem [shape: f32[2,1,2,128], index: 3, kind: output, shape index: {1}]  }
   0x1   :  { %s4438_s14 = smov 0  }
   0x2 LB: > { %s33_s15 = sadd.s32 1, %s4408_s13  ;;  %p3426_p0 = scmp.ge.s32.totalorder %s4412_s14, 1  ;;  %s4412_s14 = sphi %s4438_s14, %s14_s14   ;;  %s4408_s13 = sphi %s4436_s13, %s5293_s13   ;;  %s4404_s12 = sphi %s4434_s12, %s5292_s12  }
   0x3   : > { %p35_p1 = scmp.ge.s32.totalorder %s33_s15, 2  ;;  %p176_p2 = scmp.lt.s32.totalorder %s4412_s14, 3 }
   0x5   : > { %s5295_s15 = smov (%p35_p1, %s33_s15), 0  ;;  %p177_p3 = pnand %p3426_p0, %p176_p2 }
   0x7   : > { %180 = sbr.rel (%p177_p3) target bundleno = 769 (0x301), region = 28 }
   0xc   : > { %v4169_v0 = vld [vmem:[%s5256_s1 + $0xf8] sm:$0xff]  ;;  %v4168_v1 = vld [vmem:[%s5256_s1 + $0xf0] sm:$0xff]  ;;  %v4167_v2 = vld [vmem:[%s5256_s1 + $0xe8] sm:$0xff]  ;;  %p222_p4 = scmp.lt.s32.totalorder %s4404_s12, 1  ;;  %vm451_vm0 = vsmask.f32 7424 }
   0xd   : > { %1434 = vmatpush.bf16.msra.mxu0 %v4169_v0  ;;  %4321 = vmatpush.bf16.msra.mxu1 %v4169_v0  ;;  %v4166_v3 = vld [vmem:[%s5256_s1 + $0xe0] sm:$0xff]  ;;  %v4165_v4 = vld [vmem:[%s5256_s1 + $0xd8] sm:$0xff]  ;;  %v4164_v5 = vld [vmem:[%s5256_s1 + $0xd0] sm:$0xff]  ;;  %vm660_vm1 = vcmask 1046528   ;;  %vm3242_vm2 = vcmask 1040384  }
   0xe   : > { %4322 = vmatpush.bf16.msra.mxu2 %v4169_v0  ;;  %4323 = vmatpush.bf16.msra.mxu3 %v4169_v0  ;;  %s5297_s12 = smov (!%p222_p4, %s4404_s12), 1  ;;  %v4163_v6 = vld [vmem:[%s5256_s1 + $0xc8] sm:$0xff]  ;;  %v4162_v7 = vld [vmem:[%s5256_s1 + $0xc0] sm:$0xff]  ;;  %v4185_v8 = vld [vmem:[%s5256_s1 + $0x178] sm:$0xff] }
   0xf   : > { %s4345_s30 = smul.u32 216, %s5297_s12  ;;  %v4129_v9 = vld [vmem:[%s5256_s1 + $0x38] sm:$0xff]  ;;  %v4184_v16 = vld [vmem:[%s5256_s1 + $0x170] sm:$0xff]  ;;  %v4183_v20 = vld [vmem:[%s5256_s1 + $0x168] sm:$0xff]  ;;  %s4105_s4 = sshll.u32 %s5297_s12, 7 }
  0x10   : > { %v4177_v14 = vld [vmem:[%s5256_s1 + $0x138] sm:$0xff]  ;;  %v4128_v17 = vld [vmem:[%s5256_s1 + $0x30] sm:$0xff]  ;;  %v4127_v21 = vld [vmem:[%s5256_s1 + $0x28] sm:$0xff]  ;;  %s5154_s7 = scalar_lea.vmem %s5257_s2, %s4105_s4 }
  0x11   : > { %1435 = vmatpush.bf16.msra.mxu0 %v4168_v1  ;;  %4324 = vmatpush.bf16.msra.mxu1 %v4168_v1  ;;  %s4486_s8 = scalar_lea.vmem %s5255_s0, %s4345_s30  ;;  %v4137_v15 = vld [vmem:[%s5256_s1 + $0x78] sm:$0xff]  ;;  %v4176_v18 = vld [vmem:[%s5256_s1 + $0x130] sm:$0xff]  ;;  %v4175_v22 = vld [vmem:[%s5256_s1 + $0x128] sm:$0xff] }
  0x12   : > { %4325 = vmatpush.bf16.msra.mxu2 %v4168_v1  ;;  %4326 = vmatpush.bf16.msra.mxu3 %v4168_v1  ;;  %v4495_v10 = vld [vmem:[%s4486_s8 + $0xc] sm:$0xff]  ;;  %v4498_v11 = vld [vmem:[%s4486_s8 + $0x3c] sm:$0xff]  ;;  %v4611_v48 = vld [vmem:[%s4486_s8 + $0x24] sm:$0xff] }
  0x13   : > { %v4501_v12 = vld [vmem:[%s4486_s8 + $0x6c] sm:$0xff]  ;;  %v4158_v13 = vld [vmem:[%s4486_s8 + $0x9c] sm:$0xff]  ;;  %v4614_v49 = vld [vmem:[%s4486_s8 + $0x54] sm:$0xff]  ;;  %v972_v1 = vshll.u32 %v4495_v10, 16 }
  0x14   : > { %v4136_v19 = vld [vmem:[%s5256_s1 + $0x70] sm:$0xff]  ;;  %v4135_v23 = vld [vmem:[%s5256_s1 + $0x68] sm:$0xff]  ;;  %v4182_v24 = vld [vmem:[%s5256_s1 + $0x160] sm:$0xff] }
  0x15   : > { %1436 = vmatpush.bf16.msra.mxu0 %v4167_v2  ;;  %4327 = vmatpush.bf16.msra.mxu1 %v4167_v2  ;;  %v4126_v25 = vld [vmem:[%s5256_s1 + $0x20] sm:$0xff]  ;;  %v4181_v28 = vld [vmem:[%s5256_s1 + $0x158] sm:$0xff]  ;;  %v4559_v31 = vld [vmem:[%s4486_s8 + $0x48] sm:$0xff] }
  0x16   : > { %4328 = vmatpush.bf16.msra.mxu2 %v4167_v2  ;;  %4329 = vmatpush.bf16.msra.mxu3 %v4167_v2  ;;  %v4174_v26 = vld [vmem:[%s5256_s1 + $0x120] sm:$0xff]  ;;  %v4125_v29 = vld [vmem:[%s5256_s1 + $0x18] sm:$0xff]  ;;  %v4159_v33 = vld [vmem:[%s4486_s8 + $0xa8] sm:$0xff] }
  0x17   : > { %v4134_v27 = vld [vmem:[%s5256_s1 + $0x60] sm:$0xff]  ;;  %v4556_v30 = vld [vmem:[%s4486_s8 + $0x18] sm:$0xff]  ;;  %v4180_v36 = vld [vmem:[%s5256_s1 + $0x150] sm:$0xff] }
  0x18   : > { %v4562_v32 = vld [vmem:[%s4486_s8 + $0x78] sm:$0xff]  ;;  %v4124_v37 = vld [vmem:[%s5256_s1 + $0x10] sm:$0xff]  ;;  %v4179_v40 = vld [vmem:[%s5256_s1 + $0x148] sm:$0xff] }
  0x19   : > { %1437 = vmatpush.bf16.msra.mxu0 %v4166_v3  ;;  %4330 = vmatpush.bf16.msra.mxu1 %v4166_v3  ;;  %v4173_v34 = vld [vmem:[%s5256_s1 + $0x118] sm:$0xff]  ;;  %v4172_v38 = vld [vmem:[%s5256_s1 + $0x110] sm:$0xff]  ;;  %v4123_v41 = vld [vmem:[%s5256_s1 + $0x8] sm:$0xff] }
  0x1a   : > { %4331 = vmatpush.bf16.msra.mxu2 %v4166_v3  ;;  %4332 = vmatpush.bf16.msra.mxu3 %v4166_v3  ;;  %v4133_v35 = vld [vmem:[%s5256_s1 + $0x58] sm:$0xff]  ;;  %v4132_v39 = vld [vmem:[%s5256_s1 + $0x50] sm:$0xff]  ;;  %v4171_v42 = vld [vmem:[%s5256_s1 + $0x108] sm:$0xff] }
  0x1b   : > { %v4131_v43 = vld [vmem:[%s5256_s1 + $0x48] sm:$0xff]  ;;  %v4178_v44 = vld [vmem:[%s5256_s1 + $0x140] sm:$0xff]  ;;  %v4160_v51 = vld [vmem:[%s4486_s8 + $0xb4] sm:$0xff] }
  0x1c   : > { %v4122_v45 = vld [vmem:[%s5256_s1] sm:$0xff]  ;;  %v4209_v52 = vld [vmem:[%s5256_s1 + $0x1b8] sm:$0xff]  ;;  %v3497_v56 = vld [vmem:[%s4486_s8 + $0x14] sm:$0x1] }
  0x1d   : > { %1438 = vmatpush.bf16.msra.mxu0 %v4165_v4  ;;  %4333 = vmatpush.bf16.msra.mxu1 %v4165_v4  ;;  %v4170_v46 = vld [vmem:[%s5256_s1 + $0x100] sm:$0xff]  ;;  %v4217_v53 = vld [vmem:[%s5256_s1 + $0x1f8] sm:$0xff]  ;;  %v261_v57 = vld [vmem:[%s4486_s8 + $0x8] sm:$0x1]  ;;  %v937_v62 = vunpack.c.l.b16 %v3497_v56 }
  0x1e   : > { %4334 = vmatpush.bf16.msra.mxu2 %v4165_v4  ;;  %4335 = vmatpush.bf16.msra.mxu3 %v4165_v4  ;;  %v4130_v47 = vld [vmem:[%s5256_s1 + $0x40] sm:$0xff]  ;;  %v4145_v54 = vld [vmem:[%s5256_s1 + $0xb8] sm:$0xff]  ;;  %v4638_v58 = vld [vmem:[%s4486_s8 + $0x30] sm:$0xff]  ;;  %v419_v0 = vunpack.c.l.b16 %v261_v57 }
  0x1f   : > { %v4617_v50 = vld [vmem:[%s4486_s8 + $0x84] sm:$0xff]  ;;  %v4225_v55 = vld [vmem:[%s5256_s1 + $0x238] sm:$0xff]  ;;  %v4644_v60 = vld [vmem:[%s4486_s8 + $0x90] sm:$0xff]  ;;  %v953_v2 = vpack.c.b16 %v937_v62, %v937_v62 }
  0x20   : > { %v4641_v59 = vld [vmem:[%s4486_s8 + $0x60] sm:$0xff]  ;;  %v4652_v3 = vpack.c.b16 %v419_v0, %v419_v0  ;;  %v996_v0 = vshll.u32 %v4611_v48, 16 }
  0x21   : > { %1439 = vmatpush.bf16.msra.mxu0 %v4164_v5  ;;  %4336 = vmatpush.bf16.msra.mxu1 %v4164_v5  ;;  %v4161_v61 = vld [vmem:[%s4486_s8 + $0xc0] sm:$0xff] }
  0x22   : > { %4337 = vmatpush.bf16.msra.mxu2 %v4164_v5  ;;  %4338 = vmatpush.bf16.msra.mxu3 %v4164_v5  ;;  %v4106_v63 = vld [vmem:[%s4486_s8] sm:$0xff]  ;;  %v970_v5 = vshrl.u32 %v4495_v10, 16 }
  0x23   : > { %v455_v4 = vshll.u32 %v4106_v63, 16 }
  0x25   : > { %1440 = vmatpush.bf16.msra.mxu0 %v4163_v6  ;;  %4339 = vmatpush.bf16.msra.mxu1 %v4163_v6 }
  0x26   : > { %4340 = vmatpush.bf16.msra.mxu2 %v4163_v6  ;;  %4341 = vmatpush.bf16.msra.mxu3 %v4163_v6  ;;  %v974_v6 = vrot.slane %v972_v1, 1 }
  0x29   : > { %1441 = vmatpush.bf16.msra.mxu0 %v4162_v7  ;;  %4342 = vmatpush.bf16.msra.mxu1 %v4162_v7 }
  0x2a   : > { %4343 = vmatpush.bf16.msra.mxu2 %v4162_v7  ;;  %4344 = vmatpush.bf16.msra.mxu3 %v4162_v7  ;;  %v977_v7 = vshll.u32 %v953_v2, 16 }
  0x2c   : > { %1442 = vmatmul.bf16.vlgmr.msra.gmra.mxu0 %v4495_v10  ;;  %1462 = vmatmul.bf16.vlgmr.msra.gmra.mxu1 %v4498_v11 }
  0x2d   : > { %1482 = vmatmul.bf16.vlgmr.msra.gmra.mxu2 %v4501_v12  ;;  %1502 = vmatmul.bf16.vlgmr.msra.gmra.mxu3 %v4158_v13  ;;  %v460_v13 = vshll.u32 %v4652_v3, 16 }
  0x2e   : > { %1612 = vmatpush.bf16.msrb.mxu2 %v4185_v8  ;;  %1845 = vmatpush.bf16.msrb.mxu3 %v4129_v9  ;;  %v453_v8 = vshrl.u32 %v4106_v63, 16  ;;  %v457_v9 = vrot.slane %v455_v4, 1  ;;  %v994_v4 = vshrl.u32 %v4611_v48, 16 }
  0x2f   : > { %1523 = vmatpush.bf16.msrb.mxu1 %v4177_v14  ;;  %1934 = vmatpush.bf16.msrb.mxu0 %v4137_v15  ;;  %v975_v14 = vor.u32 %v974_v6, %v970_v5  ;;  %v979_v15 = vrot.slane %v977_v7, 1  ;;  %v998_v5 = vrot.slane %v996_v0, 1 }
  0x32   : > { %1613 = vmatpush.bf16.msrb.mxu2 %v4184_v16  ;;  %1846 = vmatpush.bf16.msrb.mxu3 %v4128_v17  ;;  %v458_v16 = vor.u32 %v457_v9, %v453_v8  ;;  %v462_v17 = vrot.slane %v460_v13, 1  ;;  %v999_v13 = vor.u32 %v998_v5, %v994_v4 }
  0x33   : > { %1524 = vmatpush.bf16.msrb.mxu1 %v4176_v18  ;;  %1935 = vmatpush.bf16.msrb.mxu0 %v4136_v19  ;;  %v1177_v18 = vrot.slane %v4495_v10, 1  ;;  %v1178_v19 = vrot.slane %v953_v2, 1 }
  0x36   : > { %1614 = vmatpush.bf16.msrb.mxu2 %v4183_v20  ;;  %1847 = vmatpush.bf16.msrb.mxu3 %v4127_v21  ;;  %v3500_v20 = vld [vmem:[%s4486_s8 + $0x20] sm:$0x1]  ;;  %v264_v21 = vld [vmem:[%s4486_s8 + $0x14] sm:$0x1] }
  0x37   : > { %1525 = vmatpush.bf16.msrb.mxu1 %v4175_v22  ;;  %1936 = vmatpush.bf16.msrb.mxu0 %v4135_v23  ;;  %v980_v22 = vsel %vm451_vm0, %v975_v14, %v979_v15  ;;  %v463_v23 = vsel %vm451_vm0, %v458_v16, %v462_v17  ;;  %v1183_v17 = vrot.slane %v4611_v48, 1 }
  0x3a   : > { %1615 = vmatpush.bf16.msrb.mxu2 %v4182_v24  ;;  %1848 = vmatpush.bf16.msrb.mxu3 %v4126_v25  ;;  %v938_v24 = vunpack.c.l.b16 %v3500_v20  ;;  %v4107_v25 = vld [vmem:[%s4486_s8 + $0xc] sm:$0xff] }
  0x3b   : > { %1526 = vmatpush.bf16.msrb.mxu1 %v4174_v26  ;;  %1937 = vmatpush.bf16.msrb.mxu0 %v4134_v27  ;;  %v420_v26 = vunpack.c.l.b16 %v264_v21  ;;  %v1179_v27 = vsel %vm660_vm1, %v1177_v18, %v1178_v19  ;;  %v3506_v19 = vld [vmem:[%s4486_s8 + $0x38] sm:$0x1]  ;;  %v270_v20 = vld [vmem:[%s4486_s8 + $0x2c] sm:$0x1] }
  0x3c   : > { %1447 = vmatmul.bf16.gmra.mxu0 %v4556_v30  ;;  %1467 = vmatmul.bf16.gmra.mxu1 %v4559_v31  ;;  %v954_v10 = vpack.c.b16 %v938_v24, %v938_v24  ;;  %v4109_v24 = vld [vmem:[%s4486_s8 + $0x24] sm:$0xff] }
  0x3d   : > { %1487 = vmatmul.bf16.gmra.mxu2 %v4562_v32  ;;  %1507 = vmatmul.bf16.gmra.mxu3 %v4159_v33  ;;  %v467_v33 = vshll.u32 %v4107_v25, 16 }
  0x3e   : > { %1616 = vmatpush.bf16.msrb.mxu2 %v4181_v28  ;;  %1849 = vmatpush.bf16.msrb.mxu3 %v4125_v29  ;;  %v984_v28 = vshll.u32 %v4556_v30, 16  ;;  %v4664_v29 = vpack.c.b16 %v420_v26, %v420_v26 }
  0x3f   : > { %1527 = vmatpush.bf16.msrb.mxu1 %v4173_v34  ;;  %1938 = vmatpush.bf16.msrb.mxu0 %v4133_v35  ;;  %v4208_v34 = vld [vmem:[%s5256_s1 + $0x1b0] sm:$0xff] }
  0x40   : > { %v4216_v35 = vld [vmem:[%s5256_s1 + $0x1f0] sm:$0xff] }
  0x42   : > { %1617 = vmatpush.bf16.msrb.mxu2 %v4180_v36  ;;  %1850 = vmatpush.bf16.msrb.mxu3 %v4124_v37  ;;  %v4144_v36 = vld [vmem:[%s5256_s1 + $0xb0] sm:$0xff] }
  0x43   : > { %1528 = vmatpush.bf16.msrb.mxu1 %v4172_v38  ;;  %1939 = vmatpush.bf16.msrb.mxu0 %v4132_v39  ;;  %v4224_v37 = vld [vmem:[%s5256_s1 + $0x230] sm:$0xff]  ;;  %v982_v38 = vshrl.u32 %v4556_v30, 16  ;;  %v986_v39 = vrot.slane %v984_v28, 1 }
  0x46   : > { %1618 = vmatpush.bf16.msrb.mxu2 %v4179_v40  ;;  %1851 = vmatpush.bf16.msrb.mxu3 %v4123_v41  ;;  %v989_v40 = vshll.u32 %v954_v10, 16  ;;  %v465_v41 = vshrl.u32 %v4107_v25, 16 }
  0x47   : > { %1529 = vmatpush.bf16.msrb.mxu1 %v4171_v42  ;;  %1940 = vmatpush.bf16.msrb.mxu0 %v4131_v43  ;;  %v469_v42 = vrot.slane %v467_v33, 1  ;;  %v472_v43 = vshll.u32 %v4664_v29, 16  ;;  %v4207_v33 = vld [vmem:[%s5256_s1 + $0x1a8] sm:$0xff] }
  0x4a   : > { %1619 = vmatpush.bf16.msrb.mxu2 %v4178_v44  ;;  %1852 = vmatpush.bf16.msrb.mxu3 %v4122_v45  ;;  %v987_v44 = vor.u32 %v986_v39, %v982_v38  ;;  %v991_v45 = vrot.slane %v989_v40, 1  ;;  %v489_v38 = vshrl.u32 %v4109_v24, 16 }
  0x4b   : > { %1530 = vmatpush.bf16.msrb.mxu1 %v4170_v46  ;;  %1941 = vmatpush.bf16.msrb.mxu0 %v4130_v47  ;;  %v470_v46 = vor.u32 %v469_v42, %v465_v41  ;;  %v474_v47 = vrot.slane %v472_v43, 1  ;;  %v4143_v41 = vld [vmem:[%s5256_s1 + $0xa8] sm:$0xff] }
  0x4c   : > { %1452 = vmatmul.bf16.gmra.mxu0 %v4611_v48  ;;  %1472 = vmatmul.bf16.gmra.mxu1 %v4614_v49  ;;  %v4223_v42 = vld [vmem:[%s5256_s1 + $0x228] sm:$0xff] }
  0x4d   : > { %1492 = vmatmul.bf16.gmra.mxu2 %v4617_v50  ;;  %1512 = vmatmul.bf16.gmra.mxu3 %v4160_v51  ;;  %v1180_v51 = vrot.slane %v4556_v30, 1  ;;  %v475_v56 = vsel %vm451_vm0, %v470_v46, %v474_v47  ;;  %v1186_v47 = vrot.slane %v4638_v58, 1 }
  0x4e   : > { %2773 = vmatpush.bf16.msra.mxu2 %v4209_v52  ;;  %2862 = vmatpush.bf16.msra.mxu3 %v4217_v53  ;;  %v1181_v52 = vrot.slane %v954_v10, 1  ;;  %v3503_v53 = vld [vmem:[%s4486_s8 + $0x2c] sm:$0x1]  ;;  %v491_v10 = vshll.u32 %v4109_v24, 16 }
  0x4f   : > { %2023 = vmatpush.bf16.msra.mxu1 %v4145_v54  ;;  %2951 = vmatpush.bf16.msra.mxu0 %v4225_v55  ;;  %v267_v54 = vld [vmem:[%s4486_s8 + $0x20] sm:$0x1]  ;;  %v992_v55 = vsel %vm451_vm0, %v987_v44, %v991_v45  ;;  %v939_v57 = vunpack.c.l.b16 %v3503_v53  ;;  %v273_v53 = vld [vmem:[%s4486_s8 + $0x38] sm:$0x1] }
  0x50   : > { %v421_v62 = vunpack.c.l.b16 %v267_v54  ;;  %v493_v39 = vrot.slane %v491_v10, 1 }
  0x51   : > { %v955_v30 = vpack.c.b16 %v939_v57, %v939_v57  ;;  %v4110_v57 = vld [vmem:[%s4486_s8 + $0x30] sm:$0xff] }
  0x52   : > { %2774 = vmatpush.bf16.msra.mxu2 %v4208_v34  ;;  %2863 = vmatpush.bf16.msra.mxu3 %v4216_v35  ;;  %v4688_v1 = vpack.c.b16 %v421_v62, %v421_v62  ;;  %v4215_v34 = vld [vmem:[%s5256_s1 + $0x1e8] sm:$0xff]  ;;  %v1006_v35 = vshrl.u32 %v4638_v58, 16  ;;  %v494_v45 = vor.u32 %v493_v39, %v489_v38  ;;  %v1030_v38 = vshrl.u32 %v4559_v31, 16 }
  0x53   : > { %2024 = vmatpush.bf16.msra.mxu1 %v4144_v36  ;;  %2952 = vmatpush.bf16.msra.mxu0 %v4224_v37  ;;  %v1001_v6 = vshll.u32 %v955_v30, 16  ;;  %v1184_v18 = vrot.slane %v955_v30, 1  ;;  %v503_v30 = vshll.u32 %v4110_v57, 16 }
  0x54   : > { %v484_v9 = vshll.u32 %v4688_v1, 16 }
  0x55   : > { %v1003_v14 = vrot.slane %v1001_v6, 1  ;;  %v1185_v26 = vsel %vm660_vm1, %v1183_v17, %v1184_v18  ;;  %v501_v6 = vshrl.u32 %v4110_v57, 16  ;;  %v3512_v18 = vld [vmem:[%s4486_s8 + $0x50] sm:$0x1] }
  0x56   : > { %v486_v16 = vrot.slane %v484_v9, 1  ;;  %2775 = vmatpush.bf16.msra.mxu2 %v4207_v33  ;;  %2864 = vmatpush.bf16.msra.mxu3 %v4215_v34  ;;  %v4206_v34 = vld [vmem:[%s5256_s1 + $0x1a0] sm:$0xff] }
  0x57   : > { %v1004_v21 = vsel %vm451_vm0, %v999_v13, %v1003_v14  ;;  %2025 = vmatpush.bf16.msra.mxu1 %v4143_v41  ;;  %2953 = vmatpush.bf16.msra.mxu0 %v4223_v42 }
  0x5a   : > { %2776 = vmatpush.bf16.msra.mxu2 %v4206_v34  ;;  %v1195_v34 = vrot.slane %v4614_v49, 1 }
  0x5c   : > { %1457 = vmatmul.bf16.gmra.mxu0 %v4638_v58  ;;  %1477 = vmatmul.bf16.gmra.mxu1 %v4641_v59 }
  0x5d   : > { %1497 = vmatmul.bf16.gmra.mxu2 %v4644_v60  ;;  %1517 = vmatmul.bf16.gmra.mxu3 %v4161_v61  ;;  %v4108_v61 = vld [vmem:[%s4486_s8 + $0x18] sm:$0xff] }
  0x5e   : > { %v479_v2 = vshll.u32 %v4108_v61, 16  ;;  %v477_v7 = vshrl.u32 %v4108_v61, 16 }
  0x60   : > { %v481_v8 = vrot.slane %v479_v2, 1  ;;  %v1018_v2 = vshrl.u32 %v4498_v11, 16 }
  0x62   : > { %v482_v15 = vor.u32 %v481_v8, %v477_v7  ;;  %v505_v7 = vrot.slane %v503_v30, 1 }
  0x64   : > { %v506_v14 = vor.u32 %v505_v7, %v501_v6  ;;  %v4112_v6 = vld [vmem:[%s4486_s8 + $0x48] sm:$0xff] }
  0x6c   : > { %1531 = vmatmul.bf16.vlgmr.msrb.gmra.mxu1 %v980_v22  ;;  %1942 = vmatmul.bf16.vlgmr.msrb.gmra.mxu0 %v463_v23  ;;  %v487_v22 = vsel %vm451_vm0, %v482_v15, %v486_v16  ;;  %v940_v23 = vunpack.c.l.b16 %v3506_v19  ;;  %v1189_v16 = vrot.slane %v4498_v11, 1  ;;  %v276_v19 = vld [vmem:[%s4486_s8 + $0x44] sm:$0x1] }
  0x6d   : > { %1620 = vmatmul.bf16.vlgmr.msrb.gmra.mxu2 %v1179_v27  ;;  %1853 = vmatmul.bf16.vlgmr.msrb.gmra.mxu3 %v4106_v63  ;;  %v1182_v63 = vsel %vm660_vm1, %v1180_v51, %v1181_v52  ;;  %v1008_v27 = vshll.u32 %v4638_v58, 16  ;;  %v3509_v52 = vld [vmem:[%s4486_s8 + $0x44] sm:$0x1] }
  0x6e   : > { %v956_v28 = vpack.c.b16 %v940_v23, %v940_v23 }
  0x6f   : > { %v1010_v36 = vrot.slane %v1008_v27, 1 }
  0x70   : > { %v1013_v37 = vshll.u32 %v956_v28, 16  ;;  %v1187_v51 = vrot.slane %v956_v28, 1 }
  0x71   : > { %v1011_v43 = vor.u32 %v1010_v36, %v1006_v35  ;;  %v4214_v35 = vld [vmem:[%s5256_s1 + $0x1e0] sm:$0xff] }
  0x72   : > { %v1015_v44 = vrot.slane %v1013_v37, 1  ;;  %v1188_v62 = vsel %vm660_vm1, %v1186_v47, %v1187_v51  ;;  %2865 = vmatpush.bf16.msra.mxu3 %v4214_v35  ;;  %v4222_v47 = vld [vmem:[%s5256_s1 + $0x220] sm:$0xff] }
  0x73   : > { %2954 = vmatpush.bf16.msra.mxu0 %v4222_v47 }
  0x74   : > { %v1016_v54 = vsel %vm451_vm0, %v1011_v43, %v1015_v44 }
  0x7c   : > { %1536 = vmatmul.bf16.gmra.mxu1 %v992_v55  ;;  %1947 = vmatmul.bf16.gmra.mxu0 %v475_v56  ;;  %v941_v56 = vunpack.c.l.b16 %v3509_v52 }
  0x7d   : > { %1625 = vmatmul.bf16.gmra.mxu2 %v1182_v63  ;;  %1858 = vmatmul.bf16.gmra.mxu3 %v4107_v25  ;;  %v422_v25 = vunpack.c.l.b16 %v270_v20  ;;  %v1020_v63 = vshll.u32 %v4498_v11, 16  ;;  %v1032_v11 = vshll.u32 %v4559_v31, 16 }
  0x7e   : > { %v957_v58 = vpack.c.b16 %v941_v56, %v941_v56 }
  0x7f   : > { %v4700_v48 = vpack.c.b16 %v422_v25, %v422_v25  ;;  %v1022_v4 = vrot.slane %v1020_v63, 1  ;;  %v4111_v25 = vld [vmem:[%s4486_s8 + $0x3c] sm:$0xff]  ;;  %v1034_v39 = vrot.slane %v1032_v11, 1 }
  0x80   : > { %v1025_v5 = vshll.u32 %v957_v58, 16  ;;  %v1190_v17 = vrot.slane %v957_v58, 1  ;;  %v515_v33 = vshll.u32 %v4111_v25, 16  ;;  %v513_v43 = vshrl.u32 %v4111_v25, 16 }
  0x81   : > { %v496_v40 = vshll.u32 %v4700_v48, 16  ;;  %v1023_v9 = vor.u32 %v1022_v4, %v1018_v2  ;;  %v1035_v51 = vor.u32 %v1034_v39, %v1030_v38  ;;  %v3518_v38 = vld [vmem:[%s4486_s8 + $0x68] sm:$0x1]  ;;  %v282_v39 = vld [vmem:[%s4486_s8 + $0x5c] sm:$0x1] }
  0x82   : > { %v1027_v13 = vrot.slane %v1025_v5, 1  ;;  %v1191_v27 = vsel %vm660_vm1, %v1189_v16, %v1190_v17  ;;  %v517_v44 = vrot.slane %v515_v33, 1  ;;  %v1042_v17 = vshrl.u32 %v4614_v49, 16 }
  0x83   : > { %v498_v46 = vrot.slane %v496_v40, 1 }
  0x85   : > { %v499_v55 = vsel %vm451_vm0, %v494_v45, %v498_v46  ;;  %v4142_v46 = vld [vmem:[%s5256_s1 + $0xa0] sm:$0xff] }
  0x86   : > { %2026 = vmatpush.bf16.msra.mxu1 %v4142_v46 }
  0x8c   : > { %1541 = vmatmul.bf16.gmra.mxu1 %v1004_v21  ;;  %1952 = vmatmul.bf16.gmra.mxu0 %v487_v22  ;;  %v1028_v22 = vsel %vm451_vm0, %v1023_v9, %v1027_v13 }
  0x8d   : > { %1630 = vmatmul.bf16.gmra.mxu2 %v1185_v26  ;;  %1863 = vmatmul.bf16.gmra.mxu3 %v4108_v61  ;;  %v423_v61 = vunpack.c.l.b16 %v273_v53  ;;  %v424_v26 = vunpack.c.l.b16 %v276_v19  ;;  %v518_v53 = vor.u32 %v517_v44, %v513_v43 }
  0x8f   : > { %v4724_v0 = vpack.c.b16 %v423_v61, %v423_v61  ;;  %v4740_v10 = vpack.c.b16 %v424_v26, %v424_v26  ;;  %v279_v61 = vld [vmem:[%s4486_s8 + $0x50] sm:$0x1] }
  0x90   : > { %v425_v7 = vunpack.c.l.b16 %v279_v61  ;;  %v4205_v61 = vld [vmem:[%s5256_s1 + $0x198] sm:$0xff] }
  0x91   : > { %v508_v8 = vshll.u32 %v4724_v0, 16  ;;  %v520_v45 = vshll.u32 %v4740_v10, 16  ;;  %2777 = vmatpush.bf16.msra.mxu2 %v4205_v61 }
  0x92   : > { %v4780_v13 = vpack.c.b16 %v425_v7, %v425_v7 }
  0x93   : > { %v510_v15 = vrot.slane %v508_v8, 1  ;;  %v1044_v8 = vshll.u32 %v4614_v49, 16 }
  0x94   : > { %v532_v26 = vshll.u32 %v4780_v13, 16 }
  0x95   : > { %v511_v23 = vsel %vm451_vm0, %v506_v14, %v510_v15  ;;  %v527_v14 = vshll.u32 %v4112_v6, 16 }
  0x96   : > { %v534_v33 = vrot.slane %v532_v26, 1 }
  0x9c   : > { %1546 = vmatmul.bf16.gmra.mxu1 %v1016_v54  ;;  %1957 = vmatmul.bf16.gmra.mxu0 %v499_v55  ;;  %v522_v54 = vrot.slane %v520_v45, 1  ;;  %v1192_v55 = vrot.slane %v4559_v31, 1 }
  0x9d   : > { %1635 = vmatmul.bf16.gmra.mxu2 %v1188_v62  ;;  %1868 = vmatmul.bf16.gmra.mxu3 %v4109_v24  ;;  %v942_v24 = vunpack.c.l.b16 %v3512_v18  ;;  %v1046_v18 = vrot.slane %v1044_v8, 1 }
  0x9e   : > { %v523_v4 = vsel %vm451_vm0, %v518_v53, %v522_v54  ;;  %v426_v53 = vunpack.c.l.b16 %v282_v39  ;;  %v1056_v54 = vshll.u32 %v4641_v59, 16 }
  0x9f   : > { %v958_v28 = vpack.c.b16 %v942_v24, %v942_v24  ;;  %v525_v24 = vshrl.u32 %v4112_v6, 16 }
  0xa0   : > { %v1058_v7 = vrot.slane %v1056_v54, 1  ;;  %v4114_v54 = vld [vmem:[%s4486_s8 + $0x60] sm:$0xff] }
  0xa1   : > { %v1037_v42 = vshll.u32 %v958_v28, 16  ;;  %v1193_v56 = vrot.slane %v958_v28, 1 }
  0xa3   : > { %v1039_v52 = vrot.slane %v1037_v42, 1  ;;  %v1194_v31 = vsel %vm660_vm1, %v1192_v55, %v1193_v56  ;;  %v4808_v56 = vpack.c.b16 %v426_v53, %v426_v53 }
  0xa5   : > { %v1040_v2 = vsel %vm451_vm0, %v1035_v51, %v1039_v52  ;;  %v944_v51 = vunpack.c.l.b16 %v3518_v38  ;;  %v4113_v52 = vld [vmem:[%s4486_s8 + $0x54] sm:$0xff]  ;;  %5267 = vst [vmem:[#allocation3_spill] sm:$0xff] %v4808_v56 }
  0xa7   : > { %v960_v55 = vpack.c.b16 %v944_v51, %v944_v51 }
  0xa9   : > { %v4731_v20 = vpop.f32.mrf.mxu0  ;;  %v4733_v21 = vpop.f32.mrf.mxu1 }
  0xac   : > { %1551 = vmatmul.bf16.gmra.mxu1 %v1028_v22  ;;  %1962 = vmatmul.bf16.gmra.mxu0 %v511_v23 }
  0xad   : > { %1640 = vmatmul.bf16.gmra.mxu2 %v1191_v27  ;;  %1873 = vmatmul.bf16.gmra.mxu3 %v4110_v57  ;;  %v3515_v57 = vld [vmem:[%s4486_s8 + $0x5c] sm:$0x1]  ;;  %v1047_v27 = vor.u32 %v1046_v18, %v1042_v17  ;;  %v544_v18 = vshll.u32 %v4808_v56, 16 }
  0xae   : > { %v943_v5 = vunpack.c.l.b16 %v3515_v57  ;;  %v539_v57 = vshll.u32 %v4113_v52, 16 }
  0xb0   : > { %v4748_v36 = vpop.f32.mrf.mxu2  ;;  %v4750_v37 = vpop.f32.mrf.mxu3  ;;  %v959_v9 = vpack.c.b16 %v943_v5, %v943_v5  ;;  %v541_v17 = vrot.slane %v539_v57, 1 }
  0xb1   : > { %v4753_v40 = vpop.f32.mrf.mxu0  ;;  %v4755_v41 = vpop.f32.mrf.mxu1 }
  0xb2   : > { %v1049_v23 = vshll.u32 %v959_v9, 16  ;;  %v1196_v35 = vrot.slane %v959_v9, 1  ;;  %v1061_v9 = vshll.u32 %v960_v55, 16 }
  0xb4   : > { %v1051_v11 = vrot.slane %v1049_v23, 1  ;;  %v1197_v49 = vsel %vm660_vm1, %v1195_v34, %v1196_v35  ;;  %v4141_v23 = vld [vmem:[%s5256_s1 + $0x98] sm:$0xff]  ;;  %v1063_v26 = vrot.slane %v1061_v9, 1  ;;  %v3521_v34 = vld [vmem:[%s4486_s8 + $0x74] sm:$0x1] }
  0xb5   : > { %2027 = vmatpush.bf16.msra.mxu1 %v4141_v23  ;;  %v285_v35 = vld [vmem:[%s4486_s8 + $0x68] sm:$0x1] }
  0xb6   : > { %v1052_v46 = vsel %vm451_vm0, %v1047_v27, %v1051_v11  ;;  %v546_v11 = vrot.slane %v544_v18, 1  ;;  %v427_v57 = vunpack.c.l.b16 %v285_v35  ;;  %v1201_v35 = vrot.slane %v4501_v12, 1 }
  0xb8   : > { %v4767_v62 = vpop.f32.mrf.mxu2  ;;  %v4769_v63 = vpop.f32.mrf.mxu3 }
  0xb9   : > { %v4771_v58 = vpop.f32.mrf.mxu0  ;;  %v4773_v30 = vpop.f32.mrf.mxu1 }
  0xbc   : > { %1556 = vmatmul.bf16.gmra.mxu1 %v1040_v2  ;;  %1967 = vmatmul.bf16.gmra.mxu0 %v523_v4  ;;  %v4213_v2 = vld [vmem:[%s5256_s1 + $0x1d8] sm:$0xff] }
  0xbd   : > { %1645 = vmatmul.bf16.gmra.mxu2 %v1194_v31  ;;  %1878 = vmatmul.bf16.gmra.mxu3 %v4111_v25  ;;  %v529_v25 = vrot.slane %v527_v14, 1  ;;  %v537_v14 = vshrl.u32 %v4113_v52, 16 }
  0xbe   : > { %2866 = vmatpush.bf16.msra.mxu3 %v4213_v2  ;;  %v4848_v2 = vpack.c.b16 %v427_v57, %v427_v57 }
  0xbf   : > { %v530_v28 = vor.u32 %v529_v25, %v525_v24  ;;  %v4221_v24 = vld [vmem:[%s5256_s1 + $0x218] sm:$0xff]  ;;  %v542_v27 = vor.u32 %v541_v17, %v537_v14  ;;  %v1066_v14 = vshrl.u32 %v4501_v12, 16 }
  0xc0   : > { %v4782_v15 = vpop.f32.mrf.mxu2  ;;  %v4784_v16 = vpop.f32.mrf.mxu3  ;;  %2955 = vmatpush.bf16.msra.mxu0 %v4221_v24  ;;  %5270 = vst [vmem:[#allocation6_spill] sm:$0xff] %v4848_v2 }
  0xc1   : > { %v4787_v19 = vpop.f32.mrf.mxu0  ;;  %v4789_v22 = vpop.f32.mrf.mxu1  ;;  %v535_v47 = vsel %vm451_vm0, %v530_v28, %v534_v33  ;;  %v1198_v28 = vrot.slane %v4641_v59, 1  ;;  %v1199_v33 = vrot.slane %v960_v55, 1  ;;  %v547_v53 = vsel %vm451_vm0, %v542_v27, %v546_v11 }
  0xc2   : > { %v1068_v55 = vshll.u32 %v4501_v12, 16 }
  0xc4   : > { %v1070_v17 = vrot.slane %v1068_v55, 1 }
  0xc6   : > { %v1071_v27 = vor.u32 %v1070_v17, %v1066_v14  ;;  %v4115_v14 = vld [vmem:[%s4486_s8 + $0x6c] sm:$0xff] }
  0xc8   : > { %v4795_v42 = vpop.f32.mrf.mxu2  ;;  %v4797_v43 = vpop.f32.mrf.mxu3 }
  0xc9   : > { %5266 = vst [vmem:[#allocation2_spill] sm:$0xff] %v4797_v43  ;;  %v4799_v44 = vpop.f32.mrf.mxu0  ;;  %v4801_v45 = vpop.f32.mrf.mxu1 }
  0xcc   : > { %1561 = vmatmul.bf16.gmra.mxu1 %v1052_v46  ;;  %1972 = vmatmul.bf16.gmra.mxu0 %v535_v47 }
  0xcd   : > { %1650 = vmatmul.bf16.gmra.mxu2 %v1197_v49  ;;  %1883 = vmatmul.bf16.gmra.mxu3 %v4112_v6  ;;  %v1054_v6 = vshrl.u32 %v4641_v59, 16  ;;  %v945_v49 = vunpack.c.l.b16 %v3521_v34  ;;  %v1200_v59 = vsel %vm660_vm1, %v1198_v28, %v1199_v33  ;;  %v3524_v34 = vld [vmem:[%s4486_s8 + $0x80] sm:$0x1] }
  0xcf   : > { %v1059_v25 = vor.u32 %v1058_v7, %v1054_v6  ;;  %v961_v61 = vpack.c.b16 %v945_v49, %v945_v49  ;;  %v551_v6 = vshll.u32 %v4114_v54, 16 }
  0xd0   : > { %v4816_v4 = vpop.f32.mrf.mxu2  ;;  %v4818_v5 = vpop.f32.mrf.mxu3 }
  0xd1   : > { %5268 = vst [vmem:[#allocation4_spill] sm:$0xff] %v4818_v5  ;;  %v4821_v31 = vpop.f32.mrf.mxu0  ;;  %v4823_v8 = vpop.f32.mrf.mxu1  ;;  %v1064_v51 = vsel %vm451_vm0, %v1059_v25, %v1063_v26  ;;  %v1073_v24 = vshll.u32 %v961_v61, 16  ;;  %v549_v25 = vshrl.u32 %v4114_v54, 16  ;;  %v556_v26 = vshll.u32 %v4848_v2, 16 }
  0xd3   : > { %v1075_v11 = vrot.slane %v1073_v24, 1  ;;  %v558_v33 = vrot.slane %v556_v26, 1  ;;  %v563_v26 = vshll.u32 %v4115_v14, 16 }
  0xd8   : > { %v4835_v38 = vpop.f32.mrf.mxu2  ;;  %v4837_v39 = vpop.f32.mrf.mxu3 }
  0xd9   : > { %5269 = vst [vmem:[#allocation5_spill] sm:$0xff] %v4837_v39  ;;  %v4839_v46 = vpop.f32.mrf.mxu0  ;;  %v4841_v47 = vpop.f32.mrf.mxu1 }
  0xdc   : > { %1566 = vmatmul.bf16.gmra.mxu1 %v1064_v51  ;;  %1977 = vmatmul.bf16.gmra.mxu0 %v547_v53  ;;  %v1202_v51 = vrot.slane %v961_v61, 1  ;;  %v288_v53 = vld [vmem:[%s4486_s8 + $0x74] sm:$0x1]  ;;  %v1080_v61 = vshll.u32 %v4562_v32, 16 }
  0xdd   : > { %1655 = vmatmul.bf16.gmra.mxu2 %v1200_v59  ;;  %1888 = vmatmul.bf16.gmra.mxu3 %v4113_v52  ;;  %v553_v52 = vrot.slane %v551_v6, 1  ;;  %v946_v59 = vunpack.c.l.b16 %v3524_v34  ;;  %v1076_v6 = vsel %vm451_vm0, %v1071_v27, %v1075_v11  ;;  %v428_v17 = vunpack.c.l.b16 %v288_v53  ;;  %v4204_v27 = vld [vmem:[%s5256_s1 + $0x190] sm:$0xff] }
  0xde   : > { %2778 = vmatpush.bf16.msra.mxu2 %v4204_v27  ;;  %v561_v53 = vshrl.u32 %v4115_v14, 16 }
  0xdf   : > { %v554_v28 = vor.u32 %v553_v52, %v549_v25  ;;  %v1203_v25 = vsel %vm660_vm1, %v1201_v35, %v1202_v51  ;;  %v962_v12 = vpack.c.b16 %v946_v59, %v946_v59  ;;  %v4873_v52 = vpack.c.b16 %v428_v17, %v428_v17 }
  0xe0   : > { %v4850_v7 = vpop.f32.mrf.mxu2  ;;  %v4852_v9 = vpop.f32.mrf.mxu3  ;;  %v565_v59 = vrot.slane %v563_v26, 1  ;;  %v3527_v26 = vld [vmem:[%s4486_s8 + $0x8c] sm:$0x1] }
  0xe1   : > { %5271 = vst [vmem:[#allocation7_spill] sm:$0xff] %v4852_v9  ;;  %v4855_v18 = vpop.f32.mrf.mxu0  ;;  %v4857_v23 = vpop.f32.mrf.mxu1  ;;  %v559_v2 = vsel %vm451_vm0, %v554_v28, %v558_v33  ;;  %v1078_v28 = vshrl.u32 %v4562_v32, 16  ;;  %v1082_v33 = vrot.slane %v1080_v61, 1  ;;  %v4220_v61 = vld [vmem:[%s5256_s1 + $0x210] sm:$0xff]  ;;  %v947_v39 = vunpack.c.l.b16 %v3527_v26 }
  0xe2   : > { %5273 = vst [vmem:[#allocation9_spill] sm:$0xff] %v4873_v52  ;;  %2956 = vmatpush.bf16.msra.mxu0 %v4220_v61 }
  0xe3   : > { %v1083_v27 = vor.u32 %v1082_v33, %v1078_v28 }
  0xe8   : > { %v4863_v49 = vpop.f32.mrf.mxu2  ;;  %v4865_v57 = vpop.f32.mrf.mxu3 }
  0xe9   : > { %5272 = vst [vmem:[#allocation8_spill] sm:$0xff] %v4865_v57  ;;  %v1532_v55 = vpop.f32.mrf.mxu1  ;;  %v1943_v9 = vpop.f32.mrf.mxu0 }
  0xea   : > { %v1533_v24 = vadd.f32 %v1532_v55, %v4731_v20  ;;  %v4212_v20 = vld [vmem:[%s5256_s1 + $0x1d0] sm:$0xff]  ;;  %v568_v55 = vshll.u32 %v4873_v52, 16 }
  0xeb   : > { %2867 = vmatpush.bf16.msra.mxu3 %v4212_v20  ;;  %v566_v20 = vor.u32 %v565_v59, %v561_v53 }
  0xec   : > { %1571 = vmatmul.bf16.gmra.mxu1 %v1076_v6  ;;  %1982 = vmatmul.bf16.gmra.mxu0 %v559_v2 }
  0xed   : > { %1660 = vmatmul.bf16.gmra.mxu2 %v1203_v25  ;;  %1893 = vmatmul.bf16.gmra.mxu3 %v4114_v54  ;;  %v1085_v54 = vshll.u32 %v962_v12, 16  ;;  %v4140_v25 = vld [vmem:[%s5256_s1 + $0x90] sm:$0xff] }
  0xee   : > { %2028 = vmatpush.bf16.msra.mxu1 %v4140_v25 }
  0xf0   : > { %v1621_v11 = vpop.f32.mrf.mxu2  ;;  %v1854_v2 = vpop.f32.mrf.mxu3 }
  0xf1   : > { %v1622_v34 = vadd.f32 %v1621_v11, %v1533_v24  ;;  %v1534_v35 = vpop.f32.mrf.mxu1  ;;  %v1945_v51 = vpop.f32.mrf.mxu0  ;;  %v1087_v24 = vrot.slane %v1085_v54, 1  ;;  %v570_v11 = vrot.slane %v568_v55, 1  ;;  %v4116_v54 = vld [vmem:[%s4486_s8 + $0x78] sm:$0xff] }
  0xf2   : > { %v1535_v6 = vadd.f32 %v1534_v35, %v4753_v40  ;;  %v1204_v40 = vrot.slane %v4562_v32, 1  ;;  %v963_v32 = vpack.c.b16 %v947_v39, %v947_v39 }
  0xf3   : > { %v1855_v17 = vadd.f32 %v1854_v2, %v1622_v34  ;;  %v1205_v2 = vrot.slane %v962_v12, 1  ;;  %v291_v34 = vld [vmem:[%s4486_s8 + $0x80] sm:$0x1]  ;;  %v1088_v28 = vsel %vm451_vm0, %v1083_v27, %v1087_v24  ;;  %v571_v33 = vsel %vm451_vm0, %v566_v20, %v570_v11 }
  0xf4   : > { %v429_v53 = vunpack.c.l.b16 %v291_v34  ;;  %v1092_v12 = vshll.u32 %v4617_v50, 16  ;;  %v1097_v24 = vshll.u32 %v963_v32, 16  ;;  %v573_v20 = vshrl.u32 %v4116_v54, 16 }
  0xf5   : > { %v4891_v52 = vadd.f32 %v1943_v9, %v1855_v17  ;;  %v1206_v9 = vsel %vm660_vm1, %v1204_v40, %v1205_v2  ;;  %v575_v17 = vshll.u32 %v4116_v54, 16 }
  0xf6   : > { %v1099_v2 = vrot.slane %v1097_v24, 1 }
  0xf7   : > { %v577_v11 = vrot.slane %v575_v17, 1 }
  0xf8   : > { %v1623_v35 = vpop.f32.mrf.mxu2  ;;  %v1856_v57 = vpop.f32.mrf.mxu3 }
  0xf9   : > { %v1624_v56 = vadd.f32 %v1623_v35, %v1535_v6  ;;  %v1537_v5 = vpop.f32.mrf.mxu1  ;;  %v1948_v43 = vpop.f32.mrf.mxu0  ;;  %v4901_v6 = vpack.c.b16 %v429_v53, %v429_v53  ;;  %v578_v34 = vor.u32 %v577_v11, %v573_v20  ;;  %v1207_v53 = vrot.slane %v4617_v50, 1  ;;  %v4203_v11 = vld [vmem:[%s5256_s1 + $0x188] sm:$0xff] }
  0xfa   : > { %v1538_v59 = vadd.f32 %v1537_v5, %v4771_v58  ;;  %v1090_v58 = vshrl.u32 %v4617_v50, 16  ;;  %v1094_v5 = vrot.slane %v1092_v12, 1  ;;  %2779 = vmatpush.bf16.msra.mxu2 %v4203_v11 }
  0xfb   : > { %v1857_v55 = vadd.f32 %v1856_v57, %v1624_v56  ;;  %5274 = vst [vmem:[#allocation10_spill] sm:$0xff] %v4901_v6 }
  0xfc   : > { %1576 = vmatmul.bf16.gmra.mxu1 %v1088_v28  ;;  %1987 = vmatmul.bf16.gmra.mxu0 %v571_v33  ;;  %v3530_v28 = vld [vmem:[%s4486_s8 + $0x98] sm:$0x1] }
  0xfd   : > { %1665 = vmatmul.bf16.gmra.mxu2 %v1206_v9  ;;  %1898 = vmatmul.bf16.gmra.mxu3 %v4115_v14  ;;  %v4903_v25 = vadd.f32 %v1945_v51, %v1857_v55  ;;  %v580_v14 = vshll.u32 %v4901_v6, 16  ;;  %v1095_v51 = vor.u32 %v1094_v5, %v1090_v58  ;;  %v294_v9 = vld [vmem:[%s4486_s8 + $0x8c] sm:$0x1]  ;;  %v948_v17 = vunpack.c.l.b16 %v3530_v28  ;;  %v4117_v58 = vld [vmem:[%s4486_s8 + $0x84] sm:$0xff] }
  0xfe   : > { %v430_v5 = vunpack.c.l.b16 %v294_v9  ;;  %v587_v20 = vshll.u32 %v4117_v58, 16  ;;  %v585_v28 = vshrl.u32 %v4117_v58, 16 }
  0xff   : > { %5275 = vst [vmem:[#allocation11_spill] sm:$0xff] %v4903_v25  ;;  %v582_v35 = vrot.slane %v580_v14, 1  ;;  %v964_v50 = vpack.c.b16 %v948_v17, %v948_v17 }
 0x100   : > { %v1626_v61 = vpop.f32.mrf.mxu2  ;;  %v1859_v27 = vpop.f32.mrf.mxu3 }
 0x101   : > { %v1627_v56 = vadd.f32 %v1626_v61, %v1538_v59  ;;  %v1539_v57 = vpop.f32.mrf.mxu1  ;;  %v1950_v39 = vpop.f32.mrf.mxu0  ;;  %v1208_v59 = vrot.slane %v963_v32, 1  ;;  %v1104_v32 = vshll.u32 %v4644_v60, 16 }
 0x102   : > { %v1540_v26 = vadd.f32 %v1539_v57, %v4787_v19  ;;  %v1100_v19 = vsel %vm451_vm0, %v1095_v51, %v1099_v2  ;;  %v4919_v57 = vpack.c.b16 %v430_v5, %v430_v5  ;;  %v1109_v51 = vshll.u32 %v964_v50, 16  ;;  %v3533_v5 = vld [vmem:[%s4486_s8 + $0xa4] sm:$0x1] }
 0x103   : > { %v1860_v40 = vadd.f32 %v1859_v27, %v1627_v56  ;;  %v583_v27 = vsel %vm451_vm0, %v578_v34, %v582_v35  ;;  %v949_v11 = vunpack.c.l.b16 %v3533_v5 }
 0x105   : > { %v4909_v33 = vadd.f32 %v1948_v43, %v1860_v40  ;;  %v1209_v43 = vsel %vm660_vm1, %v1207_v53, %v1208_v59  ;;  %v1102_v40 = vshrl.u32 %v4644_v60, 16  ;;  %v589_v53 = vrot.slane %v587_v20, 1 }
 0x106   : > { %v592_v59 = vshll.u32 %v4919_v57, 16 }
 0x108   : > { %v1628_v55 = vpop.f32.mrf.mxu2  ;;  %v1861_v12 = vpop.f32.mrf.mxu3 }
 0x109   : > { %v1629_v61 = vadd.f32 %v1628_v55, %v1540_v26  ;;  %v1542_v6 = vpop.f32.mrf.mxu1  ;;  %v1953_v25 = vpop.f32.mrf.mxu0  ;;  %v4139_v55 = vld [vmem:[%s5256_s1 + $0x88] sm:$0xff] }
 0x10a   : > { %v1543_v24 = vadd.f32 %v1542_v6, %v4799_v44  ;;  %v4211_v44 = vld [vmem:[%s5256_s1 + $0x1c8] sm:$0xff]  ;;  %2029 = vmatpush.bf16.msra.mxu1 %v4139_v55 }
 0x10b   : > { %v1862_v56 = vadd.f32 %v1861_v12, %v1629_v61  ;;  %2868 = vmatpush.bf16.msra.mxu3 %v4211_v44  ;;  %v4219_v12 = vld [vmem:[%s5256_s1 + $0x208] sm:$0xff]  ;;  %v1111_v61 = vrot.slane %v1109_v51, 1  ;;  %v4118_v51 = vld [vmem:[%s4486_s8 + $0x90] sm:$0xff] }
 0x10c   : > { %1581 = vmatmul.bf16.gmra.mxu1 %v1100_v19  ;;  %1992 = vmatmul.bf16.gmra.mxu0 %v583_v27  ;;  %v590_v19 = vor.u32 %v589_v53, %v585_v28  ;;  %v594_v27 = vrot.slane %v592_v59, 1  ;;  %v4370_v28 = vld [vmem:[%s4486_s8 + $0x9c] sm:$0xff] }
 0x10d   : > { %1670 = vmatmul.bf16.gmra.mxu2 %v1209_v43  ;;  %1903 = vmatmul.bf16.gmra.mxu3 %v4116_v54  ;;  %v4927_v6 = vadd.f32 %v1950_v39, %v1862_v56  ;;  %v1106_v54 = vrot.slane %v1104_v32, 1  ;;  %v1211_v43 = vrot.slane %v964_v50, 1  ;;  %v297_v56 = vld [vmem:[%s4486_s8 + $0x98] sm:$0x1]  ;;  %v965_v50 = vpack.c.b16 %v949_v11, %v949_v11 }
 0x10e   : > { %2957 = vmatpush.bf16.msra.mxu0 %v4219_v12  ;;  %v1116_v53 = vshll.u32 %v4370_v28, 16 }
 0x10f   : > { %v1107_v17 = vor.u32 %v1106_v54, %v1102_v40  ;;  %v595_v54 = vsel %vm451_vm0, %v590_v19, %v594_v27 }
 0x110   : > { %v1631_v14 = vpop.f32.mrf.mxu2  ;;  %v1864_v26 = vpop.f32.mrf.mxu3 }
 0x111   : > { %v1632_v2 = vadd.f32 %v1631_v14, %v1543_v24  ;;  %v1544_v34 = vpop.f32.mrf.mxu1  ;;  %v1955_v35 = vpop.f32.mrf.mxu0  ;;  %v1112_v40 = vsel %vm451_vm0, %v1107_v17, %v1111_v61  ;;  %v1114_v17 = vshrl.u32 %v4370_v28, 16  ;;  %v1121_v61 = vshll.u32 %v965_v50, 16 }
 0x112   : > { %v1545_v39 = vadd.f32 %v1544_v34, %v4821_v31  ;;  %v1210_v31 = vrot.slane %v4644_v60, 1 }
 0x113   : > { %v1865_v9 = vadd.f32 %v1864_v26, %v1632_v2  ;;  %v431_v2 = vunpack.c.l.b16 %v297_v56 }
 0x114   : > { %v1212_v34 = vsel %vm660_vm1, %v1210_v31, %v1211_v43  ;;  %v597_v31 = vshrl.u32 %v4118_v51, 16 }
 0x115   : > { %v4939_v24 = vadd.f32 %v1953_v25, %v1865_v9  ;;  %v4949_v59 = vpack.c.b16 %v431_v2, %v431_v2  ;;  %v1214_v2 = vrot.slane %v965_v50, 1 }
 0x117   : > { %5276 = vst [vmem:[#allocation12_spill] sm:$0xff] %v4949_v59  ;;  %v604_v56 = vshll.u32 %v4949_v59, 16 }
 0x118   : > { %v1633_v32 = vpop.f32.mrf.mxu2  ;;  %v1866_v20 = vpop.f32.mrf.mxu3 }
 0x119   : > { %v1634_v44 = vadd.f32 %v1633_v32, %v1545_v39  ;;  %v1547_v14 = vpop.f32.mrf.mxu1  ;;  %v1958_v26 = vpop.f32.mrf.mxu0  ;;  %v599_v39 = vshll.u32 %v4118_v51, 16 }
 0x11a   : > { %v1548_v25 = vadd.f32 %v1547_v14, %v4839_v46  ;;  %v1118_v46 = vrot.slane %v1116_v53, 1  ;;  %v3536_v14 = vld [vmem:[%s4486_s8 + $0xb0] sm:$0x1] }
 0x11b   : > { %v1867_v60 = vadd.f32 %v1866_v20, %v1634_v44  ;;  %v601_v43 = vrot.slane %v599_v39, 1  ;;  %v606_v44 = vrot.slane %v604_v56, 1  ;;  %v950_v53 = vunpack.c.l.b16 %v3536_v14  ;;  %v4210_v56 = vld [vmem:[%s5256_s1 + $0x1c0] sm:$0xff] }
 0x11c   : > { %1586 = vmatmul.bf16.gmra.mxu1 %v1112_v40  ;;  %1997 = vmatmul.bf16.gmra.mxu0 %v595_v54  ;;  %v1119_v20 = vor.u32 %v1118_v46, %v1114_v17  ;;  %v1213_v54 = vrot.slane %v4370_v28, 1  ;;  %v4119_v17 = vld [vmem:[%s4486_s8 + $0x9c] sm:$0xff]  ;;  %v4371_v28 = vld [vmem:[%s4486_s8 + $0xa8] sm:$0xff] }
 0x11d   : > { %1675 = vmatmul.bf16.gmra.mxu2 %v1212_v34  ;;  %1908 = vmatmul.bf16.gmra.mxu3 %v4117_v58  ;;  %v4951_v9 = vadd.f32 %v1955_v35, %v1867_v60  ;;  %v1123_v35 = vrot.slane %v1121_v61, 1  ;;  %v602_v11 = vor.u32 %v601_v43, %v597_v31  ;;  %v966_v50 = vpack.c.b16 %v950_v53, %v950_v53  ;;  %v4202_v43 = vld [vmem:[%s5256_s1 + $0x180] sm:$0xff] }
 0x11e   : > { %v1215_v61 = vsel %vm660_vm1, %v1213_v54, %v1214_v2  ;;  %v611_v31 = vshll.u32 %v4119_v17, 16  ;;  %2780 = vmatpush.bf16.msra.mxu2 %v4202_v43  ;;  %2869 = vmatpush.bf16.msra.mxu3 %v4210_v56  ;;  %v4218_v53 = vld [vmem:[%s5256_s1 + $0x200] sm:$0xff] }
 0x11f   : > { %2958 = vmatpush.bf16.msra.mxu0 %v4218_v53 }
 0x120   : > { %v1636_v55 = vpop.f32.mrf.mxu2  ;;  %v1869_v12 = vpop.f32.mrf.mxu3 }
 0x121   : > { %v1637_v19 = vadd.f32 %v1636_v55, %v1548_v25  ;;  %v1549_v27 = vpop.f32.mrf.mxu1  ;;  %v1960_v5 = vpop.f32.mrf.mxu0  ;;  %v300_v25 = vld [vmem:[%s4486_s8 + $0xa4] sm:$0x1] }
 0x122   : > { %v1550_v58 = vadd.f32 %v1549_v27, %v4855_v18  ;;  %v1124_v18 = vsel %vm451_vm0, %v1119_v20, %v1123_v35  ;;  %v432_v46 = vunpack.c.l.b16 %v300_v25  ;;  %v609_v25 = vshrl.u32 %v4119_v17, 16 }
 0x123   : > { %v1870_v32 = vadd.f32 %v1869_v12, %v1637_v19  ;;  %v607_v12 = vsel %vm451_vm0, %v602_v11, %v606_v44  ;;  %v1128_v19 = vshll.u32 %v4371_v28, 16  ;;  %v1133_v44 = vshll.u32 %v966_v50, 16 }
 0x124   : > { %v4964_v27 = vpack.c.b16 %v432_v46, %v432_v46  ;;  %v3539_v46 = vld [vmem:[%s4486_s8 + $0xbc] sm:$0x1] }
 0x125   : > { %v4956_v40 = vadd.f32 %v1958_v26, %v1870_v32  ;;  %v1130_v11 = vrot.slane %v1128_v19, 1  ;;  %v1217_v19 = vrot.slane %v966_v50, 1 }
 0x128   : > { %v1638_v34 = vpop.f32.mrf.mxu2  ;;  %v1871_v60 = vpop.f32.mrf.mxu3 }
 0x129   : > { %v1639_v39 = vadd.f32 %v1638_v34, %v1550_v58  ;;  %v1552_v55 = vpop.f32.mrf.mxu1  ;;  %v1963_v59 = vpop.f32.mrf.mxu0  ;;  %v613_v34 = vrot.slane %v611_v31, 1  ;;  %v303_v31 = vld [vmem:[%s4486_s8 + $0xb0] sm:$0x1] }
 0x12a   : > { %v1553_v32 = vadd.f32 %v1552_v55, %v4733_v21  ;;  %v4138_v21 = vld [vmem:[%s5256_s1 + $0x80] sm:$0xff]  ;;  %v1135_v55 = vrot.slane %v1133_v44, 1 }
 0x12b   : > { %v1872_v26 = vadd.f32 %v1871_v60, %v1639_v39  ;;  %v616_v60 = vshll.u32 %v4964_v27, 16  ;;  %2030 = vmatpush.bf16.msra.mxu1 %v4138_v21 }
 0x12c   : > { %1591 = vmatmul.bf16.gmra.mxu1 %v1124_v18  ;;  %2002 = vmatmul.bf16.gmra.mxu0 %v607_v12  ;;  %v614_v18 = vor.u32 %v613_v34, %v609_v25  ;;  %v4120_v25 = vld [vmem:[%s4486_s8 + $0xa8] sm:$0xff]  ;;  %v433_v34 = vunpack.c.l.b16 %v303_v31 }
 0x12d   : > { %1680 = vmatmul.bf16.gmra.mxu2 %v1215_v61  ;;  %1913 = vmatmul.bf16.gmra.mxu3 %v4118_v51  ;;  %v4972_v58 = vadd.f32 %v1960_v5, %v1872_v26  ;;  %v1126_v51 = vshrl.u32 %v4371_v28, 16  ;;  %v618_v12 = vrot.slane %v616_v60, 1  ;;  %v1216_v26 = vrot.slane %v4371_v28, 1 }
 0x12e   : > { %v4992_v60 = vpack.c.b16 %v433_v34, %v433_v34 }
 0x12f   : > { %v1131_v39 = vor.u32 %v1130_v11, %v1126_v51 }
 0x130   : > { %v1641_v20 = vpop.f32.mrf.mxu2  ;;  %v1874_v35 = vpop.f32.mrf.mxu3  ;;  %5277 = vst [vmem:[#allocation13_spill] sm:$0xff] %v4992_v60 }
 0x131   : > { %v1642_v14 = vadd.f32 %v1641_v20, %v1553_v32  ;;  %v1554_v54 = vpop.f32.mrf.mxu1  ;;  %v1965_v2 = vpop.f32.mrf.mxu0  ;;  %v951_v20 = vunpack.c.l.b16 %v3539_v46  ;;  %v1136_v44 = vsel %vm451_vm0, %v1131_v39, %v1135_v55 }
 0x132   : > { %v1555_v43 = vadd.f32 %v1554_v54, %v4755_v41  ;;  %v4372_v41 = vld [vmem:[%s4486_s8 + $0xb4] sm:$0xff] }
 0x133   : > { %v1875_v5 = vadd.f32 %v1874_v35, %v1642_v14  ;;  %v619_v14 = vsel %vm451_vm0, %v614_v18, %v618_v12  ;;  %v967_v50 = vpack.c.b16 %v951_v20, %v951_v20  ;;  %v1140_v54 = vshll.u32 %v4372_v41, 16 }
 0x134   : > { %v1138_v18 = vshrl.u32 %v4372_v41, 16 }
 0x135   : > { %v4983_v61 = vadd.f32 %v1963_v59, %v1875_v5  ;;  %v1218_v59 = vsel %vm660_vm1, %v1216_v26, %v1217_v19  ;;  %v623_v5 = vshll.u32 %v4120_v25, 16  ;;  %v1142_v12 = vrot.slane %v1140_v54, 1 }
 0x136   : > { %v1145_v46 = vshll.u32 %v967_v50, 16  ;;  %v1220_v34 = vrot.slane %v967_v50, 1 }
 0x137   : > { %v1143_v20 = vor.u32 %v1142_v12, %v1138_v18 }
 0x138   : > { %v1643_v56 = vpop.f32.mrf.mxu2  ;;  %v1876_v32 = vpop.f32.mrf.mxu3 }
 0x139   : > { %v1644_v35 = vadd.f32 %v1643_v56, %v1555_v43  ;;  %v1557_v51 = vpop.f32.mrf.mxu1  ;;  %v1968_v11 = vpop.f32.mrf.mxu0  ;;  %v621_v43 = vshrl.u32 %v4120_v25, 16  ;;  %v625_v56 = vrot.slane %v623_v5, 1 }
 0x13a   : > { %v1558_v53 = vadd.f32 %v1557_v51, %v4773_v30  ;;  %v3542_v51 = vld [vmem:[%s4486_s8 + $0xc8] sm:$0x1] }
 0x13b   : > { %v1877_v28 = vadd.f32 %v1876_v32, %v1644_v35  ;;  %v626_v35 = vor.u32 %v625_v56, %v621_v43  ;;  %v952_v5 = vunpack.c.l.b16 %v3542_v51 }
 0x13c   : > { %1596 = vmatmul.bf16.gmra.mxu1 %v1136_v44  ;;  %2007 = vmatmul.bf16.gmra.mxu0 %v619_v14  ;;  %v1219_v14 = vrot.slane %v4372_v41, 1 }
 0x13d   : > { %1685 = vmatmul.bf16.gmra.mxu2 %v1218_v59  ;;  %1918 = vmatmul.bf16.gmra.mxu3 %v4119_v17  ;;  %v4994_v21 = vadd.f32 %v1965_v2, %v1877_v28  ;;  %v628_v17 = vshll.u32 %v4992_v60, 16  ;;  %v1147_v2 = vrot.slane %v1145_v46, 1  ;;  %v306_v59 = vld [vmem:[%s4486_s8 + $0xbc] sm:$0x1]  ;;  %v4121_v46 = vld [vmem:[%s4486_s8 + $0xb4] sm:$0xff]  ;;  %v968_v50 = vpack.c.b16 %v952_v5, %v952_v5 }
 0x13e   : > { %v635_v56 = vshll.u32 %v4121_v46, 16 }
 0x13f   : > { %v630_v30 = vrot.slane %v628_v17, 1  ;;  %v1148_v18 = vsel %vm451_vm0, %v1143_v20, %v1147_v2  ;;  %v1157_v51 = vshll.u32 %v968_v50, 16 }
 0x140   : > { %v1646_v39 = vpop.f32.mrf.mxu2  ;;  %v1879_v55 = vpop.f32.mrf.mxu3 }
 0x141   : > { %v1647_v26 = vadd.f32 %v1646_v39, %v1558_v53  ;;  %v1559_v19 = vpop.f32.mrf.mxu1  ;;  %v1970_v31 = vpop.f32.mrf.mxu0  ;;  %v631_v12 = vsel %vm451_vm0, %v626_v35, %v630_v30 }
 0x142   : > { %v1560_v28 = vadd.f32 %v1559_v19, %v4789_v22  ;;  %v4373_v22 = vld [vmem:[%s4486_s8 + $0xc0] sm:$0xff] }
 0x143   : > { %v1880_v32 = vadd.f32 %v1879_v55, %v1647_v26  ;;  %v434_v26 = vunpack.c.l.b16 %v306_v59  ;;  %v1152_v19 = vshll.u32 %v4373_v22, 16  ;;  %v1150_v35 = vshrl.u32 %v4373_v22, 16 }
 0x145   : > { %v4999_v44 = vadd.f32 %v1968_v11, %v1880_v32  ;;  %v1221_v11 = vsel %vm660_vm1, %v1219_v14, %v1220_v34  ;;  %v5008_v43 = vpack.c.b16 %v434_v26, %v434_v26  ;;  %v1154_v30 = vrot.slane %v1152_v19, 1 }
 0x147   : > { %5278 = vst [vmem:[#allocation14_spill] sm:$0xff] %v5008_v43  ;;  %v1155_v5 = vor.u32 %v1154_v30, %v1150_v35  ;;  %v4186_v30 = vld [vmem:[%s4486_s8 + $0x18] sm:$0xff] }
 0x148   : > { %v1648_v54 = vpop.f32.mrf.mxu2  ;;  %v1881_v53 = vpop.f32.mrf.mxu3 }
 0x149   : > { %v1649_v39 = vadd.f32 %v1648_v54, %v1560_v28  ;;  %v1562_v60 = vpop.f32.mrf.mxu1  ;;  %v1973_v55 = vpop.f32.mrf.mxu0  ;;  %v633_v28 = vshrl.u32 %v4121_v46, 16  ;;  %v637_v54 = vrot.slane %v635_v56, 1 }
 0x14a   : > { %v1563_v32 = vadd.f32 %v1562_v60, %v4801_v45  ;;  %v1222_v60 = vrot.slane %v4373_v22, 1  ;;  %v2311_v22 = vshll.u32 %v4186_v30, 16 }
 0x14b   : > { %v1882_v41 = vadd.f32 %v1881_v53, %v1649_v39  ;;  %v1159_v39 = vrot.slane %v1157_v51, 1 }
 0x14c   : > { %1601 = vmatmul.bf16.gmra.mxu1 %v1148_v18  ;;  %2012 = vmatmul.bf16.gmra.mxu0 %v631_v12  ;;  %v1223_v12 = vrot.slane %v968_v50, 1 }
 0x14d   : > { %1690 = vmatmul.bf16.gmra.mxu2 %v1221_v11  ;;  %1923 = vmatmul.bf16.gmra.mxu3 %v4120_v25  ;;  %v5010_v17 = vadd.f32 %v1970_v31, %v1882_v41  ;;  %v640_v25 = vshll.u32 %v5008_v43, 16  ;;  %v638_v31 = vor.u32 %v637_v54, %v633_v28  ;;  %v3849_v11 = vld [vmem:[%s4486_s8 + $0x20] sm:$0x1]  ;;  %v1160_v43 = vsel %vm451_vm0, %v1155_v5, %v1159_v39 }
 0x14e   : > { %v1224_v35 = vsel %vm660_vm1, %v1222_v60, %v1223_v12  ;;  %v2276_v51 = vunpack.c.l.b16 %v3849_v11  ;;  %v2309_v5 = vshrl.u32 %v4186_v30, 16  ;;  %v2313_v39 = vrot.slane %v2311_v22, 1 }
 0x14f   : > { %v642_v18 = vrot.slane %v640_v25, 1 }
 0x150   : > { %v1651_v20 = vpop.f32.mrf.mxu2  ;;  %v1884_v2 = vpop.f32.mrf.mxu3  ;;  %v2292_v50 = vpack.c.b16 %v2276_v51, %v2276_v51 }
 0x151   : > { %v1652_v14 = vadd.f32 %v1651_v20, %v1563_v32  ;;  %v1564_v34 = vpop.f32.mrf.mxu1  ;;  %v1975_v59 = vpop.f32.mrf.mxu0 }
 0x152   : > { %v1565_v26 = vadd.f32 %v1564_v34, %v4823_v8  ;;  %v2517_v12 = vrot.slane %v2292_v50, 1 }
 0x153   : > { %v1885_v53 = vadd.f32 %v1884_v2, %v1652_v14  ;;  %v643_v2 = vsel %vm451_vm0, %v638_v31, %v642_v18  ;;  %v2316_v31 = vshll.u32 %v2292_v50, 16  ;;  %v4374_v18 = vld [vmem:[%s4486_s8] sm:$0xff] }
 0x154   : > { %v661_v60 = vrot.slane %v4374_v18, 1 }
 0x155   : > { %v5014_v45 = vadd.f32 %v1973_v55, %v1885_v53  ;;  %v2318_v11 = vrot.slane %v2316_v31, 1 }
 0x158   : > { %v1653_v41 = vpop.f32.mrf.mxu2  ;;  %v1886_v19 = vpop.f32.mrf.mxu3 }
 0x159   : > { %v1654_v32 = vadd.f32 %v1653_v41, %v1565_v26  ;;  %v1567_v20 = vpop.f32.mrf.mxu1  ;;  %v1978_v56 = vpop.f32.mrf.mxu0 }
 0x15a   : > { %v1568_v14 = vadd.f32 %v1567_v20, %v4841_v47  ;;  %v2314_v47 = vor.u32 %v2313_v39, %v2309_v5 }
 0x15b   : > { %v1887_v55 = vadd.f32 %v1886_v19, %v1654_v32  ;;  %v3852_v19 = vld [vmem:[%s4486_s8 + $0x2c] sm:$0x1] }
 0x15c   : > { %1606 = vmatmul.bf16.gmra.mxu1 %v1160_v43  ;;  %2017 = vmatmul.bf16.gmra.mxu0 %v643_v2  ;;  %v2277_v50 = vunpack.c.l.b16 %v3852_v19 }
 0x15d   : > { %1695 = vmatmul.bf16.gmra.mxu2 %v1224_v35  ;;  %1928 = vmatmul.bf16.gmra.mxu3 %v4121_v46  ;;  %v5022_v8 = vadd.f32 %v1975_v59, %v1887_v55  ;;  %v662_v46 = vrot.slane %v4652_v3, 1  ;;  %v2516_v59 = vrot.slane %v4186_v30, 1  ;;  %v2319_v3 = vsel %vm451_vm0, %v2314_v47, %v2318_v11 }
 0x15f   : > { %v663_v55 = vsel %vm660_vm1, %v661_v60, %v662_v46  ;;  %v2518_v22 = vsel %vm660_vm1, %v2516_v59, %v2517_v12  ;;  %v4375_v12 = vld [vmem:[%s4486_s8 + $0xc] sm:$0xff] }
 0x160   : > { %v1656_v34 = vpop.f32.mrf.mxu2  ;;  %v1889_v28 = vpop.f32.mrf.mxu3  ;;  %v664_v47 = vrot.slane %v4375_v12, 1 }
 0x161   : > { %v1657_v54 = vadd.f32 %v1656_v34, %v1568_v14  ;;  %v1569_v25 = vpop.f32.mrf.mxu1  ;;  %v1980_v53 = vpop.f32.mrf.mxu0  ;;  %v4187_v14 = vld [vmem:[%s4486_s8 + $0x24] sm:$0xff]  ;;  %v2293_v34 = vpack.c.b16 %v2277_v50, %v2277_v50 }
 0x162   : > { %v1570_v41 = vadd.f32 %v1569_v25, %v4857_v23  ;;  %v2321_v18 = vshrl.u32 %v4187_v14, 16 }
 0x163   : > { %v1890_v43 = vadd.f32 %v1889_v28, %v1657_v54  ;;  %v2323_v28 = vshll.u32 %v4187_v14, 16  ;;  %v2328_v46 = vshll.u32 %v2293_v34, 16  ;;  %v2520_v11 = vrot.slane %v2293_v34, 1 }
 0x165   : > { %v5027_v26 = vadd.f32 %v1978_v56, %v1890_v43  ;;  %v2325_v60 = vrot.slane %v2323_v28, 1  ;;  %v2330_v19 = vrot.slane %v2328_v46, 1  ;;  %v4188_v28 = vld [vmem:[%s4486_s8 + $0x30] sm:$0xff] }
 0x168   : > { %v1658_v32 = vpop.f32.mrf.mxu2  ;;  %v1891_v20 = vpop.f32.mrf.mxu3 }
 0x169   : > { %v1659_v2 = vadd.f32 %v1658_v32, %v1570_v41  ;;  %v1572_v35 = vpop.f32.mrf.mxu1  ;;  %v1983_v51 = vpop.f32.mrf.mxu0 }
 0x16a   : > { %v1573_v54 = vadd.f32 %v1572_v35, %v4748_v36  ;;  %v2326_v36 = vor.u32 %v2325_v60, %v2321_v18 }
 0x16b   : > { %v1892_v56 = vadd.f32 %v1891_v20, %v1659_v2  ;;  %v3855_v20 = vld [vmem:[%s4486_s8 + $0x38] sm:$0x1] }
 0x16c   : > { %2031 = vmatmul.bf16.vlgmr.msra.gmra.mxu1 %v663_v55  ;;  %2959 = vmatmul.bf16.vlgmr.msra.gmra.mxu0 %v2518_v22  ;;  %v2278_v34 = vunpack.c.l.b16 %v3855_v20 }
 0x16d   : > { %2781 = vmatmul.bf16.vlgmr.msra.gmra.mxu2 %v4186_v30  ;;  %2870 = vmatmul.bf16.vlgmr.msra.gmra.mxu3 %v2319_v3  ;;  %v5035_v23 = vadd.f32 %v1980_v53, %v1892_v56  ;;  %v665_v30 = vrot.slane %v4664_v29, 1  ;;  %v2519_v53 = vrot.slane %v4187_v14, 1  ;;  %v2331_v29 = vsel %vm451_vm0, %v2326_v36, %v2330_v19 }
 0x16f   : > { %v666_v50 = vsel %vm660_vm1, %v664_v47, %v665_v30  ;;  %v2521_v56 = vsel %vm660_vm1, %v2519_v53, %v2520_v11  ;;  %v4376_v53 = vld [vmem:[%s4486_s8 + $0x18] sm:$0xff] }
 0x170   : > { %v1661_v25 = vpop.f32.mrf.mxu2  ;;  %v1894_v5 = vpop.f32.mrf.mxu3  ;;  %v667_v11 = vrot.slane %v4376_v53, 1 }
 0x171   : > { %v1662_v39 = vadd.f32 %v1661_v25, %v1573_v54  ;;  %v1574_v31 = vpop.f32.mrf.mxu1  ;;  %v1985_v43 = vpop.f32.mrf.mxu0  ;;  %v2294_v54 = vpack.c.b16 %v2278_v34, %v2278_v34  ;;  %v2335_v25 = vshll.u32 %v4188_v28, 16 }
 0x172   : > { %v1575_v32 = vadd.f32 %v1574_v31, %v4767_v62 }
 0x173   : > { %v1895_v59 = vadd.f32 %v1894_v5, %v1662_v39  ;;  %v2337_v12 = vrot.slane %v2335_v25, 1  ;;  %v2340_v47 = vshll.u32 %v2294_v54, 16  ;;  %v2523_v36 = vrot.slane %v2294_v54, 1 }
 0x175   : > { %v5040_v41 = vadd.f32 %v1983_v51, %v1895_v59  ;;  %v2333_v59 = vshrl.u32 %v4188_v28, 16 }
 0x178   : > { %v1663_v2 = vpop.f32.mrf.mxu2  ;;  %v1896_v35 = vpop.f32.mrf.mxu3 }
 0x179   : > { %v1664_v55 = vadd.f32 %v1663_v2, %v1575_v32  ;;  %v1577_v22 = vpop.f32.mrf.mxu1  ;;  %v1988_v3 = vpop.f32.mrf.mxu0  ;;  %v2342_v32 = vrot.slane %v2340_v47, 1  ;;  %v3858_v2 = vld [vmem:[%s4486_s8 + $0x44] sm:$0x1] }
 0x17a   : > { %v1578_v5 = vadd.f32 %v1577_v22, %v4782_v15  ;;  %v2338_v15 = vor.u32 %v2337_v12, %v2333_v59  ;;  %v2279_v54 = vunpack.c.l.b16 %v3858_v2  ;;  %v3861_v2 = vld [vmem:[%s4486_s8 + $0x50] sm:$0x1] }
 0x17b   : > { %v1897_v51 = vadd.f32 %v1896_v35, %v1664_v55 }
 0x17c   : > { %2036 = vmatmul.bf16.gmra.mxu1 %v666_v50  ;;  %2964 = vmatmul.bf16.gmra.mxu0 %v2521_v56  ;;  %v2295_v25 = vpack.c.b16 %v2279_v54, %v2279_v54  ;;  %v4190_v54 = vld [vmem:[%s4486_s8 + $0x48] sm:$0xff] }
 0x17d   : > { %2786 = vmatmul.bf16.gmra.mxu2 %v4187_v14  ;;  %2875 = vmatmul.bf16.gmra.mxu3 %v2331_v29  ;;  %v5048_v62 = vadd.f32 %v1985_v43, %v1897_v51  ;;  %v668_v14 = vrot.slane %v4688_v1, 1  ;;  %v2522_v43 = vrot.slane %v4188_v28, 1  ;;  %v2343_v1 = vsel %vm451_vm0, %v2338_v15, %v2342_v32  ;;  %v4189_v51 = vld [vmem:[%s4486_s8 + $0x3c] sm:$0xff] }
 0x17e   : > { %v2345_v47 = vshrl.u32 %v4189_v51, 16  ;;  %v2352_v53 = vshll.u32 %v2295_v25, 16 }
 0x17f   : > { %v669_v29 = vsel %vm660_vm1, %v667_v11, %v668_v14  ;;  %v2524_v34 = vsel %vm660_vm1, %v2522_v43, %v2523_v36  ;;  %v4377_v14 = vld [vmem:[%s4486_s8 + $0x24] sm:$0xff]  ;;  %v2526_v36 = vrot.slane %v2295_v25, 1 }
 0x180   : > { %v1666_v39 = vpop.f32.mrf.mxu2  ;;  %v1899_v31 = vpop.f32.mrf.mxu3  ;;  %v670_v43 = vrot.slane %v4377_v14, 1  ;;  %v2354_v32 = vrot.slane %v2352_v53, 1 }
 0x181   : > { %v1667_v18 = vadd.f32 %v1666_v39, %v1578_v5  ;;  %v1579_v60 = vpop.f32.mrf.mxu1  ;;  %v1990_v46 = vpop.f32.mrf.mxu0  ;;  %v2347_v5 = vshll.u32 %v4189_v51, 16 }
 0x182   : > { %v1580_v20 = vadd.f32 %v1579_v60, %v4795_v42 }
 0x183   : > { %v1900_v30 = vadd.f32 %v1899_v31, %v1667_v18 }
 0x185   : > { %v5053_v19 = vadd.f32 %v1988_v3, %v1900_v30  ;;  %v2349_v30 = vrot.slane %v2347_v5, 1  ;;  %v2359_v5 = vshll.u32 %v4190_v54, 16 }
 0x187   : > { %v2361_v53 = vrot.slane %v2359_v5, 1 }
 0x188   : > { %v1668_v35 = vpop.f32.mrf.mxu2  ;;  %v1901_v55 = vpop.f32.mrf.mxu3 }
 0x189   : > { %v1669_v22 = vadd.f32 %v1668_v35, %v1580_v20  ;;  %v1582_v50 = vpop.f32.mrf.mxu1  ;;  %v1993_v56 = vpop.f32.mrf.mxu0 }
 0x18a   : > { %v1583_v39 = vadd.f32 %v1582_v50, %v4816_v4  ;;  %v2350_v4 = vor.u32 %v2349_v30, %v2345_v47  ;;  %v2357_v30 = vshrl.u32 %v4190_v54, 16 }
 0x18b   : > { %v1902_v3 = vadd.f32 %v1901_v55, %v1669_v22 }
 0x18c   : > { %2041 = vmatmul.bf16.gmra.mxu1 %v669_v29  ;;  %2969 = vmatmul.bf16.gmra.mxu0 %v2524_v34 }
 0x18d   : > { %2791 = vmatmul.bf16.gmra.mxu2 %v4188_v28  ;;  %2880 = vmatmul.bf16.gmra.mxu3 %v2343_v1  ;;  %v5061_v42 = vadd.f32 %v1990_v46, %v1902_v3  ;;  %v671_v28 = vrot.slane %v4700_v48, 1  ;;  %v2525_v46 = vrot.slane %v4189_v51, 1  ;;  %v2355_v48 = vsel %vm451_vm0, %v2350_v4, %v2354_v32 }
 0x18e   : > { %v2280_v3 = vunpack.c.l.b16 %v3861_v2 }
 0x18f   : > { %v672_v34 = vsel %vm660_vm1, %v670_v43, %v671_v28  ;;  %v2527_v1 = vsel %vm660_vm1, %v2525_v46, %v2526_v36  ;;  %v4378_v43 = vld [vmem:[%s4486_s8 + $0x30] sm:$0xff] }
 0x190   : > { %v1671_v31 = vpop.f32.mrf.mxu2  ;;  %v1904_v18 = vpop.f32.mrf.mxu3  ;;  %v2296_v25 = vpack.c.b16 %v2280_v3, %v2280_v3  ;;  %v673_v28 = vrot.slane %v4378_v43, 1  ;;  %v4379_v43 = vld [vmem:[%s4486_s8 + $0x3c] sm:$0xff] }
 0x191   : > { %v1672_v60 = vadd.f32 %v1671_v31, %v1583_v39  ;;  %v1584_v59 = vpop.f32.mrf.mxu1  ;;  %v1995_v12 = vpop.f32.mrf.mxu0 }
 0x192   : > { %v1585_v20 = vadd.f32 %v1584_v59, %v4835_v38  ;;  %v2529_v46 = vrot.slane %v2296_v25, 1 }
 0x193   : > { %v1905_v11 = vadd.f32 %v1904_v18, %v1672_v60 }
 0x195   : > { %v5066_v15 = vadd.f32 %v1993_v56, %v1905_v11  ;;  %v2364_v11 = vshll.u32 %v2296_v25, 16 }
 0x197   : > { %v2366_v4 = vrot.slane %v2364_v11, 1 }
 0x198   : > { %v1673_v35 = vpop.f32.mrf.mxu2  ;;  %v1906_v55 = vpop.f32.mrf.mxu3 }
 0x199   : > { %v1674_v22 = vadd.f32 %v1673_v35, %v1585_v20  ;;  %v1587_v50 = vpop.f32.mrf.mxu1  ;;  %v1998_v29 = vpop.f32.mrf.mxu0  ;;  %v3864_v20 = vld [vmem:[%s4486_s8 + $0x5c] sm:$0x1] }
 0x19a   : > { %v1588_v39 = vadd.f32 %v1587_v50, %v4850_v7  ;;  %v2362_v7 = vor.u32 %v2361_v53, %v2357_v30  ;;  %v2281_v3 = vunpack.c.l.b16 %v3864_v20 }
 0x19b   : > { %v1907_v56 = vadd.f32 %v1906_v55, %v1674_v22 }
 0x19c   : > { %2046 = vmatmul.bf16.gmra.mxu1 %v672_v34  ;;  %2974 = vmatmul.bf16.gmra.mxu0 %v2527_v1 }
 0x19d   : > { %2796 = vmatmul.bf16.gmra.mxu2 %v4189_v51  ;;  %2885 = vmatmul.bf16.gmra.mxu3 %v2355_v48  ;;  %v5074_v38 = vadd.f32 %v1995_v12, %v1907_v56  ;;  %v674_v51 = vrot.slane %v4724_v0, 1  ;;  %v2528_v12 = vrot.slane %v4190_v54, 1  ;;  %v2367_v0 = vsel %vm451_vm0, %v2362_v7, %v2366_v4  ;;  %v4191_v48 = vld [vmem:[%s4486_s8 + $0x54] sm:$0xff]  ;;  %v3867_v4 = vld [vmem:[%s4486_s8 + $0x68] sm:$0x1] }
 0x19e   : > { %v2297_v56 = vpack.c.b16 %v2281_v3, %v2281_v3  ;;  %v2371_v25 = vshll.u32 %v4191_v48, 16  ;;  %v2369_v30 = vshrl.u32 %v4191_v48, 16 }
 0x19f   : > { %v675_v34 = vsel %vm660_vm1, %v673_v28, %v674_v51  ;;  %v2530_v1 = vsel %vm660_vm1, %v2528_v12, %v2529_v46  ;;  %v676_v28 = vrot.slane %v4379_v43, 1 }
 0x1a0   : > { %v1676_v31 = vpop.f32.mrf.mxu2  ;;  %v1909_v18 = vpop.f32.mrf.mxu3  ;;  %v2373_v53 = vrot.slane %v2371_v25, 1  ;;  %v2376_v11 = vshll.u32 %v2297_v56, 16  ;;  %v2532_v51 = vrot.slane %v2297_v56, 1 }
 0x1a1   : > { %v1677_v60 = vadd.f32 %v1676_v31, %v1588_v39  ;;  %v1589_v59 = vpop.f32.mrf.mxu1  ;;  %v2000_v47 = vpop.f32.mrf.mxu0 }
 0x1a2   : > { %v1590_v32 = vadd.f32 %v1589_v59, %v4863_v49  ;;  %v2378_v46 = vrot.slane %v2376_v11, 1 }
 0x1a3   : > { %v1910_v14 = vadd.f32 %v1909_v18, %v1677_v60 }
 0x1a5   : > { %v5079_v36 = vadd.f32 %v1998_v29, %v1910_v14 }
 0x1a8   : > { %v1678_v2 = vpop.f32.mrf.mxu2  ;;  %v1911_v35 = vpop.f32.mrf.mxu3 }
 0x1a9   : > { %v1679_v55 = vadd.f32 %v1678_v2, %v1590_v32  ;;  %v1592_v22 = vpop.f32.mrf.mxu1  ;;  %v2003_v50 = vpop.f32.mrf.mxu0 }
 0x1aa   : > { %v1593_v5 = vadd.f32 %v1592_v22, %v4750_v37  ;;  %v2374_v37 = vor.u32 %v2373_v53, %v2369_v30 }
 0x1ab   : > { %v1912_v29 = vadd.f32 %v1911_v35, %v1679_v55 }
 0x1ac   : > { %2051 = vmatmul.bf16.gmra.mxu1 %v675_v34  ;;  %2979 = vmatmul.bf16.gmra.mxu0 %v2530_v1  ;;  %v4192_v1 = vld [vmem:[%s4486_s8 + $0x60] sm:$0xff] }
 0x1ad   : > { %2801 = vmatmul.bf16.gmra.mxu2 %v4190_v54  ;;  %2890 = vmatmul.bf16.gmra.mxu3 %v2367_v0  ;;  %v5087_v49 = vadd.f32 %v2000_v47, %v1912_v29  ;;  %v677_v54 = vrot.slane %v4740_v10, 1  ;;  %v2531_v47 = vrot.slane %v4191_v48, 1  ;;  %v2379_v10 = vsel %vm451_vm0, %v2374_v37, %v2378_v46  ;;  %v3870_v46 = vld [vmem:[%s4486_s8 + $0x74] sm:$0x1] }
 0x1ae   : > { %v2282_v0 = vunpack.c.l.b16 %v3867_v4  ;;  %v2383_v29 = vshll.u32 %v4192_v1, 16 }
 0x1af   : > { %v678_v22 = vsel %vm660_vm1, %v676_v28, %v677_v54  ;;  %v2533_v34 = vsel %vm660_vm1, %v2531_v47, %v2532_v51  ;;  %v5279_v51 = vld [vmem:[#allocation2_spill] sm:$0xff] }
 0x1b0   : > { %v1681_v39 = vpop.f32.mrf.mxu2  ;;  %v1914_v31 = vpop.f32.mrf.mxu3  ;;  %v2298_v3 = vpack.c.b16 %v2282_v0, %v2282_v0  ;;  %v2385_v30 = vrot.slane %v2383_v29, 1  ;;  %v5280_v29 = vld [vmem:[#allocation4_spill] sm:$0xff] }
 0x1b1   : > { %v1682_v18 = vadd.f32 %v1681_v39, %v1593_v5  ;;  %v1594_v60 = vpop.f32.mrf.mxu1  ;;  %v2005_v59 = vpop.f32.mrf.mxu0 }
 0x1b2   : > { %v1595_v7 = vadd.f32 %v1594_v60, %v4769_v63  ;;  %v2381_v60 = vshrl.u32 %v4192_v1, 16  ;;  %v2388_v53 = vshll.u32 %v2298_v3, 16  ;;  %v2535_v28 = vrot.slane %v2298_v3, 1 }
 0x1b3   : > { %v1915_v14 = vadd.f32 %v1914_v31, %v1682_v18 }
 0x1b4   : > { %v2390_v47 = vrot.slane %v2388_v53, 1 }
 0x1b5   : > { %v5092_v12 = vadd.f32 %v2003_v50, %v1915_v14  ;;  %v4380_v14 = vld [vmem:[%s4486_s8 + $0x48] sm:$0xff] }
 0x1b6   : > { %v679_v43 = vrot.slane %v4380_v14, 1 }
 0x1b8   : > { %v1683_v32 = vpop.f32.mrf.mxu2  ;;  %v1916_v20 = vpop.f32.mrf.mxu3 }
 0x1b9   : > { %v1684_v2 = vadd.f32 %v1683_v32, %v1595_v7  ;;  %v1597_v35 = vpop.f32.mrf.mxu1  ;;  %v2008_v55 = vpop.f32.mrf.mxu0 }
 0x1ba   : > { %v1598_v56 = vadd.f32 %v1597_v35, %v4784_v16  ;;  %v2386_v16 = vor.u32 %v2385_v30, %v2381_v60 }
 0x1bb   : > { %v1917_v50 = vadd.f32 %v1916_v20, %v1684_v2 }
 0x1bc   : > { %2056 = vmatmul.bf16.gmra.mxu1 %v678_v22  ;;  %2984 = vmatmul.bf16.gmra.mxu0 %v2533_v34  ;;  %v4193_v34 = vld [vmem:[%s4486_s8 + $0x6c] sm:$0xff] }
 0x1bd   : > { %2806 = vmatmul.bf16.gmra.mxu2 %v4191_v48  ;;  %2895 = vmatmul.bf16.gmra.mxu3 %v2379_v10  ;;  %v5100_v63 = vadd.f32 %v2005_v59, %v1917_v50  ;;  %v680_v48 = vrot.slane %v4780_v13, 1  ;;  %v2534_v59 = vrot.slane %v4192_v1, 1  ;;  %v2391_v13 = vsel %vm451_vm0, %v2386_v16, %v2390_v47 }
 0x1be   : > { %v2283_v10 = vunpack.c.l.b16 %v3870_v46  ;;  %v2395_v3 = vshll.u32 %v4193_v34, 16  ;;  %v2393_v30 = vshrl.u32 %v4193_v34, 16 }
 0x1bf   : > { %v681_v35 = vsel %vm660_vm1, %v679_v43, %v680_v48  ;;  %v2536_v22 = vsel %vm660_vm1, %v2534_v59, %v2535_v28  ;;  %v4381_v43 = vld [vmem:[%s4486_s8 + $0x54] sm:$0xff] }
 0x1c0   : > { %v1686_v25 = vpop.f32.mrf.mxu2  ;;  %v1919_v5 = vpop.f32.mrf.mxu3  ;;  %v2299_v50 = vpack.c.b16 %v2283_v10, %v2283_v10  ;;  %v2397_v53 = vrot.slane %v2395_v3, 1  ;;  %v682_v48 = vrot.slane %v4381_v43, 1  ;;  %v4194_v3 = vld [vmem:[%s4486_s8 + $0x78] sm:$0xff] }
 0x1c1   : > { %v1687_v39 = vadd.f32 %v1686_v25, %v1598_v56  ;;  %v1599_v31 = vpop.f32.mrf.mxu1  ;;  %v2010_v18 = vpop.f32.mrf.mxu0  ;;  %v2405_v43 = vshrl.u32 %v4194_v3, 16 }
 0x1c2   : > { %v1600_v37 = vadd.f32 %v1599_v31, %v5279_v51  ;;  %v2538_v28 = vrot.slane %v2299_v50, 1  ;;  %v2398_v47 = vor.u32 %v2397_v53, %v2393_v30 }
 0x1c3   : > { %v1920_v11 = vadd.f32 %v1919_v5, %v1687_v39 }
 0x1c5   : > { %v5105_v54 = vadd.f32 %v2008_v55, %v1920_v11  ;;  %v2400_v11 = vshll.u32 %v2299_v50, 16 }
 0x1c7   : > { %v2402_v51 = vrot.slane %v2400_v11, 1 }
 0x1c8   : > { %v1688_v7 = vpop.f32.mrf.mxu2  ;;  %v1921_v4 = vpop.f32.mrf.mxu3 }
 0x1c9   : > { %v1689_v32 = vadd.f32 %v1688_v7, %v1600_v37  ;;  %v1602_v20 = vpop.f32.mrf.mxu1  ;;  %v2013_v2 = vpop.f32.mrf.mxu0  ;;  %v5282_v37 = vld [vmem:[#allocation5_spill] sm:$0xff]  ;;  %v3873_v7 = vld [vmem:[%s4486_s8 + $0x80] sm:$0x1] }
 0x1ca   : > { %v1603_v56 = vadd.f32 %v1602_v20, %v5280_v29  ;;  %v2284_v50 = vunpack.c.l.b16 %v3873_v7 }
 0x1cb   : > { %v1922_v55 = vadd.f32 %v1921_v4, %v1689_v32 }
 0x1cc   : > { %2061 = vmatmul.bf16.gmra.mxu1 %v681_v35  ;;  %2989 = vmatmul.bf16.gmra.mxu0 %v2536_v22 }
 0x1cd   : > { %2811 = vmatmul.bf16.gmra.mxu2 %v4192_v1  ;;  %2900 = vmatmul.bf16.gmra.mxu3 %v2391_v13  ;;  %v5113_v0 = vadd.f32 %v2010_v18, %v1922_v55  ;;  %v5281_v1 = vld [vmem:[#allocation3_spill] sm:$0xff]  ;;  %v2537_v18 = vrot.slane %v4193_v34, 1  ;;  %v2403_v55 = vsel %vm451_vm0, %v2398_v47, %v2402_v51 }
 0x1ce   : > { %v683_v59 = vrot.slane %v5281_v1, 1 }
 0x1cf   : > { %v2539_v10 = vsel %vm660_vm1, %v2537_v18, %v2538_v28  ;;  %v4382_v18 = vld [vmem:[%s4486_s8 + $0x60] sm:$0xff] }
 0x1d0   : > { %v1691_v25 = vpop.f32.mrf.mxu2  ;;  %v1924_v5 = vpop.f32.mrf.mxu3  ;;  %v684_v13 = vsel %vm660_vm1, %v682_v48, %v683_v59  ;;  %v685_v28 = vrot.slane %v4382_v18, 1 }
 0x1d1   : > { %v1692_v39 = vadd.f32 %v1691_v25, %v1603_v56  ;;  %v1604_v31 = vpop.f32.mrf.mxu1  ;;  %v2015_v60 = vpop.f32.mrf.mxu0  ;;  %v2300_v56 = vpack.c.b16 %v2284_v50, %v2284_v50  ;;  %v2407_v25 = vshll.u32 %v4194_v3, 16 }
 0x1d2   : > { %v1605_v46 = vadd.f32 %v1604_v31, %v5282_v37 }
 0x1d3   : > { %v1925_v14 = vadd.f32 %v1924_v5, %v1692_v39  ;;  %v5283_v5 = vld [vmem:[#allocation7_spill] sm:$0xff]  ;;  %v2409_v48 = vrot.slane %v2407_v25, 1  ;;  %v2412_v1 = vshll.u32 %v2300_v56, 16  ;;  %v2541_v51 = vrot.slane %v2300_v56, 1 }
 0x1d5   : > { %v5118_v16 = vadd.f32 %v2013_v2, %v1925_v14  ;;  %v2414_v7 = vrot.slane %v2412_v1, 1 }
 0x1d8   : > { %v1693_v4 = vpop.f32.mrf.mxu2  ;;  %v1926_v32 = vpop.f32.mrf.mxu3 }
 0x1d9   : > { %v1694_v20 = vadd.f32 %v1693_v4, %v1605_v46  ;;  %v1607_v35 = vpop.f32.mrf.mxu1  ;;  %v2018_v22 = vpop.f32.mrf.mxu0  ;;  %v2410_v46 = vor.u32 %v2409_v48, %v2405_v43  ;;  %v5285_v4 = vld [vmem:[#allocation8_spill] sm:$0xff] }
 0x1da   : > { %v1608_v39 = vadd.f32 %v1607_v35, %v5283_v5 }
 0x1db   : > { %v1927_v2 = vadd.f32 %v1926_v32, %v1694_v20  ;;  %v3876_v20 = vld [vmem:[%s4486_s8 + $0x8c] sm:$0x1]  ;;  %v2415_v5 = vsel %vm451_vm0, %v2410_v46, %v2414_v7 }
 0x1dc   : > { %2066 = vmatmul.bf16.gmra.mxu1 %v684_v13  ;;  %2994 = vmatmul.bf16.gmra.mxu0 %v2539_v10  ;;  %v2285_v56 = vunpack.c.l.b16 %v3876_v20  ;;  %v3879_v20 = vld [vmem:[%s4486_s8 + $0x98] sm:$0x1] }
 0x1dd   : > { %2816 = vmatmul.bf16.gmra.mxu2 %v4193_v34  ;;  %2905 = vmatmul.bf16.gmra.mxu3 %v2403_v55  ;;  %v5126_v29 = vadd.f32 %v2015_v60, %v1927_v2  ;;  %v5284_v34 = vld [vmem:[#allocation6_spill] sm:$0xff]  ;;  %v2540_v60 = vrot.slane %v4194_v3, 1 }
 0x1de   : > { %v686_v47 = vrot.slane %v5284_v34, 1 }
 0x1df   : > { %v2542_v25 = vsel %vm660_vm1, %v2540_v60, %v2541_v51  ;;  %v5286_v51 = vld [vmem:[#allocation9_spill] sm:$0xff] }
 0x1e0   : > { %v1696_v31 = vpop.f32.mrf.mxu2  ;;  %v1929_v30 = vpop.f32.mrf.mxu3  ;;  %v687_v2 = vsel %vm660_vm1, %v685_v28, %v686_v47  ;;  %v4383_v47 = vld [vmem:[%s4486_s8 + $0x6c] sm:$0xff]  ;;  %v689_v46 = vrot.slane %v5286_v51, 1 }
 0x1e1   : > { %v1697_v53 = vadd.f32 %v1696_v31, %v1608_v39  ;;  %v1609_v11 = vpop.f32.mrf.mxu1  ;;  %v2020_v14 = vpop.f32.mrf.mxu0  ;;  %v4195_v39 = vld [vmem:[%s4486_s8 + $0x84] sm:$0xff]  ;;  %v688_v60 = vrot.slane %v4383_v47, 1 }
 0x1e2   : > { %v1610_v32 = vadd.f32 %v1609_v11, %v5285_v4 }
 0x1e3   : > { %v1930_v59 = vadd.f32 %v1929_v30, %v1697_v53  ;;  %v2301_v30 = vpack.c.b16 %v2285_v56, %v2285_v56  ;;  %v2419_v53 = vshll.u32 %v4195_v39, 16  ;;  %v690_v56 = vsel %vm660_vm1, %v688_v60, %v689_v46 }
 0x1e5   : > { %v5131_v37 = vadd.f32 %v2018_v22, %v1930_v59  ;;  %v2417_v59 = vshrl.u32 %v4195_v39, 16  ;;  %v2421_v18 = vrot.slane %v2419_v53, 1  ;;  %v2424_v28 = vshll.u32 %v2301_v30, 16 }
 0x1e6   : > { %v2544_v7 = vrot.slane %v2301_v30, 1  ;;  %v2286_v30 = vunpack.c.l.b16 %v3879_v20 }
 0x1e7   : > { %v2426_v4 = vrot.slane %v2424_v28, 1 }
 0x1e8   : > { %v1698_v35 = vpop.f32.mrf.mxu2  ;;  %v1931_v13 = vpop.f32.mrf.mxu3 }
 0x1e9   : > { %v1699_v10 = vadd.f32 %v1698_v35, %v1610_v32  ;;  %v2032_v55 = vpop.f32.mrf.mxu1  ;;  %v2960_v50 = vpop.f32.mrf.mxu0 }
 0x1eb   : > { %v1932_v22 = vadd.f32 %v1931_v13, %v1699_v10  ;;  %v2033_v10 = vadd.f32 %v2032_v55, %v4891_v52  ;;  %v2302_v52 = vpack.c.b16 %v2286_v30, %v2286_v30 }
 0x1ec   : > { %2071 = vmatmul.bf16.gmra.mxu1 %v687_v2  ;;  %2999 = vmatmul.bf16.gmra.mxu0 %v2542_v25 }
 0x1ed   : > { %2821 = vmatmul.bf16.gmra.mxu2 %v4194_v3  ;;  %2910 = vmatmul.bf16.gmra.mxu3 %v2415_v5  ;;  %v5139_v31 = vadd.f32 %v2020_v14, %v1932_v22  ;;  %v2543_v3 = vrot.slane %v4195_v39, 1  ;;  %v2422_v14 = vor.u32 %v2421_v18, %v2417_v59  ;;  %v5287_v59 = vld [vmem:[#allocation11_spill] sm:$0xff]  ;;  %v2547_v30 = vrot.slane %v2302_v52, 1 }
 0x1ef   : > { %v2545_v22 = vsel %vm660_vm1, %v2543_v3, %v2544_v7  ;;  %v2427_v53 = vsel %vm451_vm0, %v2422_v14, %v2426_v4 }
 0x1f0   : > { %v2782_v11 = vpop.f32.mrf.mxu2  ;;  %v2871_v43 = vpop.f32.mrf.mxu3 }
 0x1f1   : > { %v2034_v48 = vpop.f32.mrf.mxu1  ;;  %v2962_v1 = vpop.f32.mrf.mxu0  ;;  %v2872_v34 = vadd.f32 %v2871_v43, %v2782_v11  ;;  %v4196_v11 = vld [vmem:[%s4486_s8 + $0x90] sm:$0xff] }
 0x1f2   : > { %v2035_v18 = vadd.f32 %v2034_v48, %v5287_v59  ;;  %v2431_v55 = vshll.u32 %v4196_v11, 16  ;;  %v2429_v14 = vshrl.u32 %v4196_v11, 16 }
 0x1f3   : > { %v2961_v32 = vadd.f32 %v2960_v50, %v2872_v34 }
 0x1f4   : > { %v2433_v4 = vrot.slane %v2431_v55, 1 }
 0x1f5   : > { %v3040_v43 = vadd.f32 %v2961_v32, %v2033_v10  ;;  %v2436_v32 = vshll.u32 %v2302_v52, 16 }
 0x1f7   : > { %v3173_v34 = vmul.f32 %v3040_v43, %v3040_v43  ;;  %v2438_v59 = vrot.slane %v2436_v32, 1 }
 0x1f8   : > { %v2784_v35 = vpop.f32.mrf.mxu2  ;;  %v2873_v13 = vpop.f32.mrf.mxu3 }
 0x1f9   : > { %v2874_v2 = vadd.f32 %v2873_v13, %v2784_v35  ;;  %v2037_v25 = vpop.f32.mrf.mxu1  ;;  %v2965_v5 = vpop.f32.mrf.mxu0  ;;  %v4384_v13 = vld [vmem:[%s4486_s8 + $0x78] sm:$0xff] }
 0x1fa   : > { %v2038_v20 = vadd.f32 %v2037_v25, %v4909_v33  ;;  %v691_v10 = vrot.slane %v4384_v13, 1 }
 0x1fb   : > { %v2963_v50 = vadd.f32 %v2962_v1, %v2874_v2 }
 0x1fc   : > { %2076 = vmatmul.bf16.gmra.mxu1 %v690_v56  ;;  %3004 = vmatmul.bf16.gmra.mxu0 %v2545_v22  ;;  %v5288_v56 = vld [vmem:[#allocation10_spill] sm:$0xff] }
 0x1fd   : > { %v3041_v28 = vadd.f32 %v2963_v50, %v2035_v18  ;;  %2826 = vmatmul.bf16.gmra.mxu2 %v4195_v39  ;;  %2915 = vmatmul.bf16.gmra.mxu3 %v2427_v53  ;;  %v692_v22 = vrot.slane %v5288_v56, 1  ;;  %v2546_v53 = vrot.slane %v4196_v11, 1 }
 0x1ff   : > { %v4229_v47 = vpack.c.bf16 %v3041_v28, %v3040_v43  ;;  %v3136_v60 = vadd.f32 %v3041_v28, %v3040_v43  ;;  %v3174_v48 = vmul.f32 %v3041_v28, %v3041_v28  ;;  %v2434_v43 = vor.u32 %v2433_v4, %v2429_v14  ;;  %v3882_v28 = vld [vmem:[%s4486_s8 + $0xa4] sm:$0x1] }
 0x200   : > { %v2787_v51 = vpop.f32.mrf.mxu2  ;;  %v2876_v1 = vpop.f32.mrf.mxu3  ;;  %v693_v25 = vsel %vm660_vm1, %v691_v10, %v692_v22  ;;  %v2287_v52 = vunpack.c.l.b16 %v3882_v28 }
 0x201   : > { %4230 = vst [vmem:[%s5154_s7] sm:$0xff] %v4229_v47   ;;  %v3205_v46 = vadd.f32 %v3174_v48, %v3173_v34  ;;  %v2877_v3 = vadd.f32 %v2876_v1, %v2787_v51  ;;  %v2039_v39 = vpop.f32.mrf.mxu1  ;;  %v2967_v7 = vpop.f32.mrf.mxu0  ;;  %v2439_v1 = vsel %vm451_vm0, %v2434_v43, %v2438_v59 }
 0x202   : > { %v2040_v14 = vadd.f32 %v2039_v39, %v4927_v6 }
 0x203   : > { %v2966_v35 = vadd.f32 %v2965_v5, %v2877_v3  ;;  %v2548_v5 = vsel %vm660_vm1, %v2546_v53, %v2547_v30  ;;  %v4197_v3 = vld [vmem:[%s4486_s8 + $0x9c] sm:$0xff] }
 0x204   : > { %v2443_v32 = vshll.u32 %v4197_v3, 16  ;;  %v2441_v6 = vshrl.u32 %v4197_v3, 16 }
 0x205   : > { %v3042_v2 = vadd.f32 %v2966_v35, %v2038_v20 }
 0x206   : > { %v2445_v39 = vrot.slane %v2443_v32, 1 }
 0x207   : > { %v3137_v18 = vadd.f32 %v3136_v60, %v3042_v2  ;;  %v3175_v50 = vmul.f32 %v3042_v2, %v3042_v2 }
 0x208   : > { %v2789_v34 = vpop.f32.mrf.mxu2  ;;  %v2878_v47 = vpop.f32.mrf.mxu3 }
 0x209   : > { %v3206_v55 = vadd.f32 %v3205_v46, %v3175_v50  ;;  %v2879_v48 = vadd.f32 %v2878_v47, %v2789_v34  ;;  %v2042_v51 = vpop.f32.mrf.mxu1  ;;  %v2970_v33 = vpop.f32.mrf.mxu0  ;;  %v2303_v46 = vpack.c.b16 %v2287_v52, %v2287_v52  ;;  %v4385_v50 = vld [vmem:[%s4486_s8 + $0x84] sm:$0xff] }
 0x20a   : > { %v694_v28 = vrot.slane %v4385_v50, 1 }
 0x20b   : > { %v2968_v60 = vadd.f32 %v2967_v7, %v2879_v48  ;;  %v2448_v7 = vshll.u32 %v2303_v46, 16  ;;  %v2550_v47 = vrot.slane %v2303_v46, 1  ;;  %v2446_v48 = vor.u32 %v2445_v39, %v2441_v6 }
 0x20c   : > { %2081 = vmatmul.bf16.gmra.mxu1 %v693_v25  ;;  %3009 = vmatmul.bf16.gmra.mxu0 %v2548_v5 }
 0x20d   : > { %v3043_v4 = vadd.f32 %v2968_v60, %v2040_v14  ;;  %2831 = vmatmul.bf16.gmra.mxu2 %v4196_v11  ;;  %2920 = vmatmul.bf16.gmra.mxu3 %v2439_v1  ;;  %v2043_v11 = vadd.f32 %v2042_v51, %v4939_v24  ;;  %v3885_v1 = vld [vmem:[%s4486_s8 + $0xb0] sm:$0x1] }
 0x20e   : > { %v2288_v46 = vunpack.c.l.b16 %v3885_v1 }
 0x20f   : > { %v4234_v20 = vpack.c.bf16 %v3043_v4, %v3042_v2  ;;  %v3138_v35 = vadd.f32 %v3137_v18, %v3043_v4  ;;  %v3176_v13 = vmul.f32 %v3043_v4, %v3043_v4  ;;  %v695_v2 = vrot.slane %v4919_v57, 1 }
 0x210   : > { %v2792_v10 = vpop.f32.mrf.mxu2  ;;  %v2881_v56 = vpop.f32.mrf.mxu3  ;;  %v2549_v18 = vrot.slane %v4197_v3, 1 }
 0x211   : > { %4306 = vst [vmem:[%s5154_s7 + $0x8] sm:$0xff] %v4234_v20   ;;  %v3207_v22 = vadd.f32 %v3206_v55, %v3176_v13  ;;  %v2882_v53 = vadd.f32 %v2881_v56, %v2792_v10  ;;  %v2044_v30 = vpop.f32.mrf.mxu1  ;;  %v2972_v43 = vpop.f32.mrf.mxu0  ;;  %v2450_v55 = vrot.slane %v2448_v7, 1  ;;  %v696_v51 = vsel %vm660_vm1, %v694_v28, %v695_v2  ;;  %v4198_v20 = vld [vmem:[%s4486_s8 + $0xa8] sm:$0xff] }
 0x212   : > { %v2045_v13 = vadd.f32 %v2044_v30, %v4951_v9  ;;  %v2304_v56 = vpack.c.b16 %v2288_v46, %v2288_v46  ;;  %v2453_v9 = vshrl.u32 %v4198_v20, 16 }
 0x213   : > { %v2971_v59 = vadd.f32 %v2970_v33, %v2882_v53  ;;  %v2551_v33 = vsel %vm660_vm1, %v2549_v18, %v2550_v47  ;;  %v2451_v57 = vsel %vm451_vm0, %v2446_v48, %v2450_v55  ;;  %v4386_v47 = vld [vmem:[%s4486_s8 + $0x90] sm:$0xff] }
 0x214   : > { %v697_v48 = vrot.slane %v4386_v47, 1  ;;  %v2553_v1 = vrot.slane %v2304_v56, 1 }
 0x215   : > { %v3044_v34 = vadd.f32 %v2971_v59, %v2043_v11 }
 0x217   : > { %v3139_v25 = vadd.f32 %v3138_v35, %v3044_v34  ;;  %v3177_v5 = vmul.f32 %v3044_v34, %v3044_v34 }
 0x218   : > { %v2794_v52 = vpop.f32.mrf.mxu2  ;;  %v2883_v14 = vpop.f32.mrf.mxu3 }
 0x219   : > { %v3208_v60 = vadd.f32 %v3207_v22, %v3177_v5  ;;  %v2884_v4 = vadd.f32 %v2883_v14, %v2794_v52  ;;  %v2047_v32 = vpop.f32.mrf.mxu1  ;;  %v2975_v24 = vpop.f32.mrf.mxu0  ;;  %v2455_v22 = vshll.u32 %v4198_v20, 16  ;;  %v2552_v5 = vrot.slane %v4198_v20, 1 }
 0x21b   : > { %v2973_v35 = vadd.f32 %v2972_v43, %v2884_v4  ;;  %v2457_v30 = vrot.slane %v2455_v22, 1  ;;  %v2460_v43 = vshll.u32 %v2304_v56, 16  ;;  %v4199_v22 = vld [vmem:[%s4486_s8 + $0xb4] sm:$0xff] }
 0x21c   : > { %2086 = vmatmul.bf16.gmra.mxu1 %v696_v51  ;;  %3014 = vmatmul.bf16.gmra.mxu0 %v2551_v33  ;;  %v3888_v51 = vld [vmem:[%s4486_s8 + $0xbc] sm:$0x1] }
 0x21d   : > { %v3045_v10 = vadd.f32 %v2973_v35, %v2045_v13  ;;  %2836 = vmatmul.bf16.gmra.mxu2 %v4197_v3  ;;  %2925 = vmatmul.bf16.gmra.mxu3 %v2451_v57  ;;  %v2048_v3 = vadd.f32 %v2047_v32, %v4956_v40  ;;  %v2458_v52 = vor.u32 %v2457_v30, %v2453_v9  ;;  %v2462_v14 = vrot.slane %v2460_v43, 1 }
 0x21e   : > { %v2289_v56 = vunpack.c.l.b16 %v3888_v51 }
 0x21f   : > { %v4239_v53 = vpack.c.bf16 %v3045_v10, %v3044_v34  ;;  %v3140_v6 = vadd.f32 %v3139_v25, %v3045_v10  ;;  %v3178_v39 = vmul.f32 %v3045_v10, %v3045_v10  ;;  %v5289_v34 = vld [vmem:[#allocation12_spill] sm:$0xff]  ;;  %v2463_v10 = vsel %vm451_vm0, %v2458_v52, %v2462_v14 }
 0x220   : > { %v2797_v7 = vpop.f32.mrf.mxu2  ;;  %v2886_v11 = vpop.f32.mrf.mxu3  ;;  %v698_v25 = vrot.slane %v5289_v34, 1  ;;  %v2555_v52 = vrot.slane %v4199_v22, 1 }
 0x221   : > { %4307 = vst [vmem:[%s5154_s7 + $0x10] sm:$0xff] %v4239_v53   ;;  %v3209_v59 = vadd.f32 %v3208_v60, %v3178_v39  ;;  %v2887_v50 = vadd.f32 %v2886_v11, %v2797_v7  ;;  %v2049_v28 = vpop.f32.mrf.mxu1  ;;  %v2977_v2 = vpop.f32.mrf.mxu0  ;;  %v2305_v7 = vpack.c.b16 %v2289_v56, %v2289_v56  ;;  %v2467_v11 = vshll.u32 %v4199_v22, 16  ;;  %v4200_v56 = vld [vmem:[%s4486_s8 + $0xc0] sm:$0xff] }
 0x222   : > { %v699_v32 = vsel %vm660_vm1, %v697_v48, %v698_v25  ;;  %v2050_v53 = vadd.f32 %v2049_v28, %v4972_v58  ;;  %v2465_v58 = vshrl.u32 %v4199_v22, 16  ;;  %v4387_v25 = vld [vmem:[%s4486_s8 + $0x9c] sm:$0xff] }
 0x223   : > { %v2976_v18 = vadd.f32 %v2975_v24, %v2887_v50  ;;  %v2554_v24 = vsel %vm660_vm1, %v2552_v5, %v2553_v1  ;;  %v2469_v28 = vrot.slane %v2467_v11, 1  ;;  %v700_v5 = vrot.slane %v4387_v25, 1 }
 0x224   : > { %v2556_v14 = vrot.slane %v2305_v7, 1 }
 0x225   : > { %v3046_v55 = vadd.f32 %v2976_v18, %v2048_v3 }
 0x227   : > { %v3141_v60 = vadd.f32 %v3140_v6, %v3046_v55  ;;  %v3179_v4 = vmul.f32 %v3046_v55, %v3046_v55 }
 0x228   : > { %v2799_v33 = vpop.f32.mrf.mxu2  ;;  %v2888_v57 = vpop.f32.mrf.mxu3 }
 0x229   : > { %v3210_v46 = vadd.f32 %v3209_v59, %v3179_v4  ;;  %v2889_v13 = vadd.f32 %v2888_v57, %v2799_v33  ;;  %v2052_v35 = vpop.f32.mrf.mxu1  ;;  %v2980_v40 = vpop.f32.mrf.mxu0  ;;  %v3891_v57 = vld [vmem:[%s4486_s8 + $0xc8] sm:$0x1] }
 0x22b   : > { %v2978_v6 = vadd.f32 %v2977_v2, %v2889_v13  ;;  %v2472_v2 = vshll.u32 %v2305_v7, 16 }
 0x22c   : > { %2091 = vmatmul.bf16.gmra.mxu1 %v699_v32  ;;  %3019 = vmatmul.bf16.gmra.mxu0 %v2554_v24 }
 0x22d   : > { %v3047_v39 = vadd.f32 %v2978_v6, %v2050_v53  ;;  %2841 = vmatmul.bf16.gmra.mxu2 %v4198_v20  ;;  %2930 = vmatmul.bf16.gmra.mxu3 %v2463_v10  ;;  %v2053_v20 = vadd.f32 %v2052_v35, %v4983_v61  ;;  %v2474_v4 = vrot.slane %v2472_v2, 1  ;;  %v2290_v53 = vunpack.c.l.b16 %v3891_v57  ;;  %v3894_v57 = vld [vmem:[%s4486_s8 + $0xd4] sm:$0x1] }
 0x22f   : > { %v4244_v59 = vpack.c.bf16 %v3047_v39, %v3046_v55  ;;  %v3142_v50 = vadd.f32 %v3141_v60, %v3047_v39  ;;  %v3180_v9 = vmul.f32 %v3047_v39, %v3047_v39  ;;  %v701_v55 = vrot.slane %v4964_v27, 1 }
 0x230   : > { %v2802_v30 = vpop.f32.mrf.mxu2  ;;  %v2891_v43 = vpop.f32.mrf.mxu3  ;;  %v2470_v60 = vor.u32 %v2469_v28, %v2465_v58  ;;  %v2306_v11 = vpack.c.b16 %v2290_v53, %v2290_v53  ;;  %v2291_v53 = vunpack.c.l.b16 %v3894_v57 }
 0x231   : > { %4308 = vst [vmem:[%s5154_s7 + $0x18] sm:$0xff] %v4244_v59   ;;  %v3211_v3 = vadd.f32 %v3210_v46, %v3180_v9  ;;  %v2892_v18 = vadd.f32 %v2891_v43, %v2802_v30  ;;  %v2054_v47 = vpop.f32.mrf.mxu1  ;;  %v2982_v48 = vpop.f32.mrf.mxu0  ;;  %v702_v35 = vsel %vm660_vm1, %v700_v5, %v701_v55  ;;  %v2479_v59 = vshll.u32 %v4200_v56, 16 }
 0x232   : > { %v2475_v27 = vsel %vm451_vm0, %v2470_v60, %v2474_v4  ;;  %v2055_v6 = vadd.f32 %v2054_v47, %v4994_v21  ;;  %v2477_v21 = vshrl.u32 %v4200_v56, 16 }
 0x233   : > { %v2981_v34 = vadd.f32 %v2980_v40, %v2892_v18  ;;  %v2557_v40 = vsel %vm660_vm1, %v2555_v52, %v2556_v14  ;;  %v2481_v47 = vrot.slane %v2479_v59, 1  ;;  %v2558_v52 = vrot.slane %v4200_v56, 1 }
 0x234   : > { %v2559_v14 = vrot.slane %v2306_v11, 1 }
 0x235   : > { %v3048_v1 = vadd.f32 %v2981_v34, %v2053_v20  ;;  %v4388_v34 = vld [vmem:[%s4486_s8 + $0xa8] sm:$0xff]  ;;  %v2482_v60 = vor.u32 %v2481_v47, %v2477_v21 }
 0x236   : > { %v703_v25 = vrot.slane %v4388_v34, 1 }
 0x237   : > { %v3143_v51 = vadd.f32 %v3142_v50, %v3048_v1  ;;  %v3181_v33 = vmul.f32 %v3048_v1, %v3048_v1 }
 0x238   : > { %v2804_v46 = vpop.f32.mrf.mxu2  ;;  %v2893_v13 = vpop.f32.mrf.mxu3 }
 0x239   : > { %v3212_v32 = vadd.f32 %v3211_v3, %v3181_v33  ;;  %v2894_v24 = vadd.f32 %v2893_v13, %v2804_v46  ;;  %v2057_v10 = vpop.f32.mrf.mxu1  ;;  %v2985_v61 = vpop.f32.mrf.mxu0 }
 0x23b   : > { %v2983_v39 = vadd.f32 %v2982_v48, %v2894_v24  ;;  %v2484_v48 = vshll.u32 %v2306_v11, 16  ;;  %v2307_v11 = vpack.c.b16 %v2291_v53, %v2291_v53 }
 0x23c   : > { %2096 = vmatmul.bf16.gmra.mxu1 %v702_v35  ;;  %3024 = vmatmul.bf16.gmra.mxu0 %v2557_v40 }
 0x23d   : > { %v3049_v7 = vadd.f32 %v2983_v39, %v2055_v6  ;;  %2846 = vmatmul.bf16.gmra.mxu2 %v4199_v22  ;;  %2935 = vmatmul.bf16.gmra.mxu3 %v2475_v27  ;;  %v2058_v22 = vadd.f32 %v2057_v10, %v4999_v44  ;;  %v2486_v4 = vrot.slane %v2484_v48, 1  ;;  %v4201_v27 = vld [vmem:[%s4486_s8 + $0xcc] sm:$0xff] }
 0x23e   : > { %v2491_v59 = vshll.u32 %v4201_v27, 16 }
 0x23f   : > { %v4249_v50 = vpack.c.bf16 %v3049_v7, %v3048_v1  ;;  %v3144_v9 = vadd.f32 %v3143_v51, %v3049_v7  ;;  %v3182_v30 = vmul.f32 %v3049_v7, %v3049_v7  ;;  %v5290_v1 = vld [vmem:[#allocation13_spill] sm:$0xff]  ;;  %v2487_v40 = vsel %vm451_vm0, %v2482_v60, %v2486_v4 }
 0x240   : > { %v2807_v43 = vpop.f32.mrf.mxu2  ;;  %v2896_v3 = vpop.f32.mrf.mxu3  ;;  %v704_v55 = vrot.slane %v5290_v1, 1  ;;  %v2561_v1 = vrot.slane %v4201_v27, 1 }
 0x241   : > { %4309 = vst [vmem:[%s5154_s7 + $0x20] sm:$0xff] %v4249_v50   ;;  %v3213_v18 = vadd.f32 %v3212_v32, %v3182_v30  ;;  %v2897_v58 = vadd.f32 %v2896_v3, %v2807_v43  ;;  %v2059_v28 = vpop.f32.mrf.mxu1  ;;  %v2987_v2 = vpop.f32.mrf.mxu0 }
 0x242   : > { %v705_v10 = vsel %vm660_vm1, %v703_v25, %v704_v55  ;;  %v2060_v6 = vadd.f32 %v2059_v28, %v5010_v17  ;;  %v2489_v17 = vshrl.u32 %v4201_v27, 16  ;;  %v2493_v28 = vrot.slane %v2491_v59, 1  ;;  %v5291_v25 = vld [vmem:[#allocation14_spill] sm:$0xff] }
 0x243   : > { %v2986_v20 = vadd.f32 %v2985_v61, %v2897_v58  ;;  %v2560_v61 = vsel %vm660_vm1, %v2558_v52, %v2559_v14  ;;  %v2562_v55 = vrot.slane %v2307_v11, 1 }
 0x244   : > { %v2494_v52 = vor.u32 %v2493_v28, %v2489_v17 }
 0x245   : > { %v3050_v5 = vadd.f32 %v2986_v20, %v2058_v22  ;;  %v4389_v22 = vld [vmem:[%s4486_s8 + $0xb4] sm:$0xff]  ;;  %s3430_s8 = sshll.u32 %s5297_s12, 1 }
 0x246   : > { %v706_v20 = vrot.slane %v4389_v22, 1  ;;  %s254_s11 = scalar_lea.vmem %s5258_s3, %s3430_s8 }
 0x247   : > { %v3145_v51 = vadd.f32 %v3144_v9, %v3050_v5  ;;  %v3183_v33 = vmul.f32 %v3050_v5, %v3050_v5 }
 0x248   : > { %v2809_v46 = vpop.f32.mrf.mxu2  ;;  %v2898_v13 = vpop.f32.mrf.mxu3 }
 0x249   : > { %v3214_v32 = vadd.f32 %v3213_v18, %v3183_v33  ;;  %v2899_v24 = vadd.f32 %v2898_v13, %v2809_v46  ;;  %v2062_v35 = vpop.f32.mrf.mxu1  ;;  %v2990_v44 = vpop.f32.mrf.mxu0 }
 0x24a   : > { %v2063_v48 = vadd.f32 %v2062_v35, %v5014_v45 }
 0x24b   : > { %v2988_v39 = vadd.f32 %v2987_v2, %v2899_v24  ;;  %v2496_v2 = vshll.u32 %v2307_v11, 16  ;;  %v2563_v24 = vsel %vm660_vm1, %v2561_v1, %v2562_v55 }
 0x24c   : > { %2101 = vmatmul.bf16.gmra.mxu1 %v705_v10  ;;  %3029 = vmatmul.bf16.gmra.mxu0 %v2560_v61 }
 0x24d   : > { %v3051_v7 = vadd.f32 %v2988_v39, %v2060_v6  ;;  %2851 = vmatmul.bf16.gmra.mxu2 %v4200_v56  ;;  %2940 = vmatmul.bf16.gmra.mxu3 %v2487_v40  ;;  %v2498_v14 = vrot.slane %v2496_v2, 1 }
 0x24f   : > { %v4254_v50 = vpack.c.bf16 %v3051_v7, %v3050_v5  ;;  %v3146_v9 = vadd.f32 %v3145_v51, %v3051_v7  ;;  %v3184_v30 = vmul.f32 %v3051_v7, %v3051_v7  ;;  %v707_v5 = vrot.slane %v5291_v25, 1 }
 0x250   : > { %v2812_v43 = vpop.f32.mrf.mxu2  ;;  %v2901_v3 = vpop.f32.mrf.mxu3  ;;  %v2499_v35 = vsel %vm451_vm0, %v2494_v52, %v2498_v14 }
 0x251   : > { %4310 = vst [vmem:[%s5154_s7 + $0x28] sm:$0xff] %v4254_v50   ;;  %v3215_v18 = vadd.f32 %v3214_v32, %v3184_v30  ;;  %v2902_v58 = vadd.f32 %v2901_v3, %v2812_v43  ;;  %v2064_v21 = vpop.f32.mrf.mxu1  ;;  %v2992_v47 = vpop.f32.mrf.mxu0  ;;  %v708_v45 = vsel %vm660_vm1, %v706_v20, %v707_v5 }
 0x253   : > { %v2991_v56 = vadd.f32 %v2990_v44, %v2902_v58  ;;  %v2065_v44 = vadd.f32 %v2064_v21, %v5022_v8 }
 0x255   : > { %v3052_v34 = vadd.f32 %v2991_v56, %v2063_v48 }
 0x257   : > { %v3147_v60 = vadd.f32 %v3146_v9, %v3052_v34  ;;  %v3185_v4 = vmul.f32 %v3052_v34, %v3052_v34 }
 0x258   : > { %v2814_v51 = vpop.f32.mrf.mxu2  ;;  %v2903_v33 = vpop.f32.mrf.mxu3 }
 0x259   : > { %v3216_v57 = vadd.f32 %v3215_v18, %v3185_v4  ;;  %v2904_v46 = vadd.f32 %v2903_v33, %v2814_v51  ;;  %v2067_v13 = vpop.f32.mrf.mxu1  ;;  %v2995_v32 = vpop.f32.mrf.mxu0 }
 0x25a   : > { %v2068_v30 = vadd.f32 %v2067_v13, %v5027_v26 }
 0x25b   : > { %v2993_v10 = vadd.f32 %v2992_v47, %v2904_v46 }
 0x25c   : > { %2106 = vmatmul.bf16.gmra.mxu1 %v708_v45  ;;  %3034 = vmatmul.bf16.gmra.mxu0 %v2563_v24 }
 0x25d   : > { %v3053_v61 = vadd.f32 %v2993_v10, %v2065_v44  ;;  %2856 = vmatmul.bf16.gmra.mxu2 %v4201_v27  ;;  %2945 = vmatmul.bf16.gmra.mxu3 %v2499_v35 }
 0x25f   : > { %v4259_v40 = vpack.c.bf16 %v3053_v61, %v3052_v34  ;;  %v3148_v53 = vadd.f32 %v3147_v60, %v3053_v61  ;;  %v3186_v6 = vmul.f32 %v3053_v61, %v3053_v61 }
 0x260   : > { %v2817_v39 = vpop.f32.mrf.mxu2  ;;  %v2906_v7 = vpop.f32.mrf.mxu3 }
 0x261   : > { %4311 = vst [vmem:[%s5154_s7 + $0x30] sm:$0xff] %v4259_v40   ;;  %v3217_v11 = vadd.f32 %v3216_v57, %v3186_v6  ;;  %v2907_v59 = vadd.f32 %v2906_v7, %v2817_v39  ;;  %v2069_v50 = vpop.f32.mrf.mxu1  ;;  %v2997_v9 = vpop.f32.mrf.mxu0 }
 0x262   : > { %v2070_v2 = vadd.f32 %v2069_v50, %v5035_v23 }
 0x263   : > { %v2996_v43 = vadd.f32 %v2995_v32, %v2907_v59 }
 0x265   : > { %v3054_v8 = vadd.f32 %v2996_v43, %v2068_v30 }
 0x267   : > { %v3149_v3 = vadd.f32 %v3148_v53, %v3054_v8  ;;  %v3187_v18 = vmul.f32 %v3054_v8, %v3054_v8 }
 0x268   : > { %v2819_v58 = vpop.f32.mrf.mxu2  ;;  %v2908_v27 = vpop.f32.mrf.mxu3 }
 0x269   : > { %v3218_v21 = vadd.f32 %v3217_v11, %v3187_v18  ;;  %v2909_v47 = vadd.f32 %v2908_v27, %v2819_v58  ;;  %v2072_v17 = vpop.f32.mrf.mxu1  ;;  %v3000_v28 = vpop.f32.mrf.mxu0 }
 0x26a   : > { %v2073_v14 = vadd.f32 %v2072_v17, %v5040_v41 }
 0x26b   : > { %v2998_v48 = vadd.f32 %v2997_v9, %v2909_v47 }
 0x26d   : > { %v3055_v56 = vadd.f32 %v2998_v48, %v2070_v2 }
 0x26f   : > { %v4264_v22 = vpack.c.bf16 %v3055_v56, %v3054_v8  ;;  %v3150_v20 = vadd.f32 %v3149_v3, %v3055_v56  ;;  %v3188_v34 = vmul.f32 %v3055_v56, %v3055_v56 }
 0x270   : > { %v2822_v25 = vpop.f32.mrf.mxu2  ;;  %v2911_v26 = vpop.f32.mrf.mxu3 }
 0x271   : > { %4312 = vst [vmem:[%s5154_s7 + $0x38] sm:$0xff] %v4264_v22   ;;  %v3219_v5 = vadd.f32 %v3218_v21, %v3188_v34  ;;  %v2912_v1 = vadd.f32 %v2911_v26, %v2822_v25  ;;  %v2074_v55 = vpop.f32.mrf.mxu1  ;;  %v3002_v52 = vpop.f32.mrf.mxu0 }
 0x272   : > { %v2075_v24 = vadd.f32 %v2074_v55, %v5048_v62 }
 0x273   : > { %v3001_v60 = vadd.f32 %v3000_v28, %v2912_v1 }
 0x275   : > { %v3056_v4 = vadd.f32 %v3001_v60, %v2073_v14 }
 0x277   : > { %v3151_v51 = vadd.f32 %v3150_v20, %v3056_v4  ;;  %v3189_v33 = vmul.f32 %v3056_v4, %v3056_v4 }
 0x278   : > { %v2824_v23 = vpop.f32.mrf.mxu2  ;;  %v2913_v57 = vpop.f32.mrf.mxu3 }
 0x279   : > { %v3220_v46 = vadd.f32 %v3219_v5, %v3189_v33  ;;  %v2914_v13 = vadd.f32 %v2913_v57, %v2824_v23  ;;  %v2077_v32 = vpop.f32.mrf.mxu1  ;;  %v3005_v45 = vpop.f32.mrf.mxu0 }
 0x27a   : > { %v2078_v59 = vadd.f32 %v2077_v32, %v5053_v19 }
 0x27b   : > { %v3003_v35 = vadd.f32 %v3002_v52, %v2914_v13 }
 0x27d   : > { %v3057_v44 = vadd.f32 %v3003_v35, %v2075_v24 }
 0x27f   : > { %v4269_v10 = vpack.c.bf16 %v3057_v44, %v3056_v4  ;;  %v3152_v61 = vadd.f32 %v3151_v51, %v3057_v44  ;;  %v3190_v40 = vmul.f32 %v3057_v44, %v3057_v44 }
 0x280   : > { %v2827_v53 = vpop.f32.mrf.mxu2  ;;  %v2916_v41 = vpop.f32.mrf.mxu3 }
 0x281   : > { %4313 = vst [vmem:[%s5154_s7 + $0x40] sm:$0xff] %v4269_v10   ;;  %v3221_v6 = vadd.f32 %v3220_v46, %v3190_v40  ;;  %v2917_v39 = vadd.f32 %v2916_v41, %v2827_v53  ;;  %v2079_v7 = vpop.f32.mrf.mxu1  ;;  %v3007_v11 = vpop.f32.mrf.mxu0 }
 0x282   : > { %v2080_v21 = vadd.f32 %v2079_v7, %v5061_v42 }
 0x283   : > { %v3006_v50 = vadd.f32 %v3005_v45, %v2917_v39 }
 0x285   : > { %v3058_v9 = vadd.f32 %v3006_v50, %v2078_v59 }
 0x287   : > { %v3153_v30 = vadd.f32 %v3152_v61, %v3058_v9  ;;  %v3191_v43 = vmul.f32 %v3058_v9, %v3058_v9 }
 0x288   : > { %v2829_v62 = vpop.f32.mrf.mxu2  ;;  %v2918_v8 = vpop.f32.mrf.mxu3 }
 0x289   : > { %v3222_v3 = vadd.f32 %v3221_v6, %v3191_v43  ;;  %v2919_v18 = vadd.f32 %v2918_v8, %v2829_v62  ;;  %v2082_v58 = vpop.f32.mrf.mxu1  ;;  %v3010_v27 = vpop.f32.mrf.mxu0 }
 0x28a   : > { %v2083_v26 = vadd.f32 %v2082_v58, %v5066_v15 }
 0x28b   : > { %v3008_v47 = vadd.f32 %v3007_v11, %v2919_v18 }
 0x28d   : > { %v3059_v17 = vadd.f32 %v3008_v47, %v2080_v21 }
 0x28f   : > { %v4274_v28 = vpack.c.bf16 %v3059_v17, %v3058_v9  ;;  %v3154_v2 = vadd.f32 %v3153_v30, %v3059_v17  ;;  %v3192_v48 = vmul.f32 %v3059_v17, %v3059_v17 }
 0x290   : > { %v2832_v56 = vpop.f32.mrf.mxu2  ;;  %v2921_v19 = vpop.f32.mrf.mxu3 }
 0x291   : > { %4314 = vst [vmem:[%s5154_s7 + $0x48] sm:$0xff] %v4274_v28   ;;  %v3223_v22 = vadd.f32 %v3222_v3, %v3192_v48  ;;  %v2922_v20 = vadd.f32 %v2921_v19, %v2832_v56  ;;  %v2084_v34 = vpop.f32.mrf.mxu1  ;;  %v3012_v25 = vpop.f32.mrf.mxu0 }
 0x292   : > { %v2085_v23 = vadd.f32 %v2084_v34, %v5074_v38 }
 0x293   : > { %v3011_v5 = vadd.f32 %v3010_v27, %v2922_v20 }
 0x295   : > { %v3060_v1 = vadd.f32 %v3011_v5, %v2083_v26 }
 0x297   : > { %v3155_v55 = vadd.f32 %v3154_v2, %v3060_v1  ;;  %v3193_v52 = vmul.f32 %v3060_v1, %v3060_v1 }
 0x298   : > { %v2834_v42 = vpop.f32.mrf.mxu2  ;;  %v2923_v14 = vpop.f32.mrf.mxu3 }
 0x299   : > { %v3224_v60 = vadd.f32 %v3223_v22, %v3193_v52  ;;  %v2924_v4 = vadd.f32 %v2923_v14, %v2834_v42  ;;  %v2087_v51 = vpop.f32.mrf.mxu1  ;;  %v3015_v33 = vpop.f32.mrf.mxu0 }
 0x29a   : > { %v2088_v40 = vadd.f32 %v2087_v51, %v5079_v36 }
 0x29b   : > { %v3013_v57 = vadd.f32 %v3012_v25, %v2924_v4 }
 0x29d   : > { %v3061_v46 = vadd.f32 %v3013_v57, %v2085_v23 }
 0x29f   : > { %v4279_v13 = vpack.c.bf16 %v3061_v46, %v3060_v1  ;;  %v3156_v32 = vadd.f32 %v3155_v55, %v3061_v46  ;;  %v3194_v45 = vmul.f32 %v3061_v46, %v3061_v46 }
 0x2a0   : > { %v2837_v24 = vpop.f32.mrf.mxu2  ;;  %v2926_v15 = vpop.f32.mrf.mxu3 }
 0x2a1   : > { %4315 = vst [vmem:[%s5154_s7 + $0x50] sm:$0xff] %v4279_v13   ;;  %v3225_v35 = vadd.f32 %v3224_v60, %v3194_v45  ;;  %v2927_v44 = vadd.f32 %v2926_v15, %v2837_v24  ;;  %v2089_v10 = vpop.f32.mrf.mxu1  ;;  %v3017_v61 = vpop.f32.mrf.mxu0 }
 0x2a2   : > { %v2090_v30 = vadd.f32 %v2089_v10, %v5087_v49 }
 0x2a3   : > { %v3016_v53 = vadd.f32 %v3015_v33, %v2927_v44 }
 0x2a5   : > { %v3062_v41 = vadd.f32 %v3016_v53, %v2088_v40 }
 0x2a7   : > { %v3157_v6 = vadd.f32 %v3156_v32, %v3062_v41  ;;  %v3195_v39 = vmul.f32 %v3062_v41, %v3062_v41 }
 0x2a8   : > { %v2839_v38 = vpop.f32.mrf.mxu2  ;;  %v2928_v7 = vpop.f32.mrf.mxu3 }
 0x2a9   : > { %v3226_v11 = vadd.f32 %v3225_v35, %v3195_v39  ;;  %v2929_v59 = vadd.f32 %v2928_v7, %v2839_v38  ;;  %v2092_v50 = vpop.f32.mrf.mxu1  ;;  %v3020_v9 = vpop.f32.mrf.mxu0 }
 0x2aa   : > { %v2093_v28 = vadd.f32 %v2092_v50, %v5092_v12 }
 0x2ab   : > { %v3018_v43 = vadd.f32 %v3017_v61, %v2929_v59 }
 0x2ad   : > { %v3063_v62 = vadd.f32 %v3018_v43, %v2090_v30 }
 0x2af   : > { %v4284_v8 = vpack.c.bf16 %v3063_v62, %v3062_v41  ;;  %v3158_v3 = vadd.f32 %v3157_v6, %v3063_v62  ;;  %v3196_v18 = vmul.f32 %v3063_v62, %v3063_v62 }
 0x2b0   : > { %v2842_v58 = vpop.f32.mrf.mxu2  ;;  %v2931_v36 = vpop.f32.mrf.mxu3 }
 0x2b1   : > { %4316 = vst [vmem:[%s5154_s7 + $0x58] sm:$0xff] %v4284_v8   ;;  %v3227_v27 = vadd.f32 %v3226_v11, %v3196_v18  ;;  %v2932_v21 = vadd.f32 %v2931_v36, %v2842_v58  ;;  %v2094_v47 = vpop.f32.mrf.mxu1  ;;  %v3022_v17 = vpop.f32.mrf.mxu0 }
 0x2b2   : > { %v2095_v5 = vadd.f32 %v2094_v47, %v5100_v63 }
 0x2b3   : > { %v3021_v2 = vadd.f32 %v3020_v9, %v2932_v21 }
 0x2b5   : > { %v3064_v48 = vadd.f32 %v3021_v2, %v2093_v28 }
 0x2b7   : > { %v3159_v56 = vadd.f32 %v3158_v3, %v3064_v48  ;;  %v3197_v19 = vmul.f32 %v3064_v48, %v3064_v48 }
 0x2b8   : > { %v2844_v49 = vpop.f32.mrf.mxu2  ;;  %v2933_v22 = vpop.f32.mrf.mxu3 }
 0x2b9   : > { %v3228_v20 = vadd.f32 %v3227_v27, %v3197_v19  ;;  %v2934_v34 = vadd.f32 %v2933_v22, %v2844_v49  ;;  %v2097_v25 = vpop.f32.mrf.mxu1  ;;  %v3025_v26 = vpop.f32.mrf.mxu0 }
 0x2ba   : > { %v2098_v57 = vadd.f32 %v2097_v25, %v5105_v54 }
 0x2bb   : > { %v3023_v1 = vadd.f32 %v3022_v17, %v2934_v34 }
 0x2bd   : > { %v3065_v55 = vadd.f32 %v3023_v1, %v2095_v5 }
 0x2bf   : > { %v4289_v52 = vpack.c.bf16 %v3065_v55, %v3064_v48  ;;  %v3160_v42 = vadd.f32 %v3159_v56, %v3065_v55  ;;  %v3198_v14 = vmul.f32 %v3065_v55, %v3065_v55 }
 0x2c0   : > { %v2847_v60 = vpop.f32.mrf.mxu2  ;;  %v2936_v12 = vpop.f32.mrf.mxu3 }
 0x2c1   : > { %4317 = vst [vmem:[%s5154_s7 + $0x60] sm:$0xff] %v4289_v52   ;;  %v3229_v4 = vadd.f32 %v3228_v20, %v3198_v14  ;;  %v2937_v51 = vadd.f32 %v2936_v12, %v2847_v60  ;;  %v2099_v33 = vpop.f32.mrf.mxu1  ;;  %v3027_v23 = vpop.f32.mrf.mxu0 }
 0x2c2   : > { %v2100_v10 = vadd.f32 %v2099_v33, %v5113_v0 }
 0x2c3   : > { %v3026_v46 = vadd.f32 %v3025_v26, %v2937_v51 }
 0x2c5   : > { %v3066_v13 = vadd.f32 %v3026_v46, %v2098_v57 }
 0x2c7   : > { %v3161_v32 = vadd.f32 %v3160_v42, %v3066_v13  ;;  %v3199_v45 = vmul.f32 %v3066_v13, %v3066_v13 }
 0x2c8   : > { %v2849_v63 = vpop.f32.mrf.mxu2  ;;  %v2938_v24 = vpop.f32.mrf.mxu3 }
 0x2c9   : > { %v3230_v15 = vadd.f32 %v3229_v4, %v3199_v45  ;;  %v2939_v35 = vadd.f32 %v2938_v24, %v2849_v63  ;;  %v2102_v44 = vpop.f32.mrf.mxu1  ;;  %v3030_v40 = vpop.f32.mrf.mxu0 }
 0x2ca   : > { %v2103_v59 = vadd.f32 %v2102_v44, %v5118_v16 }
 0x2cb   : > { %v3028_v61 = vadd.f32 %v3027_v23, %v2939_v35 }
 0x2cd   : > { %v3067_v53 = vadd.f32 %v3028_v61, %v2100_v10 }
 0x2cf   : > { %v4294_v41 = vpack.c.bf16 %v3067_v53, %v3066_v13  ;;  %v3162_v6 = vadd.f32 %v3161_v32, %v3067_v53  ;;  %v3200_v39 = vmul.f32 %v3067_v53, %v3067_v53 }
 0x2d0   : > { %v2852_v38 = vpop.f32.mrf.mxu2  ;;  %v2941_v54 = vpop.f32.mrf.mxu3 }
 0x2d1   : > { %4318 = vst [vmem:[%s5154_s7 + $0x68] sm:$0xff] %v4294_v41   ;;  %v3231_v7 = vadd.f32 %v3230_v15, %v3200_v39  ;;  %v2942_v11 = vadd.f32 %v2941_v54, %v2852_v38  ;;  %v2104_v9 = vpop.f32.mrf.mxu1  ;;  %v3032_v43 = vpop.f32.mrf.mxu0 }
 0x2d2   : > { %v2105_v36 = vadd.f32 %v2104_v9, %v5126_v29 }
 0x2d3   : > { %v3031_v50 = vadd.f32 %v3030_v40, %v2942_v11 }
 0x2d5   : > { %v3068_v30 = vadd.f32 %v3031_v50, %v2103_v59 }
 0x2d7   : > { %v3163_v62 = vadd.f32 %v3162_v6, %v3068_v30  ;;  %v3201_v0 = vmul.f32 %v3068_v30, %v3068_v30 }
 0x2d8   : > { %v2854_v8 = vpop.f32.mrf.mxu2  ;;  %v2943_v3 = vpop.f32.mrf.mxu3 }
 0x2d9   : > { %v3232_v18 = vadd.f32 %v3231_v7, %v3201_v0  ;;  %v2944_v58 = vadd.f32 %v2943_v3, %v2854_v8  ;;  %v2107_v47 = vpop.f32.mrf.mxu1  ;;  %v3035_v16 = vpop.f32.mrf.mxu0 }
 0x2da   : > { %v2108_v22 = vadd.f32 %v2107_v47, %v5131_v37 }
 0x2db   : > { %v3033_v27 = vadd.f32 %v3032_v43, %v2944_v58 }
 0x2dd   : > { %v3069_v21 = vadd.f32 %v3033_v27, %v2105_v36 }
 0x2df   : > { %v4299_v17 = vpack.c.bf16 %v3069_v21, %v3068_v30  ;;  %v3164_v28 = vadd.f32 %v3163_v62, %v3069_v21  ;;  %v3202_v2 = vmul.f32 %v3069_v21, %v3069_v21 }
 0x2e0   : > { %v2857_v48 = vpop.f32.mrf.mxu2  ;;  %v2946_v56 = vpop.f32.mrf.mxu3 }
 0x2e1   : > { %4319 = vst [vmem:[%s5154_s7 + $0x70] sm:$0xff] %v4299_v17   ;;  %v3233_v19 = vadd.f32 %v3232_v18, %v3202_v2  ;;  %v2947_v49 = vadd.f32 %v2946_v56, %v2857_v48  ;;  %v2109_v29 = vpop.f32.mrf.mxu1  ;;  %v3037_v42 = vpop.f32.mrf.mxu0 }
 0x2e2   : > { %v2110_v14 = vadd.f32 %v2109_v29, %v5139_v31 }
 0x2e3   : > { %v3036_v20 = vadd.f32 %v3035_v16, %v2947_v49 }
 0x2e5   : > { %v3070_v34 = vadd.f32 %v3036_v20, %v2108_v22 }
 0x2e7   : > { %v3165_v25 = vadd.f32 %v3164_v28, %v3070_v34  ;;  %v3203_v26 = vmul.f32 %v3070_v34, %v3070_v34 }
 0x2e8   : > { %v2859_v5 = vpop.f32.mrf.mxu2  ;;  %v2948_v1 = vpop.f32.mrf.mxu3 }
 0x2e9   : > { %v3234_v55 = vadd.f32 %v3233_v19, %v3203_v26  ;;  %v2949_v52 = vadd.f32 %v2948_v1, %v2859_v5 }
 0x2eb   : > { %v3038_v60 = vadd.f32 %v3037_v42, %v2949_v52 }
 0x2ed   : > { %v3071_v12 = vadd.f32 %v3038_v60, %v2110_v14 }
 0x2ef   : > { %v4304_v4 = vpack.c.bf16 %v3071_v12, %v3070_v34  ;;  %v3166_v51 = vadd.f32 %v3165_v25, %v3071_v12  ;;  %v3204_v33 = vmul.f32 %v3071_v12, %v3071_v12 }
 0x2f1   : > { %4320 = vst [vmem:[%s5154_s7 + $0x78] sm:$0xff] %v4304_v4   ;;  %v3167_v37 = vrot.slane %v3166_v51, 4  ;;  %v3235_v23 = vadd.f32 %v3234_v55, %v3204_v33 }
 0x2f3   : > { %v3168_v57 = vadd.f32 %v3167_v37, %v3166_v51  ;;  %v3236_v46 = vrot.slane %v3235_v23, 4 }
 0x2f5   : > { %v3169_v13 = vrot.slane %v3168_v57, 2  ;;  %v3237_v32 = vadd.f32 %v3236_v46, %v3235_v23 }
 0x2f7   : > { %v3170_v45 = vadd.f32 %v3169_v13, %v3168_v57  ;;  %v3238_v63 = vrot.slane %v3237_v32, 2 }
 0x2f9   : > { %v3171_v24 = vrot.slane %v3170_v45, 1  ;;  %v3239_v15 = vadd.f32 %v3238_v63, %v3237_v32 }
 0x2fb   : > { %v3240_v35 = vrot.slane %v3239_v15, 1  ;;  %v3172_v31 = vadd.f32 %v3171_v24, %v3170_v45 }
 0x2fd   : > { %v3241_v44 = vadd.f32 %v3240_v35, %v3239_v15 }
 0x2ff   : > { %v3243_v10 = vsel %vm3242_vm2, %v3172_v31, %v3241_v44 }
 0x300   : > { %3244 = vst [vmem:[%s254_s11] sm:$0x3] %v3243_v10 }
 0x301 PF: > { %s14_s14 = sadd.s32 1, %s4412_s14   ;;  %s5292_s12 = smov %s4408_s13 }
 0x302   : > { %p11_p5 = scmp.ge.s32.totalorder %s14_s14, 4   ;;  %s5293_s13 = smov %s5295_s15 }
 0x304   :  { %13 = sbr.rel (!%p11_p5) target bundleno = 2 (0x2), region = 78 }

</bundles_post_ra>
